<compile_context>
chip_gen: v7x
topology: tpu7x:2x2x1
jax: 0.10.0
libtpu: 0.0.40
codegen_flags: <defaults>
</compile_context>

<pallas_src>
import functools

import jax
import jax.numpy as jnp
from jax import lax
from jax.experimental import pallas as pl
from jax.experimental.pallas import tpu as pltpu


# ------------------------------ Fused kernel --------------------------------
def _cbam_kernel(x_ref, w1_ref, b1_ref, w2_ref, b2_ref, wc_ref, bc_ref,
                 out_ref, pmaps_ref, *, H, W, pad):
    bt, C, HW = x_ref.shape

    w1 = w1_ref[...]                                   # (hidden, C)
    b1 = b1_ref[...]                                   # (hidden, 1)
    w2 = w2_ref[...]                                   # (C, hidden)
    b2 = b2_ref[...]                                   # (C, 1)

    # Zero the padded-map scratch once per grid step; the interior is fully
    # overwritten per batch element, the halo stays zero (== conv padding=3).
    pmaps_ref[...] = jnp.zeros_like(pmaps_ref)

    # Batch-independent helpers, hoisted out of the batch loop.
    col = lax.broadcasted_iota(jnp.int32, (1, HW), 1) % W
    col_ok = {dj: jnp.logical_and(col >= -dj, col < W - dj)
              for dj in range(-3, 4)}
    sel_avg = lax.broadcasted_iota(jnp.int32, (C, 2), 1) == 0   # col0=avg, col1=max

    for b in range(bt):
        x = x_ref[b].astype(jnp.float32)               # (C, HW), lane dense

        # ------------------------ channel attention -------------------------
        avg_c = jnp.mean(x, axis=1, keepdims=True)     # (C, 1)
        max_c = jnp.max(x, axis=1, keepdims=True)      # (C, 1)
        v = jnp.where(sel_avg, avg_c, max_c)           # (C, 2): one MLP pass
        h = jnp.dot(w1, v, preferred_element_type=jnp.float32) + b1
        h = jnp.maximum(h, 0.0)
        o = jnp.dot(w2, h, preferred_element_type=jnp.float32) + b2    # (C, 2)
        gate_c = jax.nn.sigmoid(jnp.sum(o, axis=1, keepdims=True))     # (C, 1)
        y = x * gate_c                                 # channel-gated features

        # ------------------------ spatial attention --------------------------
        amap = jnp.mean(y, axis=0, keepdims=True)      # (1, HW)
        mmap = jnp.max(y, axis=0, keepdims=True)       # (1, HW)
        pmaps_ref[0:1, pad:pad + HW] = amap            # interior of padded maps
        pmaps_ref[1:2, pad:pad + HW] = mmap

        # 7x7 conv (2 -> 1 channels) in the flattened lane domain.
        acc = jnp.full((1, HW), bc_ref[0], dtype=jnp.float32)
        for dj in range(-3, 4):
            ok = col_ok[dj]
            for di in range(-3, 4):
                s = di * W + dj
                win = pmaps_ref[:, pad + s:pad + s + HW]      # (2, HW) shifted view
                k = (di + 3) * 7 + (dj + 3)
                contrib = (wc_ref[0, k] * win[0:1, :]
                           + wc_ref[1, k] * win[1:2, :])
                acc = acc + jnp.where(ok, contrib, 0.0)
        gate_s = jax.nn.sigmoid(acc)                   # (1, HW)

        out_ref[b] = (y * gate_s).astype(out_ref.dtype)


# ------------------------------- Wrapper -------------------------------------
def _pick_batch_block(B, C, HW, itemsize, vmem_budget_bytes=4 << 20):
    """Largest divisor of B whose x-block fits the budget, preferring >=2 grid
    steps so both v7x TensorCores get work."""
    max_bt = max(1, vmem_budget_bytes // max(1, C * HW * itemsize))
    for bt in range(min(B, max_bt), 0, -1):
        if B % bt == 0 and (B // bt >= 2 or B == 1):
            return bt
    return 1


def cbam_forward(x, params, *, batch_block=None):
    B, C, H, W = x.shape
    HW = H * W
    w1, b1, w2, b2, wc, bc = (params[k] for k in ("w1", "b1", "w2", "b2", "wc", "bc"))
    hidden = w1.shape[0]

    bt = batch_block if batch_block is not None else _pick_batch_block(
        B, C, HW, x.dtype.itemsize)
    assert B % bt == 0
    grid = (B // bt,)

    # Lane-dense layout: minor dim becomes H*W (free metadata reshape in XLA).
    x_flat = x.reshape(B, C, HW)
    wc_flat = wc.reshape(2, 49).astype(jnp.float32)    # (1,2,7,7) -> (2,49)
    bc_f = bc.astype(jnp.float32)

    # Lane-aligned halo that covers the max flattened conv shift (3*W + 3).
    pad = -(-(3 * W + 3) // 128) * 128

    kernel = functools.partial(_cbam_kernel, H=H, W=W, pad=pad)

    out_flat = pl.pallas_call(
        kernel,
        out_shape=jax.ShapeDtypeStruct((B, C, HW), x.dtype),
        grid=grid,
        in_specs=[
            pl.BlockSpec((bt, C, HW), lambda i: (i, 0, 0)),
            pl.BlockSpec((hidden, C), lambda i: (0, 0)),
            pl.BlockSpec((hidden, 1), lambda i: (0, 0)),
            pl.BlockSpec((C, hidden), lambda i: (0, 0)),
            pl.BlockSpec((C, 1), lambda i: (0, 0)),
            pl.BlockSpec(memory_space=pltpu.MemorySpace.SMEM),   # conv weights (2,49)
            pl.BlockSpec(memory_space=pltpu.MemorySpace.SMEM),   # conv bias (1,)
        ],
        out_specs=pl.BlockSpec((bt, C, HW), lambda i: (i, 0, 0)),
        scratch_shapes=[pltpu.VMEM((2, HW + 2 * pad), jnp.float32)],
        compiler_params=pltpu.CompilerParams(
            dimension_semantics=("parallel",),
            vmem_limit_bytes=32 * 1024 * 1024),
    )(x_flat, w1, b1, w2, b2, wc_flat, bc_f)
    return out_flat.reshape(B, C, H, W)


# --------------------------- Pure-JAX reference -------------------------------
def cbam_reference(x, params):
    w1, b1, w2, b2, wc, bc = (params[k] for k in ("w1", "b1", "w2", "b2", "wc", "bc"))
    avg = jnp.mean(x, axis=(2, 3))                                # (B, C)
    mx = jnp.max(x, axis=(2, 3))                                  # (B, C)

    def fc(v):
        h = jnp.maximum(v @ w1.T + b1[:, 0], 0.0)
        return h @ w2.T + b2[:, 0]

    gate = jax.nn.sigmoid(fc(avg) + fc(mx))[:, :, None, None]
    y = x * gate
    amap = jnp.mean(y, axis=1, keepdims=True)
    mmap = jnp.max(y, axis=1, keepdims=True)
    p = jnp.concatenate([amap, mmap], axis=1)
    s = lax.conv_general_dilated(p, wc, window_strides=(1, 1),
                                 padding=[(3, 3), (3, 3)],
                                 dimension_numbers=("NCHW", "OIHW", "NCHW")) + bc[0]
    return y * jax.nn.sigmoid(s)


def init_params(key, channels, reduction_ratio=16):
    hidden = channels // reduction_ratio
    ks = jax.random.split(key, 6)
    scale = 0.1
    return {
        "w1": scale * jax.random.normal(ks[0], (hidden, channels), jnp.float32),
        "b1": scale * jax.random.normal(ks[1], (hidden, 1), jnp.float32),
        "w2": scale * jax.random.normal(ks[2], (channels, hidden), jnp.float32),
        "b2": scale * jax.random.normal(ks[3], (channels, 1), jnp.float32),
        "wc": scale * jax.random.normal(ks[4], (1, 2, 7, 7), jnp.float32),
        "bc": scale * jax.random.normal(ks[5], (1,), jnp.float32),
    }


if __name__ == "__main__":
    # Primary config: channels=32, reduction=16 -> hidden=2.
    B, C, H, W = 2, 32, 16, 16
    key = jax.random.PRNGKey(0)
    kx, kp = jax.random.split(key)
    x = jax.random.normal(kx, (B, C, H, W), jnp.float32)
    params = init_params(kp, C, reduction_ratio=16)

    out = jax.block_until_ready(cbam_forward(x, params))
    ref = cbam_reference(x, params)
    assert out.shape == (B, C, H, W)
    assert jnp.allclose(out, ref, rtol=2e-5, atol=2e-5), "mismatch vs reference"

    # Secondary config exercising the multi-batch-per-step path (bt=2) and
    # non-square spatial dims.
    B2, C2, H2, W2 = 4, 16, 8, 16
    k2x, k2p = jax.random.split(jax.random.PRNGKey(0), 2)
    x2 = jax.random.normal(k2x, (B2, C2, H2, W2), jnp.float32)
    params2 = init_params(k2p, C2, reduction_ratio=8)
    out2 = jax.block_until_ready(cbam_forward(x2, params2))
    ref2 = cbam_reference(x2, params2)
    assert jnp.allclose(out2, ref2, rtol=2e-5, atol=2e-5), "mismatch vs reference (bt=2)"

    print("KERNEL_OK")
</pallas_src>

<mosaic_0001>
module attributes {stable_mosaic.version = 11 : i64} {
  func.func @_cbam_kernel(%arg0: i32, %arg1: memref<1x32x256xf32, #tpu.memory_space<vmem>>, %arg2: memref<2x32xf32, #tpu.memory_space<vmem>>, %arg3: memref<2x1xf32, #tpu.memory_space<vmem>>, %arg4: memref<32x2xf32, #tpu.memory_space<vmem>>, %arg5: memref<32x1xf32, #tpu.memory_space<vmem>>, %arg6: memref<2x49xf32, #tpu.memory_space<smem>>, %arg7: memref<1xf32, #tpu.memory_space<smem>>, %arg8: memref<1x32x256xf32, #tpu.memory_space<vmem>>, %arg9: memref<2x512xf32, #tpu.memory_space<vmem>>) attributes {dimension_semantics = [#tpu.dimension_semantics<parallel>], iteration_bounds = array<i64: 2>, scalar_prefetch = 0 : i64, scratch_operands = 1 : i64, tpu.core_type = #tpu.core_type<tc>, window_params = [{transform_indices = @transform_0, window_bounds = array<i64: 1, 32, 256>}, {pipeline_mode = #tpu.pipeline_mode<synchronous>, transform_indices = @transform_1, window_bounds = array<i64: 2, 32>}, {pipeline_mode = #tpu.pipeline_mode<synchronous>, transform_indices = @transform_2, window_bounds = array<i64: 2, 1>}, {pipeline_mode = #tpu.pipeline_mode<synchronous>, transform_indices = @transform_3, window_bounds = array<i64: 32, 2>}, {pipeline_mode = #tpu.pipeline_mode<synchronous>, transform_indices = @transform_4, window_bounds = array<i64: 32, 1>}, {transform_indices = @transform_5, window_bounds = array<i64: 2, 49>}, {transform_indices = @transform_6, window_bounds = array<i64: 1>}, {transform_indices = @transform_7, window_bounds = array<i64: 1, 32, 256>}]} {
    %c0 = arith.constant 0 : index
    %c0_0 = arith.constant 0 : index
    %0 = vector.load %arg2[%c0, %c0_0] : memref<2x32xf32, #tpu.memory_space<vmem>>, vector<2x32xf32>
    %c0_1 = arith.constant 0 : index
    %c0_2 = arith.constant 0 : index
    %1 = vector.load %arg3[%c0_1, %c0_2] : memref<2x1xf32, #tpu.memory_space<vmem>>, vector<2x1xf32>
    %c0_3 = arith.constant 0 : index
    %c0_4 = arith.constant 0 : index
    %2 = vector.load %arg4[%c0_3, %c0_4] : memref<32x2xf32, #tpu.memory_space<vmem>>, vector<32x2xf32>
    %c0_5 = arith.constant 0 : index
    %c0_6 = arith.constant 0 : index
    %3 = vector.load %arg5[%c0_5, %c0_6] : memref<32x1xf32, #tpu.memory_space<vmem>>, vector<32x1xf32>
    %cst = arith.constant 0.000000e+00 : f32
    %4 = vector.broadcast %cst : f32 to vector<2x512xf32>
    %c0_7 = arith.constant 0 : index
    %c0_8 = arith.constant 0 : index
    %5 = vector.load %arg9[%c0_7, %c0_8] : memref<2x512xf32, #tpu.memory_space<vmem>>, vector<2x512xf32>
    tpu.vector_store %arg9[%c0_7, %c0_8], %4 {strides = array<i32>} : memref<2x512xf32, #tpu.memory_space<vmem>>, vector<2x512xf32>,
    %6 = tpu.iota {dimensions = array<i32: 1>} : vector<1x256xi32>
    %c16_i32 = arith.constant 16 : i32
    %c0_i32 = arith.constant 0 : i32
    %7 = arith.cmpi eq, %c16_i32, %c0_i32 : i32
    %c1_i32 = arith.constant 1 : i32
    %8 = arith.select %7, %c1_i32, %c16_i32 : i32
    %9 = vector.broadcast %8 : i32 to vector<1x256xi32>
    %10 = arith.remsi %6, %9 : vector<1x256xi32>
    %c0_i32_9 = arith.constant 0 : i32
    %11 = vector.broadcast %c0_i32_9 : i32 to vector<1x256xi32>
    %12 = arith.cmpi ne, %10, %11 : vector<1x256xi32>
    %c0_i32_10 = arith.constant 0 : i32
    %13 = vector.broadcast %c0_i32_10 : i32 to vector<1x256xi32>
    %14 = arith.cmpi slt, %10, %13 : vector<1x256xi32>
    %c0_i32_11 = arith.constant 0 : i32
    %15 = arith.cmpi slt, %8, %c0_i32_11 : i32
    %16 = vector.broadcast %15 : i1 to vector<1x256xi1>
    %17 = vector.broadcast %16 : vector<1x256xi1> to vector<1x256xi1>
    %18 = arith.xori %14, %17 : vector<1x256xi1>
    %19 = arith.andi %18, %12 : vector<1x256xi1>
    %20 = vector.broadcast %8 : i32 to vector<1x256xi32>
    %21 = arith.addi %10, %20 : vector<1x256xi32>
    %22 = arith.select %19, %21, %10 : vector<1x256xi1>, vector<1x256xi32>
    %c3_i32 = arith.constant 3 : i32
    %23 = vector.broadcast %c3_i32 : i32 to vector<1x256xi32>
    %24 = arith.cmpi sge, %22, %23 : vector<1x256xi32>
    %c19_i32 = arith.constant 19 : i32
    %25 = vector.broadcast %c19_i32 : i32 to vector<1x256xi32>
    %26 = arith.cmpi slt, %22, %25 : vector<1x256xi32>
    %27 = arith.andi %24, %26 : vector<1x256xi1>
    %c2_i32 = arith.constant 2 : i32
    %28 = vector.broadcast %c2_i32 : i32 to vector<1x256xi32>
    %29 = arith.cmpi sge, %22, %28 : vector<1x256xi32>
    %c18_i32 = arith.constant 18 : i32
    %30 = vector.broadcast %c18_i32 : i32 to vector<1x256xi32>
    %31 = arith.cmpi slt, %22, %30 : vector<1x256xi32>
    %32 = arith.andi %29, %31 : vector<1x256xi1>
    %c1_i32_12 = arith.constant 1 : i32
    %33 = vector.broadcast %c1_i32_12 : i32 to vector<1x256xi32>
    %34 = arith.cmpi sge, %22, %33 : vector<1x256xi32>
    %c17_i32 = arith.constant 17 : i32
    %35 = vector.broadcast %c17_i32 : i32 to vector<1x256xi32>
    %36 = arith.cmpi slt, %22, %35 : vector<1x256xi32>
    %37 = arith.andi %34, %36 : vector<1x256xi1>
    %c0_i32_13 = arith.constant 0 : i32
    %38 = vector.broadcast %c0_i32_13 : i32 to vector<1x256xi32>
    %39 = arith.cmpi sge, %22, %38 : vector<1x256xi32>
    %c16_i32_14 = arith.constant 16 : i32
    %40 = vector.broadcast %c16_i32_14 : i32 to vector<1x256xi32>
    %41 = arith.cmpi slt, %22, %40 : vector<1x256xi32>
    %42 = arith.andi %39, %41 : vector<1x256xi1>
    %c-1_i32 = arith.constant -1 : i32
    %43 = vector.broadcast %c-1_i32 : i32 to vector<1x256xi32>
    %44 = arith.cmpi sge, %22, %43 : vector<1x256xi32>
    %c15_i32 = arith.constant 15 : i32
    %45 = vector.broadcast %c15_i32 : i32 to vector<1x256xi32>
    %46 = arith.cmpi slt, %22, %45 : vector<1x256xi32>
    %47 = arith.andi %44, %46 : vector<1x256xi1>
    %c-2_i32 = arith.constant -2 : i32
    %48 = vector.broadcast %c-2_i32 : i32 to vector<1x256xi32>
    %49 = arith.cmpi sge, %22, %48 : vector<1x256xi32>
    %c14_i32 = arith.constant 14 : i32
    %50 = vector.broadcast %c14_i32 : i32 to vector<1x256xi32>
    %51 = arith.cmpi slt, %22, %50 : vector<1x256xi32>
    %52 = arith.andi %49, %51 : vector<1x256xi1>
    %c-3_i32 = arith.constant -3 : i32
    %53 = vector.broadcast %c-3_i32 : i32 to vector<1x256xi32>
    %54 = arith.cmpi sge, %22, %53 : vector<1x256xi32>
    %c13_i32 = arith.constant 13 : i32
    %55 = vector.broadcast %c13_i32 : i32 to vector<1x256xi32>
    %56 = arith.cmpi slt, %22, %55 : vector<1x256xi32>
    %57 = arith.andi %54, %56 : vector<1x256xi1>
    %58 = tpu.iota {dimensions = array<i32: 1>} : vector<32x2xi32>
    %c0_i32_15 = arith.constant 0 : i32
    %59 = vector.broadcast %c0_i32_15 : i32 to vector<32x2xi32>
    %60 = arith.cmpi eq, %58, %59 : vector<32x2xi32>
    %c0_16 = arith.constant 0 : index
    %c0_17 = arith.constant 0 : index
    %c0_18 = arith.constant 0 : index
    %61 = vector.load %arg1[%c0_16, %c0_17, %c0_18] : memref<1x32x256xf32, #tpu.memory_space<vmem>>, vector<1x32x256xf32>
    %62 = vector.shape_cast %61 : vector<1x32x256xf32> to vector<32x256xf32>
    %cst_19 = arith.constant dense<0.000000e+00> : vector<32xf32>
    %63 = vector.multi_reduction <add>, %62, %cst_19 [1] : vector<32x256xf32> to vector<32xf32>
    %64 = vector.shape_cast %63 : vector<32xf32> to vector<32x1xf32>
    %cst_20 = arith.constant 2.560000e+02 : f32
    %65 = vector.broadcast %cst_20 : f32 to vector<32x1xf32>
    %66 = arith.divf %64, %65 : vector<32x1xf32>
    %cst_21 = arith.constant dense<0xFF800000> : vector<32xf32>
    %67 = vector.multi_reduction <maximumf>, %62, %cst_21 [1] : vector<32x256xf32> to vector<32xf32>
    %68 = vector.shape_cast %67 : vector<32xf32> to vector<32x1xf32>
    %69 = vector.shape_cast %66 : vector<32x1xf32> to vector<32x1xf32>
    %70 = vector.broadcast %69 : vector<32x1xf32> to vector<32x2xf32>
    %71 = vector.shape_cast %68 : vector<32x1xf32> to vector<32x1xf32>
    %72 = vector.broadcast %71 : vector<32x1xf32> to vector<32x2xf32>
    %73 = arith.select %60, %70, %72 : vector<32x2xi1>, vector<32x2xf32>
    %cst_22 = arith.constant dense<0.000000e+00> : vector<2x2xf32>
    %74 = tpu.matmul %0, %73, %cst_22 {dimension_numbers = #tpu.dot_dimension_numbers<[1], [0], [0], [1], [0, 0, 1, 1], [], []>} : vector<2x32xf32>, vector<32x2xf32>, vector<2x2xf32> -> vector<2x2xf32>
    %75 = vector.broadcast %1 : vector<2x1xf32> to vector<2x2xf32>
    %76 = arith.addf %74, %75 : vector<2x2xf32>
    %cst_23 = arith.constant 0.000000e+00 : f32
    %77 = vector.broadcast %cst_23 : f32 to vector<2x2xf32>
    %78 = arith.maximumf %76, %77 : vector<2x2xf32>
    %cst_24 = arith.constant dense<0.000000e+00> : vector<32x2xf32>
    %79 = tpu.matmul %2, %78, %cst_24 {dimension_numbers = #tpu.dot_dimension_numbers<[1], [0], [0], [1], [0, 0, 1, 1], [], []>} : vector<32x2xf32>, vector<2x2xf32>, vector<32x2xf32> -> vector<32x2xf32>
    %80 = vector.broadcast %3 : vector<32x1xf32> to vector<32x2xf32>
    %81 = arith.addf %79, %80 : vector<32x2xf32>
    %cst_25 = arith.constant dense<0.000000e+00> : vector<32xf32>
    %82 = vector.multi_reduction <add>, %81, %cst_25 [1] : vector<32x2xf32> to vector<32xf32>
    %83 = vector.shape_cast %82 : vector<32xf32> to vector<32x1xf32>
    %84 = arith.negf %83 : vector<32x1xf32>
    %85 = math.exp %84 : vector<32x1xf32>
    %cst_26 = arith.constant 1.000000e+00 : f32
    %86 = vector.broadcast %cst_26 : f32 to vector<32x1xf32>
    %87 = arith.addf %86, %85 : vector<32x1xf32>
    %88 = arith.divf %86, %87 : vector<32x1xf32>
    %89 = vector.broadcast %88 : vector<32x1xf32> to vector<32x256xf32>
    %90 = arith.mulf %62, %89 : vector<32x256xf32>
    %cst_27 = arith.constant dense<0.000000e+00> : vector<256xf32>
    %91 = vector.multi_reduction <add>, %90, %cst_27 [0] : vector<32x256xf32> to vector<256xf32>
    %92 = vector.shape_cast %91 : vector<256xf32> to vector<1x256xf32>
    %cst_28 = arith.constant 3.200000e+01 : f32
    %93 = vector.broadcast %cst_28 : f32 to vector<1x256xf32>
    %94 = arith.divf %92, %93 : vector<1x256xf32>
    %cst_29 = arith.constant dense<0xFF800000> : vector<256xf32>
    %95 = vector.multi_reduction <maximumf>, %90, %cst_29 [0] : vector<32x256xf32> to vector<256xf32>
    %96 = vector.shape_cast %95 : vector<256xf32> to vector<1x256xf32>
    %c0_30 = arith.constant 0 : index
    %c128 = arith.constant 128 : index
    %97 = vector.load %arg9[%c0_30, %c128] : memref<2x512xf32, #tpu.memory_space<vmem>>, vector<1x256xf32>
    tpu.vector_store %arg9[%c0_30, %c128], %94 {strides = array<i32>} : memref<2x512xf32, #tpu.memory_space<vmem>>, vector<1x256xf32>,
    %c1 = arith.constant 1 : index
    %c128_31 = arith.constant 128 : index
    %98 = vector.load %arg9[%c1, %c128_31] : memref<2x512xf32, #tpu.memory_space<vmem>>, vector<1x256xf32>
    tpu.vector_store %arg9[%c1, %c128_31], %96 {strides = array<i32>} : memref<2x512xf32, #tpu.memory_space<vmem>>, vector<1x256xf32>,
    %c0_32 = arith.constant 0 : index
    %99 = memref.load %arg7[%c0_32] : memref<1xf32, #tpu.memory_space<smem>>
    %100 = vector.broadcast %99 : f32 to vector<1x256xf32>
    %c0_33 = arith.constant 0 : index
    %c77 = arith.constant 77 : index
    %101 = vector.load %arg9[%c0_33, %c77] : memref<2x512xf32, #tpu.memory_space<vmem>>, vector<2x256xf32>
    %c0_34 = arith.constant 0 : index
    %c0_35 = arith.constant 0 : index
    %102 = memref.load %arg6[%c0_34, %c0_35] : memref<2x49xf32, #tpu.memory_space<smem>>
    %103 = vector.extract_strided_slice %101 {offsets = [0, 0], sizes = [1, 256], strides = [1, 1]} : vector<2x256xf32> to vector<1x256xf32>
    %104 = vector.broadcast %102 : f32 to vector<1x256xf32>
    %105 = arith.mulf %104, %103 : vector<1x256xf32>
    %c1_36 = arith.constant 1 : index
    %c0_37 = arith.constant 0 : index
    %106 = memref.load %arg6[%c1_36, %c0_37] : memref<2x49xf32, #tpu.memory_space<smem>>
    %107 = vector.extract_strided_slice %101 {offsets = [1, 0], sizes = [1, 256], strides = [1, 1]} : vector<2x256xf32> to vector<1x256xf32>
    %108 = vector.broadcast %106 : f32 to vector<1x256xf32>
    %109 = arith.mulf %108, %107 : vector<1x256xf32>
    %110 = arith.addf %105, %109 : vector<1x256xf32>
    %cst_38 = arith.constant 0.000000e+00 : f32
    %111 = vector.broadcast %cst_38 : f32 to vector<1x256xf32>
    %112 = arith.select %27, %110, %111 : vector<1x256xi1>, vector<1x256xf32>
    %113 = arith.addf %100, %112 : vector<1x256xf32>
    %c0_39 = arith.constant 0 : index
    %c93 = arith.constant 93 : index
    %114 = vector.load %arg9[%c0_39, %c93] : memref<2x512xf32, #tpu.memory_space<vmem>>, vector<2x256xf32>
    %c0_40 = arith.constant 0 : index
    %c7 = arith.constant 7 : index
    %115 = memref.load %arg6[%c0_40, %c7] : memref<2x49xf32, #tpu.memory_space<smem>>
    %116 = vector.extract_strided_slice %114 {offsets = [0, 0], sizes = [1, 256], strides = [1, 1]} : vector<2x256xf32> to vector<1x256xf32>
    %117 = vector.broadcast %115 : f32 to vector<1x256xf32>
    %118 = arith.mulf %117, %116 : vector<1x256xf32>
    %c1_41 = arith.constant 1 : index
    %c7_42 = arith.constant 7 : index
    %119 = memref.load %arg6[%c1_41, %c7_42] : memref<2x49xf32, #tpu.memory_space<smem>>
    %120 = vector.extract_strided_slice %114 {offsets = [1, 0], sizes = [1, 256], strides = [1, 1]} : vector<2x256xf32> to vector<1x256xf32>
    %121 = vector.broadcast %119 : f32 to vector<1x256xf32>
    %122 = arith.mulf %121, %120 : vector<1x256xf32>
    %123 = arith.addf %118, %122 : vector<1x256xf32>
    %cst_43 = arith.constant 0.000000e+00 : f32
    %124 = vector.broadcast %cst_43 : f32 to vector<1x256xf32>
    %125 = arith.select %27, %123, %124 : vector<1x256xi1>, vector<1x256xf32>
    %126 = arith.addf %113, %125 : vector<1x256xf32>
    %c0_44 = arith.constant 0 : index
    %c109 = arith.constant 109 : index
    %127 = vector.load %arg9[%c0_44, %c109] : memref<2x512xf32, #tpu.memory_space<vmem>>, vector<2x256xf32>
    %c0_45 = arith.constant 0 : index
    %c14 = arith.constant 14 : index
    %128 = memref.load %arg6[%c0_45, %c14] : memref<2x49xf32, #tpu.memory_space<smem>>
    %129 = vector.extract_strided_slice %127 {offsets = [0, 0], sizes = [1, 256], strides = [1, 1]} : vector<2x256xf32> to vector<1x256xf32>
    %130 = vector.broadcast %128 : f32 to vector<1x256xf32>
    %131 = arith.mulf %130, %129 : vector<1x256xf32>
    %c1_46 = arith.constant 1 : index
    %c14_47 = arith.constant 14 : index
    %132 = memref.load %arg6[%c1_46, %c14_47] : memref<2x49xf32, #tpu.memory_space<smem>>
    %133 = vector.extract_strided_slice %127 {offsets = [1, 0], sizes = [1, 256], strides = [1, 1]} : vector<2x256xf32> to vector<1x256xf32>
    %134 = vector.broadcast %132 : f32 to vector<1x256xf32>
    %135 = arith.mulf %134, %133 : vector<1x256xf32>
    %136 = arith.addf %131, %135 : vector<1x256xf32>
    %cst_48 = arith.constant 0.000000e+00 : f32
    %137 = vector.broadcast %cst_48 : f32 to vector<1x256xf32>
    %138 = arith.select %27, %136, %137 : vector<1x256xi1>, vector<1x256xf32>
    %139 = arith.addf %126, %138 : vector<1x256xf32>
    %c0_49 = arith.constant 0 : index
    %c125 = arith.constant 125 : index
    %140 = vector.load %arg9[%c0_49, %c125] : memref<2x512xf32, #tpu.memory_space<vmem>>, vector<2x256xf32>
    %c0_50 = arith.constant 0 : index
    %c21 = arith.constant 21 : index
    %141 = memref.load %arg6[%c0_50, %c21] : memref<2x49xf32, #tpu.memory_space<smem>>
    %142 = vector.extract_strided_slice %140 {offsets = [0, 0], sizes = [1, 256], strides = [1, 1]} : vector<2x256xf32> to vector<1x256xf32>
    %143 = vector.broadcast %141 : f32 to vector<1x256xf32>
    %144 = arith.mulf %143, %142 : vector<1x256xf32>
    %c1_51 = arith.constant 1 : index
    %c21_52 = arith.constant 21 : index
    %145 = memref.load %arg6[%c1_51, %c21_52] : memref<2x49xf32, #tpu.memory_space<smem>>
    %146 = vector.extract_strided_slice %140 {offsets = [1, 0], sizes = [1, 256], strides = [1, 1]} : vector<2x256xf32> to vector<1x256xf32>
    %147 = vector.broadcast %145 : f32 to vector<1x256xf32>
    %148 = arith.mulf %147, %146 : vector<1x256xf32>
    %149 = arith.addf %144, %148 : vector<1x256xf32>
    %cst_53 = arith.constant 0.000000e+00 : f32
    %150 = vector.broadcast %cst_53 : f32 to vector<1x256xf32>
    %151 = arith.select %27, %149, %150 : vector<1x256xi1>, vector<1x256xf32>
    %152 = arith.addf %139, %151 : vector<1x256xf32>
    %c0_54 = arith.constant 0 : index
    %c141 = arith.constant 141 : index
    %153 = vector.load %arg9[%c0_54, %c141] : memref<2x512xf32, #tpu.memory_space<vmem>>, vector<2x256xf32>
    %c0_55 = arith.constant 0 : index
    %c28 = arith.constant 28 : index
    %154 = memref.load %arg6[%c0_55, %c28] : memref<2x49xf32, #tpu.memory_space<smem>>
    %155 = vector.extract_strided_slice %153 {offsets = [0, 0], sizes = [1, 256], strides = [1, 1]} : vector<2x256xf32> to vector<1x256xf32>
    %156 = vector.broadcast %154 : f32 to vector<1x256xf32>
    %157 = arith.mulf %156, %155 : vector<1x256xf32>
    %c1_56 = arith.constant 1 : index
    %c28_57 = arith.constant 28 : index
    %158 = memref.load %arg6[%c1_56, %c28_57] : memref<2x49xf32, #tpu.memory_space<smem>>
    %159 = vector.extract_strided_slice %153 {offsets = [1, 0], sizes = [1, 256], strides = [1, 1]} : vector<2x256xf32> to vector<1x256xf32>
    %160 = vector.broadcast %158 : f32 to vector<1x256xf32>
    %161 = arith.mulf %160, %159 : vector<1x256xf32>
    %162 = arith.addf %157, %161 : vector<1x256xf32>
    %cst_58 = arith.constant 0.000000e+00 : f32
    %163 = vector.broadcast %cst_58 : f32 to vector<1x256xf32>
    %164 = arith.select %27, %162, %163 : vector<1x256xi1>, vector<1x256xf32>
    %165 = arith.addf %152, %164 : vector<1x256xf32>
    %c0_59 = arith.constant 0 : index
    %c157 = arith.constant 157 : index
    %166 = vector.load %arg9[%c0_59, %c157] : memref<2x512xf32, #tpu.memory_space<vmem>>, vector<2x256xf32>
    %c0_60 = arith.constant 0 : index
    %c35 = arith.constant 35 : index
    %167 = memref.load %arg6[%c0_60, %c35] : memref<2x49xf32, #tpu.memory_space<smem>>
    %168 = vector.extract_strided_slice %166 {offsets = [0, 0], sizes = [1, 256], strides = [1, 1]} : vector<2x256xf32> to vector<1x256xf32>
    %169 = vector.broadcast %167 : f32 to vector<1x256xf32>
    %170 = arith.mulf %169, %168 : vector<1x256xf32>
    %c1_61 = arith.constant 1 : index
    %c35_62 = arith.constant 35 : index
    %171 = memref.load %arg6[%c1_61, %c35_62] : memref<2x49xf32, #tpu.memory_space<smem>>
    %172 = vector.extract_strided_slice %166 {offsets = [1, 0], sizes = [1, 256], strides = [1, 1]} : vector<2x256xf32> to vector<1x256xf32>
    %173 = vector.broadcast %171 : f32 to vector<1x256xf32>
    %174 = arith.mulf %173, %172 : vector<1x256xf32>
    %175 = arith.addf %170, %174 : vector<1x256xf32>
    %cst_63 = arith.constant 0.000000e+00 : f32
    %176 = vector.broadcast %cst_63 : f32 to vector<1x256xf32>
    %177 = arith.select %27, %175, %176 : vector<1x256xi1>, vector<1x256xf32>
    %178 = arith.addf %165, %177 : vector<1x256xf32>
    %c0_64 = arith.constant 0 : index
    %c173 = arith.constant 173 : index
    %179 = vector.load %arg9[%c0_64, %c173] : memref<2x512xf32, #tpu.memory_space<vmem>>, vector<2x256xf32>
    %c0_65 = arith.constant 0 : index
    %c42 = arith.constant 42 : index
    %180 = memref.load %arg6[%c0_65, %c42] : memref<2x49xf32, #tpu.memory_space<smem>>
    %181 = vector.extract_strided_slice %179 {offsets = [0, 0], sizes = [1, 256], strides = [1, 1]} : vector<2x256xf32> to vector<1x256xf32>
    %182 = vector.broadcast %180 : f32 to vector<1x256xf32>
    %183 = arith.mulf %182, %181 : vector<1x256xf32>
    %c1_66 = arith.constant 1 : index
    %c42_67 = arith.constant 42 : index
    %184 = memref.load %arg6[%c1_66, %c42_67] : memref<2x49xf32, #tpu.memory_space<smem>>
    %185 = vector.extract_strided_slice %179 {offsets = [1, 0], sizes = [1, 256], strides = [1, 1]} : vector<2x256xf32> to vector<1x256xf32>
    %186 = vector.broadcast %184 : f32 to vector<1x256xf32>
    %187 = arith.mulf %186, %185 : vector<1x256xf32>
    %188 = arith.addf %183, %187 : vector<1x256xf32>
    %cst_68 = arith.constant 0.000000e+00 : f32
    %189 = vector.broadcast %cst_68 : f32 to vector<1x256xf32>
    %190 = arith.select %27, %188, %189 : vector<1x256xi1>, vector<1x256xf32>
    %191 = arith.addf %178, %190 : vector<1x256xf32>
    %c0_69 = arith.constant 0 : index
    %c78 = arith.constant 78 : index
    %192 = vector.load %arg9[%c0_69, %c78] : memref<2x512xf32, #tpu.memory_space<vmem>>, vector<2x256xf32>
    %c0_70 = arith.constant 0 : index
    %c1_71 = arith.constant 1 : index
    %193 = memref.load %arg6[%c0_70, %c1_71] : memref<2x49xf32, #tpu.memory_space<smem>>
    %194 = vector.extract_strided_slice %192 {offsets = [0, 0], sizes = [1, 256], strides = [1, 1]} : vector<2x256xf32> to vector<1x256xf32>
    %195 = vector.broadcast %193 : f32 to vector<1x256xf32>
    %196 = arith.mulf %195, %194 : vector<1x256xf32>
    %c1_72 = arith.constant 1 : index
    %c1_73 = arith.constant 1 : index
    %197 = memref.load %arg6[%c1_72, %c1_73] : memref<2x49xf32, #tpu.memory_space<smem>>
    %198 = vector.extract_strided_slice %192 {offsets = [1, 0], sizes = [1, 256], strides = [1, 1]} : vector<2x256xf32> to vector<1x256xf32>
    %199 = vector.broadcast %197 : f32 to vector<1x256xf32>
    %200 = arith.mulf %199, %198 : vector<1x256xf32>
    %201 = arith.addf %196, %200 : vector<1x256xf32>
    %cst_74 = arith.constant 0.000000e+00 : f32
    %202 = vector.broadcast %cst_74 : f32 to vector<1x256xf32>
    %203 = arith.select %32, %201, %202 : vector<1x256xi1>, vector<1x256xf32>
    %204 = arith.addf %191, %203 : vector<1x256xf32>
    %c0_75 = arith.constant 0 : index
    %c94 = arith.constant 94 : index
    %205 = vector.load %arg9[%c0_75, %c94] : memref<2x512xf32, #tpu.memory_space<vmem>>, vector<2x256xf32>
    %c0_76 = arith.constant 0 : index
    %c8 = arith.constant 8 : index
    %206 = memref.load %arg6[%c0_76, %c8] : memref<2x49xf32, #tpu.memory_space<smem>>
    %207 = vector.extract_strided_slice %205 {offsets = [0, 0], sizes = [1, 256], strides = [1, 1]} : vector<2x256xf32> to vector<1x256xf32>
    %208 = vector.broadcast %206 : f32 to vector<1x256xf32>
    %209 = arith.mulf %208, %207 : vector<1x256xf32>
    %c1_77 = arith.constant 1 : index
    %c8_78 = arith.constant 8 : index
    %210 = memref.load %arg6[%c1_77, %c8_78] : memref<2x49xf32, #tpu.memory_space<smem>>
    %211 = vector.extract_strided_slice %205 {offsets = [1, 0], sizes = [1, 256], strides = [1, 1]} : vector<2x256xf32> to vector<1x256xf32>
    %212 = vector.broadcast %210 : f32 to vector<1x256xf32>
    %213 = arith.mulf %212, %211 : vector<1x256xf32>
    %214 = arith.addf %209, %213 : vector<1x256xf32>
    %cst_79 = arith.constant 0.000000e+00 : f32
    %215 = vector.broadcast %cst_79 : f32 to vector<1x256xf32>
    %216 = arith.select %32, %214, %215 : vector<1x256xi1>, vector<1x256xf32>
    %217 = arith.addf %204, %216 : vector<1x256xf32>
    %c0_80 = arith.constant 0 : index
    %c110 = arith.constant 110 : index
    %218 = vector.load %arg9[%c0_80, %c110] : memref<2x512xf32, #tpu.memory_space<vmem>>, vector<2x256xf32>
    %c0_81 = arith.constant 0 : index
    %c15 = arith.constant 15 : index
    %219 = memref.load %arg6[%c0_81, %c15] : memref<2x49xf32, #tpu.memory_space<smem>>
    %220 = vector.extract_strided_slice %218 {offsets = [0, 0], sizes = [1, 256], strides = [1, 1]} : vector<2x256xf32> to vector<1x256xf32>
    %221 = vector.broadcast %219 : f32 to vector<1x256xf32>
    %222 = arith.mulf %221, %220 : vector<1x256xf32>
    %c1_82 = arith.constant 1 : index
    %c15_83 = arith.constant 15 : index
    %223 = memref.load %arg6[%c1_82, %c15_83] : memref<2x49xf32, #tpu.memory_space<smem>>
    %224 = vector.extract_strided_slice %218 {offsets = [1, 0], sizes = [1, 256], strides = [1, 1]} : vector<2x256xf32> to vector<1x256xf32>
    %225 = vector.broadcast %223 : f32 to vector<1x256xf32>
    %226 = arith.mulf %225, %224 : vector<1x256xf32>
    %227 = arith.addf %222, %226 : vector<1x256xf32>
    %cst_84 = arith.constant 0.000000e+00 : f32
    %228 = vector.broadcast %cst_84 : f32 to vector<1x256xf32>
    %229 = arith.select %32, %227, %228 : vector<1x256xi1>, vector<1x256xf32>
    %230 = arith.addf %217, %229 : vector<1x256xf32>
    %c0_85 = arith.constant 0 : index
    %c126 = arith.constant 126 : index
    %231 = vector.load %arg9[%c0_85, %c126] : memref<2x512xf32, #tpu.memory_space<vmem>>, vector<2x256xf32>
    %c0_86 = arith.constant 0 : index
    %c22 = arith.constant 22 : index
    %232 = memref.load %arg6[%c0_86, %c22] : memref<2x49xf32, #tpu.memory_space<smem>>
    %233 = vector.extract_strided_slice %231 {offsets = [0, 0], sizes = [1, 256], strides = [1, 1]} : vector<2x256xf32> to vector<1x256xf32>
    %234 = vector.broadcast %232 : f32 to vector<1x256xf32>
    %235 = arith.mulf %234, %233 : vector<1x256xf32>
    %c1_87 = arith.constant 1 : index
    %c22_88 = arith.constant 22 : index
    %236 = memref.load %arg6[%c1_87, %c22_88] : memref<2x49xf32, #tpu.memory_space<smem>>
    %237 = vector.extract_strided_slice %231 {offsets = [1, 0], sizes = [1, 256], strides = [1, 1]} : vector<2x256xf32> to vector<1x256xf32>
    %238 = vector.broadcast %236 : f32 to vector<1x256xf32>
    %239 = arith.mulf %238, %237 : vector<1x256xf32>
    %240 = arith.addf %235, %239 : vector<1x256xf32>
    %cst_89 = arith.constant 0.000000e+00 : f32
    %241 = vector.broadcast %cst_89 : f32 to vector<1x256xf32>
    %242 = arith.select %32, %240, %241 : vector<1x256xi1>, vector<1x256xf32>
    %243 = arith.addf %230, %242 : vector<1x256xf32>
    %c0_90 = arith.constant 0 : index
    %c142 = arith.constant 142 : index
    %244 = vector.load %arg9[%c0_90, %c142] : memref<2x512xf32, #tpu.memory_space<vmem>>, vector<2x256xf32>
    %c0_91 = arith.constant 0 : index
    %c29 = arith.constant 29 : index
    %245 = memref.load %arg6[%c0_91, %c29] : memref<2x49xf32, #tpu.memory_space<smem>>
    %246 = vector.extract_strided_slice %244 {offsets = [0, 0], sizes = [1, 256], strides = [1, 1]} : vector<2x256xf32> to vector<1x256xf32>
    %247 = vector.broadcast %245 : f32 to vector<1x256xf32>
    %248 = arith.mulf %247, %246 : vector<1x256xf32>
    %c1_92 = arith.constant 1 : index
    %c29_93 = arith.constant 29 : index
    %249 = memref.load %arg6[%c1_92, %c29_93] : memref<2x49xf32, #tpu.memory_space<smem>>
    %250 = vector.extract_strided_slice %244 {offsets = [1, 0], sizes = [1, 256], strides = [1, 1]} : vector<2x256xf32> to vector<1x256xf32>
    %251 = vector.broadcast %249 : f32 to vector<1x256xf32>
    %252 = arith.mulf %251, %250 : vector<1x256xf32>
    %253 = arith.addf %248, %252 : vector<1x256xf32>
    %cst_94 = arith.constant 0.000000e+00 : f32
    %254 = vector.broadcast %cst_94 : f32 to vector<1x256xf32>
    %255 = arith.select %32, %253, %254 : vector<1x256xi1>, vector<1x256xf32>
    %256 = arith.addf %243, %255 : vector<1x256xf32>
    %c0_95 = arith.constant 0 : index
    %c158 = arith.constant 158 : index
    %257 = vector.load %arg9[%c0_95, %c158] : memref<2x512xf32, #tpu.memory_space<vmem>>, vector<2x256xf32>
    %c0_96 = arith.constant 0 : index
    %c36 = arith.constant 36 : index
    %258 = memref.load %arg6[%c0_96, %c36] : memref<2x49xf32, #tpu.memory_space<smem>>
    %259 = vector.extract_strided_slice %257 {offsets = [0, 0], sizes = [1, 256], strides = [1, 1]} : vector<2x256xf32> to vector<1x256xf32>
    %260 = vector.broadcast %258 : f32 to vector<1x256xf32>
    %261 = arith.mulf %260, %259 : vector<1x256xf32>
    %c1_97 = arith.constant 1 : index
    %c36_98 = arith.constant 36 : index
    %262 = memref.load %arg6[%c1_97, %c36_98] : memref<2x49xf32, #tpu.memory_space<smem>>
    %263 = vector.extract_strided_slice %257 {offsets = [1, 0], sizes = [1, 256], strides = [1, 1]} : vector<2x256xf32> to vector<1x256xf32>
    %264 = vector.broadcast %262 : f32 to vector<1x256xf32>
    %265 = arith.mulf %264, %263 : vector<1x256xf32>
    %266 = arith.addf %261, %265 : vector<1x256xf32>
    %cst_99 = arith.constant 0.000000e+00 : f32
    %267 = vector.broadcast %cst_99 : f32 to vector<1x256xf32>
    %268 = arith.select %32, %266, %267 : vector<1x256xi1>, vector<1x256xf32>
    %269 = arith.addf %256, %268 : vector<1x256xf32>
    %c0_100 = arith.constant 0 : index
    %c174 = arith.constant 174 : index
    %270 = vector.load %arg9[%c0_100, %c174] : memref<2x512xf32, #tpu.memory_space<vmem>>, vector<2x256xf32>
    %c0_101 = arith.constant 0 : index
    %c43 = arith.constant 43 : index
    %271 = memref.load %arg6[%c0_101, %c43] : memref<2x49xf32, #tpu.memory_space<smem>>
    %272 = vector.extract_strided_slice %270 {offsets = [0, 0], sizes = [1, 256], strides = [1, 1]} : vector<2x256xf32> to vector<1x256xf32>
    %273 = vector.broadcast %271 : f32 to vector<1x256xf32>
    %274 = arith.mulf %273, %272 : vector<1x256xf32>
    %c1_102 = arith.constant 1 : index
    %c43_103 = arith.constant 43 : index
    %275 = memref.load %arg6[%c1_102, %c43_103] : memref<2x49xf32, #tpu.memory_space<smem>>
    %276 = vector.extract_strided_slice %270 {offsets = [1, 0], sizes = [1, 256], strides = [1, 1]} : vector<2x256xf32> to vector<1x256xf32>
    %277 = vector.broadcast %275 : f32 to vector<1x256xf32>
    %278 = arith.mulf %277, %276 : vector<1x256xf32>
    %279 = arith.addf %274, %278 : vector<1x256xf32>
    %cst_104 = arith.constant 0.000000e+00 : f32
    %280 = vector.broadcast %cst_104 : f32 to vector<1x256xf32>
    %281 = arith.select %32, %279, %280 : vector<1x256xi1>, vector<1x256xf32>
    %282 = arith.addf %269, %281 : vector<1x256xf32>
    %c0_105 = arith.constant 0 : index
    %c79 = arith.constant 79 : index
    %283 = vector.load %arg9[%c0_105, %c79] : memref<2x512xf32, #tpu.memory_space<vmem>>, vector<2x256xf32>
    %c0_106 = arith.constant 0 : index
    %c2 = arith.constant 2 : index
    %284 = memref.load %arg6[%c0_106, %c2] : memref<2x49xf32, #tpu.memory_space<smem>>
    %285 = vector.extract_strided_slice %283 {offsets = [0, 0], sizes = [1, 256], strides = [1, 1]} : vector<2x256xf32> to vector<1x256xf32>
    %286 = vector.broadcast %284 : f32 to vector<1x256xf32>
    %287 = arith.mulf %286, %285 : vector<1x256xf32>
    %c1_107 = arith.constant 1 : index
    %c2_108 = arith.constant 2 : index
    %288 = memref.load %arg6[%c1_107, %c2_108] : memref<2x49xf32, #tpu.memory_space<smem>>
    %289 = vector.extract_strided_slice %283 {offsets = [1, 0], sizes = [1, 256], strides = [1, 1]} : vector<2x256xf32> to vector<1x256xf32>
    %290 = vector.broadcast %288 : f32 to vector<1x256xf32>
    %291 = arith.mulf %290, %289 : vector<1x256xf32>
    %292 = arith.addf %287, %291 : vector<1x256xf32>
    %cst_109 = arith.constant 0.000000e+00 : f32
    %293 = vector.broadcast %cst_109 : f32 to vector<1x256xf32>
    %294 = arith.select %37, %292, %293 : vector<1x256xi1>, vector<1x256xf32>
    %295 = arith.addf %282, %294 : vector<1x256xf32>
    %c0_110 = arith.constant 0 : index
    %c95 = arith.constant 95 : index
    %296 = vector.load %arg9[%c0_110, %c95] : memref<2x512xf32, #tpu.memory_space<vmem>>, vector<2x256xf32>
    %c0_111 = arith.constant 0 : index
    %c9 = arith.constant 9 : index
    %297 = memref.load %arg6[%c0_111, %c9] : memref<2x49xf32, #tpu.memory_space<smem>>
    %298 = vector.extract_strided_slice %296 {offsets = [0, 0], sizes = [1, 256], strides = [1, 1]} : vector<2x256xf32> to vector<1x256xf32>
    %299 = vector.broadcast %297 : f32 to vector<1x256xf32>
    %300 = arith.mulf %299, %298 : vector<1x256xf32>
    %c1_112 = arith.constant 1 : index
    %c9_113 = arith.constant 9 : index
    %301 = memref.load %arg6[%c1_112, %c9_113] : memref<2x49xf32, #tpu.memory_space<smem>>
    %302 = vector.extract_strided_slice %296 {offsets = [1, 0], sizes = [1, 256], strides = [1, 1]} : vector<2x256xf32> to vector<1x256xf32>
    %303 = vector.broadcast %301 : f32 to vector<1x256xf32>
    %304 = arith.mulf %303, %302 : vector<1x256xf32>
    %305 = arith.addf %300, %304 : vector<1x256xf32>
    %cst_114 = arith.constant 0.000000e+00 : f32
    %306 = vector.broadcast %cst_114 : f32 to vector<1x256xf32>
    %307 = arith.select %37, %305, %306 : vector<1x256xi1>, vector<1x256xf32>
    %308 = arith.addf %295, %307 : vector<1x256xf32>
    %c0_115 = arith.constant 0 : index
    %c111 = arith.constant 111 : index
    %309 = vector.load %arg9[%c0_115, %c111] : memref<2x512xf32, #tpu.memory_space<vmem>>, vector<2x256xf32>
    %c0_116 = arith.constant 0 : index
    %c16 = arith.constant 16 : index
    %310 = memref.load %arg6[%c0_116, %c16] : memref<2x49xf32, #tpu.memory_space<smem>>
    %311 = vector.extract_strided_slice %309 {offsets = [0, 0], sizes = [1, 256], strides = [1, 1]} : vector<2x256xf32> to vector<1x256xf32>
    %312 = vector.broadcast %310 : f32 to vector<1x256xf32>
    %313 = arith.mulf %312, %311 : vector<1x256xf32>
    %c1_117 = arith.constant 1 : index
    %c16_118 = arith.constant 16 : index
    %314 = memref.load %arg6[%c1_117, %c16_118] : memref<2x49xf32, #tpu.memory_space<smem>>
    %315 = vector.extract_strided_slice %309 {offsets = [1, 0], sizes = [1, 256], strides = [1, 1]} : vector<2x256xf32> to vector<1x256xf32>
    %316 = vector.broadcast %314 : f32 to vector<1x256xf32>
    %317 = arith.mulf %316, %315 : vector<1x256xf32>
    %318 = arith.addf %313, %317 : vector<1x256xf32>
    %cst_119 = arith.constant 0.000000e+00 : f32
    %319 = vector.broadcast %cst_119 : f32 to vector<1x256xf32>
    %320 = arith.select %37, %318, %319 : vector<1x256xi1>, vector<1x256xf32>
    %321 = arith.addf %308, %320 : vector<1x256xf32>
    %c0_120 = arith.constant 0 : index
    %c127 = arith.constant 127 : index
    %322 = vector.load %arg9[%c0_120, %c127] : memref<2x512xf32, #tpu.memory_space<vmem>>, vector<2x256xf32>
    %c0_121 = arith.constant 0 : index
    %c23 = arith.constant 23 : index
    %323 = memref.load %arg6[%c0_121, %c23] : memref<2x49xf32, #tpu.memory_space<smem>>
    %324 = vector.extract_strided_slice %322 {offsets = [0, 0], sizes = [1, 256], strides = [1, 1]} : vector<2x256xf32> to vector<1x256xf32>
    %325 = vector.broadcast %323 : f32 to vector<1x256xf32>
    %326 = arith.mulf %325, %324 : vector<1x256xf32>
    %c1_122 = arith.constant 1 : index
    %c23_123 = arith.constant 23 : index
    %327 = memref.load %arg6[%c1_122, %c23_123] : memref<2x49xf32, #tpu.memory_space<smem>>
    %328 = vector.extract_strided_slice %322 {offsets = [1, 0], sizes = [1, 256], strides = [1, 1]} : vector<2x256xf32> to vector<1x256xf32>
    %329 = vector.broadcast %327 : f32 to vector<1x256xf32>
    %330 = arith.mulf %329, %328 : vector<1x256xf32>
    %331 = arith.addf %326, %330 : vector<1x256xf32>
    %cst_124 = arith.constant 0.000000e+00 : f32
    %332 = vector.broadcast %cst_124 : f32 to vector<1x256xf32>
    %333 = arith.select %37, %331, %332 : vector<1x256xi1>, vector<1x256xf32>
    %334 = arith.addf %321, %333 : vector<1x256xf32>
    %c0_125 = arith.constant 0 : index
    %c143 = arith.constant 143 : index
    %335 = vector.load %arg9[%c0_125, %c143] : memref<2x512xf32, #tpu.memory_space<vmem>>, vector<2x256xf32>
    %c0_126 = arith.constant 0 : index
    %c30 = arith.constant 30 : index
    %336 = memref.load %arg6[%c0_126, %c30] : memref<2x49xf32, #tpu.memory_space<smem>>
    %337 = vector.extract_strided_slice %335 {offsets = [0, 0], sizes = [1, 256], strides = [1, 1]} : vector<2x256xf32> to vector<1x256xf32>
    %338 = vector.broadcast %336 : f32 to vector<1x256xf32>
    %339 = arith.mulf %338, %337 : vector<1x256xf32>
    %c1_127 = arith.constant 1 : index
    %c30_128 = arith.constant 30 : index
    %340 = memref.load %arg6[%c1_127, %c30_128] : memref<2x49xf32, #tpu.memory_space<smem>>
    %341 = vector.extract_strided_slice %335 {offsets = [1, 0], sizes = [1, 256], strides = [1, 1]} : vector<2x256xf32> to vector<1x256xf32>
    %342 = vector.broadcast %340 : f32 to vector<1x256xf32>
    %343 = arith.mulf %342, %341 : vector<1x256xf32>
    %344 = arith.addf %339, %343 : vector<1x256xf32>
    %cst_129 = arith.constant 0.000000e+00 : f32
    %345 = vector.broadcast %cst_129 : f32 to vector<1x256xf32>
    %346 = arith.select %37, %344, %345 : vector<1x256xi1>, vector<1x256xf32>
    %347 = arith.addf %334, %346 : vector<1x256xf32>
    %c0_130 = arith.constant 0 : index
    %c159 = arith.constant 159 : index
    %348 = vector.load %arg9[%c0_130, %c159] : memref<2x512xf32, #tpu.memory_space<vmem>>, vector<2x256xf32>
    %c0_131 = arith.constant 0 : index
    %c37 = arith.constant 37 : index
    %349 = memref.load %arg6[%c0_131, %c37] : memref<2x49xf32, #tpu.memory_space<smem>>
    %350 = vector.extract_strided_slice %348 {offsets = [0, 0], sizes = [1, 256], strides = [1, 1]} : vector<2x256xf32> to vector<1x256xf32>
    %351 = vector.broadcast %349 : f32 to vector<1x256xf32>
    %352 = arith.mulf %351, %350 : vector<1x256xf32>
    %c1_132 = arith.constant 1 : index
    %c37_133 = arith.constant 37 : index
    %353 = memref.load %arg6[%c1_132, %c37_133] : memref<2x49xf32, #tpu.memory_space<smem>>
    %354 = vector.extract_strided_slice %348 {offsets = [1, 0], sizes = [1, 256], strides = [1, 1]} : vector<2x256xf32> to vector<1x256xf32>
    %355 = vector.broadcast %353 : f32 to vector<1x256xf32>
    %356 = arith.mulf %355, %354 : vector<1x256xf32>
    %357 = arith.addf %352, %356 : vector<1x256xf32>
    %cst_134 = arith.constant 0.000000e+00 : f32
    %358 = vector.broadcast %cst_134 : f32 to vector<1x256xf32>
    %359 = arith.select %37, %357, %358 : vector<1x256xi1>, vector<1x256xf32>
    %360 = arith.addf %347, %359 : vector<1x256xf32>
    %c0_135 = arith.constant 0 : index
    %c175 = arith.constant 175 : index
    %361 = vector.load %arg9[%c0_135, %c175] : memref<2x512xf32, #tpu.memory_space<vmem>>, vector<2x256xf32>
    %c0_136 = arith.constant 0 : index
    %c44 = arith.constant 44 : index
    %362 = memref.load %arg6[%c0_136, %c44] : memref<2x49xf32, #tpu.memory_space<smem>>
    %363 = vector.extract_strided_slice %361 {offsets = [0, 0], sizes = [1, 256], strides = [1, 1]} : vector<2x256xf32> to vector<1x256xf32>
    %364 = vector.broadcast %362 : f32 to vector<1x256xf32>
    %365 = arith.mulf %364, %363 : vector<1x256xf32>
    %c1_137 = arith.constant 1 : index
    %c44_138 = arith.constant 44 : index
    %366 = memref.load %arg6[%c1_137, %c44_138] : memref<2x49xf32, #tpu.memory_space<smem>>
    %367 = vector.extract_strided_slice %361 {offsets = [1, 0], sizes = [1, 256], strides = [1, 1]} : vector<2x256xf32> to vector<1x256xf32>
    %368 = vector.broadcast %366 : f32 to vector<1x256xf32>
    %369 = arith.mulf %368, %367 : vector<1x256xf32>
    %370 = arith.addf %365, %369 : vector<1x256xf32>
    %cst_139 = arith.constant 0.000000e+00 : f32
    %371 = vector.broadcast %cst_139 : f32 to vector<1x256xf32>
    %372 = arith.select %37, %370, %371 : vector<1x256xi1>, vector<1x256xf32>
    %373 = arith.addf %360, %372 : vector<1x256xf32>
    %c0_140 = arith.constant 0 : index
    %c80 = arith.constant 80 : index
    %374 = vector.load %arg9[%c0_140, %c80] : memref<2x512xf32, #tpu.memory_space<vmem>>, vector<2x256xf32>
    %c0_141 = arith.constant 0 : index
    %c3 = arith.constant 3 : index
    %375 = memref.load %arg6[%c0_141, %c3] : memref<2x49xf32, #tpu.memory_space<smem>>
    %376 = vector.extract_strided_slice %374 {offsets = [0, 0], sizes = [1, 256], strides = [1, 1]} : vector<2x256xf32> to vector<1x256xf32>
    %377 = vector.broadcast %375 : f32 to vector<1x256xf32>
    %378 = arith.mulf %377, %376 : vector<1x256xf32>
    %c1_142 = arith.constant 1 : index
    %c3_143 = arith.constant 3 : index
    %379 = memref.load %arg6[%c1_142, %c3_143] : memref<2x49xf32, #tpu.memory_space<smem>>
    %380 = vector.extract_strided_slice %374 {offsets = [1, 0], sizes = [1, 256], strides = [1, 1]} : vector<2x256xf32> to vector<1x256xf32>
    %381 = vector.broadcast %379 : f32 to vector<1x256xf32>
    %382 = arith.mulf %381, %380 : vector<1x256xf32>
    %383 = arith.addf %378, %382 : vector<1x256xf32>
    %cst_144 = arith.constant 0.000000e+00 : f32
    %384 = vector.broadcast %cst_144 : f32 to vector<1x256xf32>
    %385 = arith.select %42, %383, %384 : vector<1x256xi1>, vector<1x256xf32>
    %386 = arith.addf %373, %385 : vector<1x256xf32>
    %c0_145 = arith.constant 0 : index
    %c96 = arith.constant 96 : index
    %387 = vector.load %arg9[%c0_145, %c96] : memref<2x512xf32, #tpu.memory_space<vmem>>, vector<2x256xf32>
    %c0_146 = arith.constant 0 : index
    %c10 = arith.constant 10 : index
    %388 = memref.load %arg6[%c0_146, %c10] : memref<2x49xf32, #tpu.memory_space<smem>>
    %389 = vector.extract_strided_slice %387 {offsets = [0, 0], sizes = [1, 256], strides = [1, 1]} : vector<2x256xf32> to vector<1x256xf32>
    %390 = vector.broadcast %388 : f32 to vector<1x256xf32>
    %391 = arith.mulf %390, %389 : vector<1x256xf32>
    %c1_147 = arith.constant 1 : index
    %c10_148 = arith.constant 10 : index
    %392 = memref.load %arg6[%c1_147, %c10_148] : memref<2x49xf32, #tpu.memory_space<smem>>
    %393 = vector.extract_strided_slice %387 {offsets = [1, 0], sizes = [1, 256], strides = [1, 1]} : vector<2x256xf32> to vector<1x256xf32>
    %394 = vector.broadcast %392 : f32 to vector<1x256xf32>
    %395 = arith.mulf %394, %393 : vector<1x256xf32>
    %396 = arith.addf %391, %395 : vector<1x256xf32>
    %cst_149 = arith.constant 0.000000e+00 : f32
    %397 = vector.broadcast %cst_149 : f32 to vector<1x256xf32>
    %398 = arith.select %42, %396, %397 : vector<1x256xi1>, vector<1x256xf32>
    %399 = arith.addf %386, %398 : vector<1x256xf32>
    %c0_150 = arith.constant 0 : index
    %c112 = arith.constant 112 : index
    %400 = vector.load %arg9[%c0_150, %c112] : memref<2x512xf32, #tpu.memory_space<vmem>>, vector<2x256xf32>
    %c0_151 = arith.constant 0 : index
    %c17 = arith.constant 17 : index
    %401 = memref.load %arg6[%c0_151, %c17] : memref<2x49xf32, #tpu.memory_space<smem>>
    %402 = vector.extract_strided_slice %400 {offsets = [0, 0], sizes = [1, 256], strides = [1, 1]} : vector<2x256xf32> to vector<1x256xf32>
    %403 = vector.broadcast %401 : f32 to vector<1x256xf32>
    %404 = arith.mulf %403, %402 : vector<1x256xf32>
    %c1_152 = arith.constant 1 : index
    %c17_153 = arith.constant 17 : index
    %405 = memref.load %arg6[%c1_152, %c17_153] : memref<2x49xf32, #tpu.memory_space<smem>>
    %406 = vector.extract_strided_slice %400 {offsets = [1, 0], sizes = [1, 256], strides = [1, 1]} : vector<2x256xf32> to vector<1x256xf32>
    %407 = vector.broadcast %405 : f32 to vector<1x256xf32>
    %408 = arith.mulf %407, %406 : vector<1x256xf32>
    %409 = arith.addf %404, %408 : vector<1x256xf32>
    %cst_154 = arith.constant 0.000000e+00 : f32
    %410 = vector.broadcast %cst_154 : f32 to vector<1x256xf32>
    %411 = arith.select %42, %409, %410 : vector<1x256xi1>, vector<1x256xf32>
    %412 = arith.addf %399, %411 : vector<1x256xf32>
    %c0_155 = arith.constant 0 : index
    %c128_156 = arith.constant 128 : index
    %413 = vector.load %arg9[%c0_155, %c128_156] : memref<2x512xf32, #tpu.memory_space<vmem>>, vector<2x256xf32>
    %c0_157 = arith.constant 0 : index
    %c24 = arith.constant 24 : index
    %414 = memref.load %arg6[%c0_157, %c24] : memref<2x49xf32, #tpu.memory_space<smem>>
    %415 = vector.extract_strided_slice %413 {offsets = [0, 0], sizes = [1, 256], strides = [1, 1]} : vector<2x256xf32> to vector<1x256xf32>
    %416 = vector.broadcast %414 : f32 to vector<1x256xf32>
    %417 = arith.mulf %416, %415 : vector<1x256xf32>
    %c1_158 = arith.constant 1 : index
    %c24_159 = arith.constant 24 : index
    %418 = memref.load %arg6[%c1_158, %c24_159] : memref<2x49xf32, #tpu.memory_space<smem>>
    %419 = vector.extract_strided_slice %413 {offsets = [1, 0], sizes = [1, 256], strides = [1, 1]} : vector<2x256xf32> to vector<1x256xf32>
    %420 = vector.broadcast %418 : f32 to vector<1x256xf32>
    %421 = arith.mulf %420, %419 : vector<1x256xf32>
    %422 = arith.addf %417, %421 : vector<1x256xf32>
    %cst_160 = arith.constant 0.000000e+00 : f32
    %423 = vector.broadcast %cst_160 : f32 to vector<1x256xf32>
    %424 = arith.select %42, %422, %423 : vector<1x256xi1>, vector<1x256xf32>
    %425 = arith.addf %412, %424 : vector<1x256xf32>
    %c0_161 = arith.constant 0 : index
    %c144 = arith.constant 144 : index
    %426 = vector.load %arg9[%c0_161, %c144] : memref<2x512xf32, #tpu.memory_space<vmem>>, vector<2x256xf32>
    %c0_162 = arith.constant 0 : index
    %c31 = arith.constant 31 : index
    %427 = memref.load %arg6[%c0_162, %c31] : memref<2x49xf32, #tpu.memory_space<smem>>
    %428 = vector.extract_strided_slice %426 {offsets = [0, 0], sizes = [1, 256], strides = [1, 1]} : vector<2x256xf32> to vector<1x256xf32>
    %429 = vector.broadcast %427 : f32 to vector<1x256xf32>
    %430 = arith.mulf %429, %428 : vector<1x256xf32>
    %c1_163 = arith.constant 1 : index
    %c31_164 = arith.constant 31 : index
    %431 = memref.load %arg6[%c1_163, %c31_164] : memref<2x49xf32, #tpu.memory_space<smem>>
    %432 = vector.extract_strided_slice %426 {offsets = [1, 0], sizes = [1, 256], strides = [1, 1]} : vector<2x256xf32> to vector<1x256xf32>
    %433 = vector.broadcast %431 : f32 to vector<1x256xf32>
    %434 = arith.mulf %433, %432 : vector<1x256xf32>
    %435 = arith.addf %430, %434 : vector<1x256xf32>
    %cst_165 = arith.constant 0.000000e+00 : f32
    %436 = vector.broadcast %cst_165 : f32 to vector<1x256xf32>
    %437 = arith.select %42, %435, %436 : vector<1x256xi1>, vector<1x256xf32>
    %438 = arith.addf %425, %437 : vector<1x256xf32>
    %c0_166 = arith.constant 0 : index
    %c160 = arith.constant 160 : index
    %439 = vector.load %arg9[%c0_166, %c160] : memref<2x512xf32, #tpu.memory_space<vmem>>, vector<2x256xf32>
    %c0_167 = arith.constant 0 : index
    %c38 = arith.constant 38 : index
    %440 = memref.load %arg6[%c0_167, %c38] : memref<2x49xf32, #tpu.memory_space<smem>>
    %441 = vector.extract_strided_slice %439 {offsets = [0, 0], sizes = [1, 256], strides = [1, 1]} : vector<2x256xf32> to vector<1x256xf32>
    %442 = vector.broadcast %440 : f32 to vector<1x256xf32>
    %443 = arith.mulf %442, %441 : vector<1x256xf32>
    %c1_168 = arith.constant 1 : index
    %c38_169 = arith.constant 38 : index
    %444 = memref.load %arg6[%c1_168, %c38_169] : memref<2x49xf32, #tpu.memory_space<smem>>
    %445 = vector.extract_strided_slice %439 {offsets = [1, 0], sizes = [1, 256], strides = [1, 1]} : vector<2x256xf32> to vector<1x256xf32>
    %446 = vector.broadcast %444 : f32 to vector<1x256xf32>
    %447 = arith.mulf %446, %445 : vector<1x256xf32>
    %448 = arith.addf %443, %447 : vector<1x256xf32>
    %cst_170 = arith.constant 0.000000e+00 : f32
    %449 = vector.broadcast %cst_170 : f32 to vector<1x256xf32>
    %450 = arith.select %42, %448, %449 : vector<1x256xi1>, vector<1x256xf32>
    %451 = arith.addf %438, %450 : vector<1x256xf32>
    %c0_171 = arith.constant 0 : index
    %c176 = arith.constant 176 : index
    %452 = vector.load %arg9[%c0_171, %c176] : memref<2x512xf32, #tpu.memory_space<vmem>>, vector<2x256xf32>
    %c0_172 = arith.constant 0 : index
    %c45 = arith.constant 45 : index
    %453 = memref.load %arg6[%c0_172, %c45] : memref<2x49xf32, #tpu.memory_space<smem>>
    %454 = vector.extract_strided_slice %452 {offsets = [0, 0], sizes = [1, 256], strides = [1, 1]} : vector<2x256xf32> to vector<1x256xf32>
    %455 = vector.broadcast %453 : f32 to vector<1x256xf32>
    %456 = arith.mulf %455, %454 : vector<1x256xf32>
    %c1_173 = arith.constant 1 : index
    %c45_174 = arith.constant 45 : index
    %457 = memref.load %arg6[%c1_173, %c45_174] : memref<2x49xf32, #tpu.memory_space<smem>>
    %458 = vector.extract_strided_slice %452 {offsets = [1, 0], sizes = [1, 256], strides = [1, 1]} : vector<2x256xf32> to vector<1x256xf32>
    %459 = vector.broadcast %457 : f32 to vector<1x256xf32>
    %460 = arith.mulf %459, %458 : vector<1x256xf32>
    %461 = arith.addf %456, %460 : vector<1x256xf32>
    %cst_175 = arith.constant 0.000000e+00 : f32
    %462 = vector.broadcast %cst_175 : f32 to vector<1x256xf32>
    %463 = arith.select %42, %461, %462 : vector<1x256xi1>, vector<1x256xf32>
    %464 = arith.addf %451, %463 : vector<1x256xf32>
    %c0_176 = arith.constant 0 : index
    %c81 = arith.constant 81 : index
    %465 = vector.load %arg9[%c0_176, %c81] : memref<2x512xf32, #tpu.memory_space<vmem>>, vector<2x256xf32>
    %c0_177 = arith.constant 0 : index
    %c4 = arith.constant 4 : index
    %466 = memref.load %arg6[%c0_177, %c4] : memref<2x49xf32, #tpu.memory_space<smem>>
    %467 = vector.extract_strided_slice %465 {offsets = [0, 0], sizes = [1, 256], strides = [1, 1]} : vector<2x256xf32> to vector<1x256xf32>
    %468 = vector.broadcast %466 : f32 to vector<1x256xf32>
    %469 = arith.mulf %468, %467 : vector<1x256xf32>
    %c1_178 = arith.constant 1 : index
    %c4_179 = arith.constant 4 : index
    %470 = memref.load %arg6[%c1_178, %c4_179] : memref<2x49xf32, #tpu.memory_space<smem>>
    %471 = vector.extract_strided_slice %465 {offsets = [1, 0], sizes = [1, 256], strides = [1, 1]} : vector<2x256xf32> to vector<1x256xf32>
    %472 = vector.broadcast %470 : f32 to vector<1x256xf32>
    %473 = arith.mulf %472, %471 : vector<1x256xf32>
    %474 = arith.addf %469, %473 : vector<1x256xf32>
    %cst_180 = arith.constant 0.000000e+00 : f32
    %475 = vector.broadcast %cst_180 : f32 to vector<1x256xf32>
    %476 = arith.select %47, %474, %475 : vector<1x256xi1>, vector<1x256xf32>
    %477 = arith.addf %464, %476 : vector<1x256xf32>
    %c0_181 = arith.constant 0 : index
    %c97 = arith.constant 97 : index
    %478 = vector.load %arg9[%c0_181, %c97] : memref<2x512xf32, #tpu.memory_space<vmem>>, vector<2x256xf32>
    %c0_182 = arith.constant 0 : index
    %c11 = arith.constant 11 : index
    %479 = memref.load %arg6[%c0_182, %c11] : memref<2x49xf32, #tpu.memory_space<smem>>
    %480 = vector.extract_strided_slice %478 {offsets = [0, 0], sizes = [1, 256], strides = [1, 1]} : vector<2x256xf32> to vector<1x256xf32>
    %481 = vector.broadcast %479 : f32 to vector<1x256xf32>
    %482 = arith.mulf %481, %480 : vector<1x256xf32>
    %c1_183 = arith.constant 1 : index
    %c11_184 = arith.constant 11 : index
    %483 = memref.load %arg6[%c1_183, %c11_184] : memref<2x49xf32, #tpu.memory_space<smem>>
    %484 = vector.extract_strided_slice %478 {offsets = [1, 0], sizes = [1, 256], strides = [1, 1]} : vector<2x256xf32> to vector<1x256xf32>
    %485 = vector.broadcast %483 : f32 to vector<1x256xf32>
    %486 = arith.mulf %485, %484 : vector<1x256xf32>
    %487 = arith.addf %482, %486 : vector<1x256xf32>
    %cst_185 = arith.constant 0.000000e+00 : f32
    %488 = vector.broadcast %cst_185 : f32 to vector<1x256xf32>
    %489 = arith.select %47, %487, %488 : vector<1x256xi1>, vector<1x256xf32>
    %490 = arith.addf %477, %489 : vector<1x256xf32>
    %c0_186 = arith.constant 0 : index
    %c113 = arith.constant 113 : index
    %491 = vector.load %arg9[%c0_186, %c113] : memref<2x512xf32, #tpu.memory_space<vmem>>, vector<2x256xf32>
    %c0_187 = arith.constant 0 : index
    %c18 = arith.constant 18 : index
    %492 = memref.load %arg6[%c0_187, %c18] : memref<2x49xf32, #tpu.memory_space<smem>>
    %493 = vector.extract_strided_slice %491 {offsets = [0, 0], sizes = [1, 256], strides = [1, 1]} : vector<2x256xf32> to vector<1x256xf32>
    %494 = vector.broadcast %492 : f32 to vector<1x256xf32>
    %495 = arith.mulf %494, %493 : vector<1x256xf32>
    %c1_188 = arith.constant 1 : index
    %c18_189 = arith.constant 18 : index
    %496 = memref.load %arg6[%c1_188, %c18_189] : memref<2x49xf32, #tpu.memory_space<smem>>
    %497 = vector.extract_strided_slice %491 {offsets = [1, 0], sizes = [1, 256], strides = [1, 1]} : vector<2x256xf32> to vector<1x256xf32>
    %498 = vector.broadcast %496 : f32 to vector<1x256xf32>
    %499 = arith.mulf %498, %497 : vector<1x256xf32>
    %500 = arith.addf %495, %499 : vector<1x256xf32>
    %cst_190 = arith.constant 0.000000e+00 : f32
    %501 = vector.broadcast %cst_190 : f32 to vector<1x256xf32>
    %502 = arith.select %47, %500, %501 : vector<1x256xi1>, vector<1x256xf32>
    %503 = arith.addf %490, %502 : vector<1x256xf32>
    %c0_191 = arith.constant 0 : index
    %c129 = arith.constant 129 : index
    %504 = vector.load %arg9[%c0_191, %c129] : memref<2x512xf32, #tpu.memory_space<vmem>>, vector<2x256xf32>
    %c0_192 = arith.constant 0 : index
    %c25 = arith.constant 25 : index
    %505 = memref.load %arg6[%c0_192, %c25] : memref<2x49xf32, #tpu.memory_space<smem>>
    %506 = vector.extract_strided_slice %504 {offsets = [0, 0], sizes = [1, 256], strides = [1, 1]} : vector<2x256xf32> to vector<1x256xf32>
    %507 = vector.broadcast %505 : f32 to vector<1x256xf32>
    %508 = arith.mulf %507, %506 : vector<1x256xf32>
    %c1_193 = arith.constant 1 : index
    %c25_194 = arith.constant 25 : index
    %509 = memref.load %arg6[%c1_193, %c25_194] : memref<2x49xf32, #tpu.memory_space<smem>>
    %510 = vector.extract_strided_slice %504 {offsets = [1, 0], sizes = [1, 256], strides = [1, 1]} : vector<2x256xf32> to vector<1x256xf32>
    %511 = vector.broadcast %509 : f32 to vector<1x256xf32>
    %512 = arith.mulf %511, %510 : vector<1x256xf32>
    %513 = arith.addf %508, %512 : vector<1x256xf32>
    %cst_195 = arith.constant 0.000000e+00 : f32
    %514 = vector.broadcast %cst_195 : f32 to vector<1x256xf32>
    %515 = arith.select %47, %513, %514 : vector<1x256xi1>, vector<1x256xf32>
    %516 = arith.addf %503, %515 : vector<1x256xf32>
    %c0_196 = arith.constant 0 : index
    %c145 = arith.constant 145 : index
    %517 = vector.load %arg9[%c0_196, %c145] : memref<2x512xf32, #tpu.memory_space<vmem>>, vector<2x256xf32>
    %c0_197 = arith.constant 0 : index
    %c32 = arith.constant 32 : index
    %518 = memref.load %arg6[%c0_197, %c32] : memref<2x49xf32, #tpu.memory_space<smem>>
    %519 = vector.extract_strided_slice %517 {offsets = [0, 0], sizes = [1, 256], strides = [1, 1]} : vector<2x256xf32> to vector<1x256xf32>
    %520 = vector.broadcast %518 : f32 to vector<1x256xf32>
    %521 = arith.mulf %520, %519 : vector<1x256xf32>
    %c1_198 = arith.constant 1 : index
    %c32_199 = arith.constant 32 : index
    %522 = memref.load %arg6[%c1_198, %c32_199] : memref<2x49xf32, #tpu.memory_space<smem>>
    %523 = vector.extract_strided_slice %517 {offsets = [1, 0], sizes = [1, 256], strides = [1, 1]} : vector<2x256xf32> to vector<1x256xf32>
    %524 = vector.broadcast %522 : f32 to vector<1x256xf32>
    %525 = arith.mulf %524, %523 : vector<1x256xf32>
    %526 = arith.addf %521, %525 : vector<1x256xf32>
    %cst_200 = arith.constant 0.000000e+00 : f32
    %527 = vector.broadcast %cst_200 : f32 to vector<1x256xf32>
    %528 = arith.select %47, %526, %527 : vector<1x256xi1>, vector<1x256xf32>
    %529 = arith.addf %516, %528 : vector<1x256xf32>
    %c0_201 = arith.constant 0 : index
    %c161 = arith.constant 161 : index
    %530 = vector.load %arg9[%c0_201, %c161] : memref<2x512xf32, #tpu.memory_space<vmem>>, vector<2x256xf32>
    %c0_202 = arith.constant 0 : index
    %c39 = arith.constant 39 : index
    %531 = memref.load %arg6[%c0_202, %c39] : memref<2x49xf32, #tpu.memory_space<smem>>
    %532 = vector.extract_strided_slice %530 {offsets = [0, 0], sizes = [1, 256], strides = [1, 1]} : vector<2x256xf32> to vector<1x256xf32>
    %533 = vector.broadcast %531 : f32 to vector<1x256xf32>
    %534 = arith.mulf %533, %532 : vector<1x256xf32>
    %c1_203 = arith.constant 1 : index
    %c39_204 = arith.constant 39 : index
    %535 = memref.load %arg6[%c1_203, %c39_204] : memref<2x49xf32, #tpu.memory_space<smem>>
    %536 = vector.extract_strided_slice %530 {offsets = [1, 0], sizes = [1, 256], strides = [1, 1]} : vector<2x256xf32> to vector<1x256xf32>
    %537 = vector.broadcast %535 : f32 to vector<1x256xf32>
    %538 = arith.mulf %537, %536 : vector<1x256xf32>
    %539 = arith.addf %534, %538 : vector<1x256xf32>
    %cst_205 = arith.constant 0.000000e+00 : f32
    %540 = vector.broadcast %cst_205 : f32 to vector<1x256xf32>
    %541 = arith.select %47, %539, %540 : vector<1x256xi1>, vector<1x256xf32>
    %542 = arith.addf %529, %541 : vector<1x256xf32>
    %c0_206 = arith.constant 0 : index
    %c177 = arith.constant 177 : index
    %543 = vector.load %arg9[%c0_206, %c177] : memref<2x512xf32, #tpu.memory_space<vmem>>, vector<2x256xf32>
    %c0_207 = arith.constant 0 : index
    %c46 = arith.constant 46 : index
    %544 = memref.load %arg6[%c0_207, %c46] : memref<2x49xf32, #tpu.memory_space<smem>>
    %545 = vector.extract_strided_slice %543 {offsets = [0, 0], sizes = [1, 256], strides = [1, 1]} : vector<2x256xf32> to vector<1x256xf32>
    %546 = vector.broadcast %544 : f32 to vector<1x256xf32>
    %547 = arith.mulf %546, %545 : vector<1x256xf32>
    %c1_208 = arith.constant 1 : index
    %c46_209 = arith.constant 46 : index
    %548 = memref.load %arg6[%c1_208, %c46_209] : memref<2x49xf32, #tpu.memory_space<smem>>
    %549 = vector.extract_strided_slice %543 {offsets = [1, 0], sizes = [1, 256], strides = [1, 1]} : vector<2x256xf32> to vector<1x256xf32>
    %550 = vector.broadcast %548 : f32 to vector<1x256xf32>
    %551 = arith.mulf %550, %549 : vector<1x256xf32>
    %552 = arith.addf %547, %551 : vector<1x256xf32>
    %cst_210 = arith.constant 0.000000e+00 : f32
    %553 = vector.broadcast %cst_210 : f32 to vector<1x256xf32>
    %554 = arith.select %47, %552, %553 : vector<1x256xi1>, vector<1x256xf32>
    %555 = arith.addf %542, %554 : vector<1x256xf32>
    %c0_211 = arith.constant 0 : index
    %c82 = arith.constant 82 : index
    %556 = vector.load %arg9[%c0_211, %c82] : memref<2x512xf32, #tpu.memory_space<vmem>>, vector<2x256xf32>
    %c0_212 = arith.constant 0 : index
    %c5 = arith.constant 5 : index
    %557 = memref.load %arg6[%c0_212, %c5] : memref<2x49xf32, #tpu.memory_space<smem>>
    %558 = vector.extract_strided_slice %556 {offsets = [0, 0], sizes = [1, 256], strides = [1, 1]} : vector<2x256xf32> to vector<1x256xf32>
    %559 = vector.broadcast %557 : f32 to vector<1x256xf32>
    %560 = arith.mulf %559, %558 : vector<1x256xf32>
    %c1_213 = arith.constant 1 : index
    %c5_214 = arith.constant 5 : index
    %561 = memref.load %arg6[%c1_213, %c5_214] : memref<2x49xf32, #tpu.memory_space<smem>>
    %562 = vector.extract_strided_slice %556 {offsets = [1, 0], sizes = [1, 256], strides = [1, 1]} : vector<2x256xf32> to vector<1x256xf32>
    %563 = vector.broadcast %561 : f32 to vector<1x256xf32>
    %564 = arith.mulf %563, %562 : vector<1x256xf32>
    %565 = arith.addf %560, %564 : vector<1x256xf32>
    %cst_215 = arith.constant 0.000000e+00 : f32
    %566 = vector.broadcast %cst_215 : f32 to vector<1x256xf32>
    %567 = arith.select %52, %565, %566 : vector<1x256xi1>, vector<1x256xf32>
    %568 = arith.addf %555, %567 : vector<1x256xf32>
    %c0_216 = arith.constant 0 : index
    %c98 = arith.constant 98 : index
    %569 = vector.load %arg9[%c0_216, %c98] : memref<2x512xf32, #tpu.memory_space<vmem>>, vector<2x256xf32>
    %c0_217 = arith.constant 0 : index
    %c12 = arith.constant 12 : index
    %570 = memref.load %arg6[%c0_217, %c12] : memref<2x49xf32, #tpu.memory_space<smem>>
    %571 = vector.extract_strided_slice %569 {offsets = [0, 0], sizes = [1, 256], strides = [1, 1]} : vector<2x256xf32> to vector<1x256xf32>
    %572 = vector.broadcast %570 : f32 to vector<1x256xf32>
    %573 = arith.mulf %572, %571 : vector<1x256xf32>
    %c1_218 = arith.constant 1 : index
    %c12_219 = arith.constant 12 : index
    %574 = memref.load %arg6[%c1_218, %c12_219] : memref<2x49xf32, #tpu.memory_space<smem>>
    %575 = vector.extract_strided_slice %569 {offsets = [1, 0], sizes = [1, 256], strides = [1, 1]} : vector<2x256xf32> to vector<1x256xf32>
    %576 = vector.broadcast %574 : f32 to vector<1x256xf32>
    %577 = arith.mulf %576, %575 : vector<1x256xf32>
    %578 = arith.addf %573, %577 : vector<1x256xf32>
    %cst_220 = arith.constant 0.000000e+00 : f32
    %579 = vector.broadcast %cst_220 : f32 to vector<1x256xf32>
    %580 = arith.select %52, %578, %579 : vector<1x256xi1>, vector<1x256xf32>
    %581 = arith.addf %568, %580 : vector<1x256xf32>
    %c0_221 = arith.constant 0 : index
    %c114 = arith.constant 114 : index
    %582 = vector.load %arg9[%c0_221, %c114] : memref<2x512xf32, #tpu.memory_space<vmem>>, vector<2x256xf32>
    %c0_222 = arith.constant 0 : index
    %c19 = arith.constant 19 : index
    %583 = memref.load %arg6[%c0_222, %c19] : memref<2x49xf32, #tpu.memory_space<smem>>
    %584 = vector.extract_strided_slice %582 {offsets = [0, 0], sizes = [1, 256], strides = [1, 1]} : vector<2x256xf32> to vector<1x256xf32>
    %585 = vector.broadcast %583 : f32 to vector<1x256xf32>
    %586 = arith.mulf %585, %584 : vector<1x256xf32>
    %c1_223 = arith.constant 1 : index
    %c19_224 = arith.constant 19 : index
    %587 = memref.load %arg6[%c1_223, %c19_224] : memref<2x49xf32, #tpu.memory_space<smem>>
    %588 = vector.extract_strided_slice %582 {offsets = [1, 0], sizes = [1, 256], strides = [1, 1]} : vector<2x256xf32> to vector<1x256xf32>
    %589 = vector.broadcast %587 : f32 to vector<1x256xf32>
    %590 = arith.mulf %589, %588 : vector<1x256xf32>
    %591 = arith.addf %586, %590 : vector<1x256xf32>
    %cst_225 = arith.constant 0.000000e+00 : f32
    %592 = vector.broadcast %cst_225 : f32 to vector<1x256xf32>
    %593 = arith.select %52, %591, %592 : vector<1x256xi1>, vector<1x256xf32>
    %594 = arith.addf %581, %593 : vector<1x256xf32>
    %c0_226 = arith.constant 0 : index
    %c130 = arith.constant 130 : index
    %595 = vector.load %arg9[%c0_226, %c130] : memref<2x512xf32, #tpu.memory_space<vmem>>, vector<2x256xf32>
    %c0_227 = arith.constant 0 : index
    %c26 = arith.constant 26 : index
    %596 = memref.load %arg6[%c0_227, %c26] : memref<2x49xf32, #tpu.memory_space<smem>>
    %597 = vector.extract_strided_slice %595 {offsets = [0, 0], sizes = [1, 256], strides = [1, 1]} : vector<2x256xf32> to vector<1x256xf32>
    %598 = vector.broadcast %596 : f32 to vector<1x256xf32>
    %599 = arith.mulf %598, %597 : vector<1x256xf32>
    %c1_228 = arith.constant 1 : index
    %c26_229 = arith.constant 26 : index
    %600 = memref.load %arg6[%c1_228, %c26_229] : memref<2x49xf32, #tpu.memory_space<smem>>
    %601 = vector.extract_strided_slice %595 {offsets = [1, 0], sizes = [1, 256], strides = [1, 1]} : vector<2x256xf32> to vector<1x256xf32>
    %602 = vector.broadcast %600 : f32 to vector<1x256xf32>
    %603 = arith.mulf %602, %601 : vector<1x256xf32>
    %604 = arith.addf %599, %603 : vector<1x256xf32>
    %cst_230 = arith.constant 0.000000e+00 : f32
    %605 = vector.broadcast %cst_230 : f32 to vector<1x256xf32>
    %606 = arith.select %52, %604, %605 : vector<1x256xi1>, vector<1x256xf32>
    %607 = arith.addf %594, %606 : vector<1x256xf32>
    %c0_231 = arith.constant 0 : index
    %c146 = arith.constant 146 : index
    %608 = vector.load %arg9[%c0_231, %c146] : memref<2x512xf32, #tpu.memory_space<vmem>>, vector<2x256xf32>
    %c0_232 = arith.constant 0 : index
    %c33 = arith.constant 33 : index
    %609 = memref.load %arg6[%c0_232, %c33] : memref<2x49xf32, #tpu.memory_space<smem>>
    %610 = vector.extract_strided_slice %608 {offsets = [0, 0], sizes = [1, 256], strides = [1, 1]} : vector<2x256xf32> to vector<1x256xf32>
    %611 = vector.broadcast %609 : f32 to vector<1x256xf32>
    %612 = arith.mulf %611, %610 : vector<1x256xf32>
    %c1_233 = arith.constant 1 : index
    %c33_234 = arith.constant 33 : index
    %613 = memref.load %arg6[%c1_233, %c33_234] : memref<2x49xf32, #tpu.memory_space<smem>>
    %614 = vector.extract_strided_slice %608 {offsets = [1, 0], sizes = [1, 256], strides = [1, 1]} : vector<2x256xf32> to vector<1x256xf32>
    %615 = vector.broadcast %613 : f32 to vector<1x256xf32>
    %616 = arith.mulf %615, %614 : vector<1x256xf32>
    %617 = arith.addf %612, %616 : vector<1x256xf32>
    %cst_235 = arith.constant 0.000000e+00 : f32
    %618 = vector.broadcast %cst_235 : f32 to vector<1x256xf32>
    %619 = arith.select %52, %617, %618 : vector<1x256xi1>, vector<1x256xf32>
    %620 = arith.addf %607, %619 : vector<1x256xf32>
    %c0_236 = arith.constant 0 : index
    %c162 = arith.constant 162 : index
    %621 = vector.load %arg9[%c0_236, %c162] : memref<2x512xf32, #tpu.memory_space<vmem>>, vector<2x256xf32>
    %c0_237 = arith.constant 0 : index
    %c40 = arith.constant 40 : index
    %622 = memref.load %arg6[%c0_237, %c40] : memref<2x49xf32, #tpu.memory_space<smem>>
    %623 = vector.extract_strided_slice %621 {offsets = [0, 0], sizes = [1, 256], strides = [1, 1]} : vector<2x256xf32> to vector<1x256xf32>
    %624 = vector.broadcast %622 : f32 to vector<1x256xf32>
    %625 = arith.mulf %624, %623 : vector<1x256xf32>
    %c1_238 = arith.constant 1 : index
    %c40_239 = arith.constant 40 : index
    %626 = memref.load %arg6[%c1_238, %c40_239] : memref<2x49xf32, #tpu.memory_space<smem>>
    %627 = vector.extract_strided_slice %621 {offsets = [1, 0], sizes = [1, 256], strides = [1, 1]} : vector<2x256xf32> to vector<1x256xf32>
    %628 = vector.broadcast %626 : f32 to vector<1x256xf32>
    %629 = arith.mulf %628, %627 : vector<1x256xf32>
    %630 = arith.addf %625, %629 : vector<1x256xf32>
    %cst_240 = arith.constant 0.000000e+00 : f32
    %631 = vector.broadcast %cst_240 : f32 to vector<1x256xf32>
    %632 = arith.select %52, %630, %631 : vector<1x256xi1>, vector<1x256xf32>
    %633 = arith.addf %620, %632 : vector<1x256xf32>
    %c0_241 = arith.constant 0 : index
    %c178 = arith.constant 178 : index
    %634 = vector.load %arg9[%c0_241, %c178] : memref<2x512xf32, #tpu.memory_space<vmem>>, vector<2x256xf32>
    %c0_242 = arith.constant 0 : index
    %c47 = arith.constant 47 : index
    %635 = memref.load %arg6[%c0_242, %c47] : memref<2x49xf32, #tpu.memory_space<smem>>
    %636 = vector.extract_strided_slice %634 {offsets = [0, 0], sizes = [1, 256], strides = [1, 1]} : vector<2x256xf32> to vector<1x256xf32>
    %637 = vector.broadcast %635 : f32 to vector<1x256xf32>
    %638 = arith.mulf %637, %636 : vector<1x256xf32>
    %c1_243 = arith.constant 1 : index
    %c47_244 = arith.constant 47 : index
    %639 = memref.load %arg6[%c1_243, %c47_244] : memref<2x49xf32, #tpu.memory_space<smem>>
    %640 = vector.extract_strided_slice %634 {offsets = [1, 0], sizes = [1, 256], strides = [1, 1]} : vector<2x256xf32> to vector<1x256xf32>
    %641 = vector.broadcast %639 : f32 to vector<1x256xf32>
    %642 = arith.mulf %641, %640 : vector<1x256xf32>
    %643 = arith.addf %638, %642 : vector<1x256xf32>
    %cst_245 = arith.constant 0.000000e+00 : f32
    %644 = vector.broadcast %cst_245 : f32 to vector<1x256xf32>
    %645 = arith.select %52, %643, %644 : vector<1x256xi1>, vector<1x256xf32>
    %646 = arith.addf %633, %645 : vector<1x256xf32>
    %c0_246 = arith.constant 0 : index
    %c83 = arith.constant 83 : index
    %647 = vector.load %arg9[%c0_246, %c83] : memref<2x512xf32, #tpu.memory_space<vmem>>, vector<2x256xf32>
    %c0_247 = arith.constant 0 : index
    %c6 = arith.constant 6 : index
    %648 = memref.load %arg6[%c0_247, %c6] : memref<2x49xf32, #tpu.memory_space<smem>>
    %649 = vector.extract_strided_slice %647 {offsets = [0, 0], sizes = [1, 256], strides = [1, 1]} : vector<2x256xf32> to vector<1x256xf32>
    %650 = vector.broadcast %648 : f32 to vector<1x256xf32>
    %651 = arith.mulf %650, %649 : vector<1x256xf32>
    %c1_248 = arith.constant 1 : index
    %c6_249 = arith.constant 6 : index
    %652 = memref.load %arg6[%c1_248, %c6_249] : memref<2x49xf32, #tpu.memory_space<smem>>
    %653 = vector.extract_strided_slice %647 {offsets = [1, 0], sizes = [1, 256], strides = [1, 1]} : vector<2x256xf32> to vector<1x256xf32>
    %654 = vector.broadcast %652 : f32 to vector<1x256xf32>
    %655 = arith.mulf %654, %653 : vector<1x256xf32>
    %656 = arith.addf %651, %655 : vector<1x256xf32>
    %cst_250 = arith.constant 0.000000e+00 : f32
    %657 = vector.broadcast %cst_250 : f32 to vector<1x256xf32>
    %658 = arith.select %57, %656, %657 : vector<1x256xi1>, vector<1x256xf32>
    %659 = arith.addf %646, %658 : vector<1x256xf32>
    %c0_251 = arith.constant 0 : index
    %c99 = arith.constant 99 : index
    %660 = vector.load %arg9[%c0_251, %c99] : memref<2x512xf32, #tpu.memory_space<vmem>>, vector<2x256xf32>
    %c0_252 = arith.constant 0 : index
    %c13 = arith.constant 13 : index
    %661 = memref.load %arg6[%c0_252, %c13] : memref<2x49xf32, #tpu.memory_space<smem>>
    %662 = vector.extract_strided_slice %660 {offsets = [0, 0], sizes = [1, 256], strides = [1, 1]} : vector<2x256xf32> to vector<1x256xf32>
    %663 = vector.broadcast %661 : f32 to vector<1x256xf32>
    %664 = arith.mulf %663, %662 : vector<1x256xf32>
    %c1_253 = arith.constant 1 : index
    %c13_254 = arith.constant 13 : index
    %665 = memref.load %arg6[%c1_253, %c13_254] : memref<2x49xf32, #tpu.memory_space<smem>>
    %666 = vector.extract_strided_slice %660 {offsets = [1, 0], sizes = [1, 256], strides = [1, 1]} : vector<2x256xf32> to vector<1x256xf32>
    %667 = vector.broadcast %665 : f32 to vector<1x256xf32>
    %668 = arith.mulf %667, %666 : vector<1x256xf32>
    %669 = arith.addf %664, %668 : vector<1x256xf32>
    %cst_255 = arith.constant 0.000000e+00 : f32
    %670 = vector.broadcast %cst_255 : f32 to vector<1x256xf32>
    %671 = arith.select %57, %669, %670 : vector<1x256xi1>, vector<1x256xf32>
    %672 = arith.addf %659, %671 : vector<1x256xf32>
    %c0_256 = arith.constant 0 : index
    %c115 = arith.constant 115 : index
    %673 = vector.load %arg9[%c0_256, %c115] : memref<2x512xf32, #tpu.memory_space<vmem>>, vector<2x256xf32>
    %c0_257 = arith.constant 0 : index
    %c20 = arith.constant 20 : index
    %674 = memref.load %arg6[%c0_257, %c20] : memref<2x49xf32, #tpu.memory_space<smem>>
    %675 = vector.extract_strided_slice %673 {offsets = [0, 0], sizes = [1, 256], strides = [1, 1]} : vector<2x256xf32> to vector<1x256xf32>
    %676 = vector.broadcast %674 : f32 to vector<1x256xf32>
    %677 = arith.mulf %676, %675 : vector<1x256xf32>
    %c1_258 = arith.constant 1 : index
    %c20_259 = arith.constant 20 : index
    %678 = memref.load %arg6[%c1_258, %c20_259] : memref<2x49xf32, #tpu.memory_space<smem>>
    %679 = vector.extract_strided_slice %673 {offsets = [1, 0], sizes = [1, 256], strides = [1, 1]} : vector<2x256xf32> to vector<1x256xf32>
    %680 = vector.broadcast %678 : f32 to vector<1x256xf32>
    %681 = arith.mulf %680, %679 : vector<1x256xf32>
    %682 = arith.addf %677, %681 : vector<1x256xf32>
    %cst_260 = arith.constant 0.000000e+00 : f32
    %683 = vector.broadcast %cst_260 : f32 to vector<1x256xf32>
    %684 = arith.select %57, %682, %683 : vector<1x256xi1>, vector<1x256xf32>
    %685 = arith.addf %672, %684 : vector<1x256xf32>
    %c0_261 = arith.constant 0 : index
    %c131 = arith.constant 131 : index
    %686 = vector.load %arg9[%c0_261, %c131] : memref<2x512xf32, #tpu.memory_space<vmem>>, vector<2x256xf32>
    %c0_262 = arith.constant 0 : index
    %c27 = arith.constant 27 : index
    %687 = memref.load %arg6[%c0_262, %c27] : memref<2x49xf32, #tpu.memory_space<smem>>
    %688 = vector.extract_strided_slice %686 {offsets = [0, 0], sizes = [1, 256], strides = [1, 1]} : vector<2x256xf32> to vector<1x256xf32>
    %689 = vector.broadcast %687 : f32 to vector<1x256xf32>
    %690 = arith.mulf %689, %688 : vector<1x256xf32>
    %c1_263 = arith.constant 1 : index
    %c27_264 = arith.constant 27 : index
    %691 = memref.load %arg6[%c1_263, %c27_264] : memref<2x49xf32, #tpu.memory_space<smem>>
    %692 = vector.extract_strided_slice %686 {offsets = [1, 0], sizes = [1, 256], strides = [1, 1]} : vector<2x256xf32> to vector<1x256xf32>
    %693 = vector.broadcast %691 : f32 to vector<1x256xf32>
    %694 = arith.mulf %693, %692 : vector<1x256xf32>
    %695 = arith.addf %690, %694 : vector<1x256xf32>
    %cst_265 = arith.constant 0.000000e+00 : f32
    %696 = vector.broadcast %cst_265 : f32 to vector<1x256xf32>
    %697 = arith.select %57, %695, %696 : vector<1x256xi1>, vector<1x256xf32>
    %698 = arith.addf %685, %697 : vector<1x256xf32>
    %c0_266 = arith.constant 0 : index
    %c147 = arith.constant 147 : index
    %699 = vector.load %arg9[%c0_266, %c147] : memref<2x512xf32, #tpu.memory_space<vmem>>, vector<2x256xf32>
    %c0_267 = arith.constant 0 : index
    %c34 = arith.constant 34 : index
    %700 = memref.load %arg6[%c0_267, %c34] : memref<2x49xf32, #tpu.memory_space<smem>>
    %701 = vector.extract_strided_slice %699 {offsets = [0, 0], sizes = [1, 256], strides = [1, 1]} : vector<2x256xf32> to vector<1x256xf32>
    %702 = vector.broadcast %700 : f32 to vector<1x256xf32>
    %703 = arith.mulf %702, %701 : vector<1x256xf32>
    %c1_268 = arith.constant 1 : index
    %c34_269 = arith.constant 34 : index
    %704 = memref.load %arg6[%c1_268, %c34_269] : memref<2x49xf32, #tpu.memory_space<smem>>
    %705 = vector.extract_strided_slice %699 {offsets = [1, 0], sizes = [1, 256], strides = [1, 1]} : vector<2x256xf32> to vector<1x256xf32>
    %706 = vector.broadcast %704 : f32 to vector<1x256xf32>
    %707 = arith.mulf %706, %705 : vector<1x256xf32>
    %708 = arith.addf %703, %707 : vector<1x256xf32>
    %cst_270 = arith.constant 0.000000e+00 : f32
    %709 = vector.broadcast %cst_270 : f32 to vector<1x256xf32>
    %710 = arith.select %57, %708, %709 : vector<1x256xi1>, vector<1x256xf32>
    %711 = arith.addf %698, %710 : vector<1x256xf32>
    %c0_271 = arith.constant 0 : index
    %c163 = arith.constant 163 : index
    %712 = vector.load %arg9[%c0_271, %c163] : memref<2x512xf32, #tpu.memory_space<vmem>>, vector<2x256xf32>
    %c0_272 = arith.constant 0 : index
    %c41 = arith.constant 41 : index
    %713 = memref.load %arg6[%c0_272, %c41] : memref<2x49xf32, #tpu.memory_space<smem>>
    %714 = vector.extract_strided_slice %712 {offsets = [0, 0], sizes = [1, 256], strides = [1, 1]} : vector<2x256xf32> to vector<1x256xf32>
    %715 = vector.broadcast %713 : f32 to vector<1x256xf32>
    %716 = arith.mulf %715, %714 : vector<1x256xf32>
    %c1_273 = arith.constant 1 : index
    %c41_274 = arith.constant 41 : index
    %717 = memref.load %arg6[%c1_273, %c41_274] : memref<2x49xf32, #tpu.memory_space<smem>>
    %718 = vector.extract_strided_slice %712 {offsets = [1, 0], sizes = [1, 256], strides = [1, 1]} : vector<2x256xf32> to vector<1x256xf32>
    %719 = vector.broadcast %717 : f32 to vector<1x256xf32>
    %720 = arith.mulf %719, %718 : vector<1x256xf32>
    %721 = arith.addf %716, %720 : vector<1x256xf32>
    %cst_275 = arith.constant 0.000000e+00 : f32
    %722 = vector.broadcast %cst_275 : f32 to vector<1x256xf32>
    %723 = arith.select %57, %721, %722 : vector<1x256xi1>, vector<1x256xf32>
    %724 = arith.addf %711, %723 : vector<1x256xf32>
    %c0_276 = arith.constant 0 : index
    %c179 = arith.constant 179 : index
    %725 = vector.load %arg9[%c0_276, %c179] : memref<2x512xf32, #tpu.memory_space<vmem>>, vector<2x256xf32>
    %c0_277 = arith.constant 0 : index
    %c48 = arith.constant 48 : index
    %726 = memref.load %arg6[%c0_277, %c48] : memref<2x49xf32, #tpu.memory_space<smem>>
    %727 = vector.extract_strided_slice %725 {offsets = [0, 0], sizes = [1, 256], strides = [1, 1]} : vector<2x256xf32> to vector<1x256xf32>
    %728 = vector.broadcast %726 : f32 to vector<1x256xf32>
    %729 = arith.mulf %728, %727 : vector<1x256xf32>
    %c1_278 = arith.constant 1 : index
    %c48_279 = arith.constant 48 : index
    %730 = memref.load %arg6[%c1_278, %c48_279] : memref<2x49xf32, #tpu.memory_space<smem>>
    %731 = vector.extract_strided_slice %725 {offsets = [1, 0], sizes = [1, 256], strides = [1, 1]} : vector<2x256xf32> to vector<1x256xf32>
    %732 = vector.broadcast %730 : f32 to vector<1x256xf32>
    %733 = arith.mulf %732, %731 : vector<1x256xf32>
    %734 = arith.addf %729, %733 : vector<1x256xf32>
    %cst_280 = arith.constant 0.000000e+00 : f32
    %735 = vector.broadcast %cst_280 : f32 to vector<1x256xf32>
    %736 = arith.select %57, %734, %735 : vector<1x256xi1>, vector<1x256xf32>
    %737 = arith.addf %724, %736 : vector<1x256xf32>
    %738 = arith.negf %737 : vector<1x256xf32>
    %739 = math.exp %738 : vector<1x256xf32>
    %cst_281 = arith.constant 1.000000e+00 : f32
    %740 = vector.broadcast %cst_281 : f32 to vector<1x256xf32>
    %741 = arith.addf %740, %739 : vector<1x256xf32>
    %742 = arith.divf %740, %741 : vector<1x256xf32>
    %743 = vector.broadcast %742 : vector<1x256xf32> to vector<32x256xf32>
    %744 = arith.mulf %90, %743 : vector<32x256xf32>
    %c0_282 = arith.constant 0 : index
    %c0_283 = arith.constant 0 : index
    %c0_284 = arith.constant 0 : index
    %745 = vector.load %arg8[%c0_282, %c0_283, %c0_284] : memref<1x32x256xf32, #tpu.memory_space<vmem>>, vector<1x32x256xf32>
    %746 = vector.shape_cast %745 : vector<1x32x256xf32> to vector<32x256xf32>
    %747 = vector.shape_cast %744 : vector<32x256xf32> to vector<1x32x256xf32>
    tpu.vector_store %arg8[%c0_282, %c0_283, %c0_284], %747 {strides = array<i32>} : memref<1x32x256xf32, #tpu.memory_space<vmem>>, vector<1x32x256xf32>,
    return
  }
  func.func @transform_0(%arg0: i32) -> (i32, i32, i32) {
    %c0_i32 = arith.constant 0 : i32
    %c0_i32_0 = arith.constant 0 : i32
    %c0_i32_1 = arith.constant 0 : i32
    return %arg0, %c0_i32, %c0_i32_0 : i32, i32, i32
  }
  func.func @transform_1(%arg0: i32) -> (i32, i32) {
    %c0_i32 = arith.constant 0 : i32
    %c0_i32_0 = arith.constant 0 : i32
    %c0_i32_1 = arith.constant 0 : i32
    return %c0_i32, %c0_i32_0 : i32, i32
  }
  func.func @transform_2(%arg0: i32) -> (i32, i32) {
    %c0_i32 = arith.constant 0 : i32
    %c0_i32_0 = arith.constant 0 : i32
    %c0_i32_1 = arith.constant 0 : i32
    return %c0_i32, %c0_i32_0 : i32, i32
  }
  func.func @transform_3(%arg0: i32) -> (i32, i32) {
    %c0_i32 = arith.constant 0 : i32
    %c0_i32_0 = arith.constant 0 : i32
    %c0_i32_1 = arith.constant 0 : i32
    return %c0_i32, %c0_i32_0 : i32, i32
  }
  func.func @transform_4(%arg0: i32) -> (i32, i32) {
    %c0_i32 = arith.constant 0 : i32
    %c0_i32_0 = arith.constant 0 : i32
    %c0_i32_1 = arith.constant 0 : i32
    return %c0_i32, %c0_i32_0 : i32, i32
  }
  func.func @transform_5(%arg0: i32) -> (i32, i32) {
    %c0_i32 = arith.constant 0 : i32
    %c0_i32_0 = arith.constant 0 : i32
    %c0_i32_1 = arith.constant 0 : i32
    return %c0_i32, %c0_i32_0 : i32, i32
  }
  func.func @transform_6(%arg0: i32) -> i32 {
    %c0_i32 = arith.constant 0 : i32
    %c0_i32_0 = arith.constant 0 : i32
    return %c0_i32 : i32
  }
  func.func @transform_7(%arg0: i32) -> (i32, i32, i32) {
    %c0_i32 = arith.constant 0 : i32
    %c0_i32_0 = arith.constant 0 : i32
    %c0_i32_1 = arith.constant 0 : i32
    return %arg0, %c0_i32, %c0_i32_0 : i32, i32, i32
  }
}

</mosaic_0001>

<bundles_post_ra>
// kernel: tpu_custom_call.1
= control target key start
LH: loop header
LB: loop body
LE: loop exit
PB: predicated region body
PF: predicated region fallthrough
CT: control target
= control target key end

     0   :  { %s4705_s0 = inlined_call_operand.hbm [shape: f32[2,32,256], index: 0, kind: input, shape index: {}]   ;;  %s4706_s1 = inlined_call_operand.vmem [shape: f32[2,32], index: 1, kind: input, shape index: {}]   ;;  %s4707_s2 = inlined_call_operand.vmem [shape: f32[2,1], index: 2, kind: input, shape index: {}]   ;;  %s4708_s3 = inlined_call_operand.vmem [shape: f32[32,2], index: 3, kind: input, shape index: {}]   ;;  %s4709_s4 = inlined_call_operand.vmem [shape: f32[32,1], index: 4, kind: input, shape index: {}]   ;;  %s4710_s5 = inlined_call_operand.vmem [shape: f32[2,49], index: 5, kind: input, shape index: {}]   ;;  %s4711_s6 = inlined_call_operand.<no memory space> [shape: f32[1], index: 6, kind: input, shape index: {}]   ;;  %s4712_s7 = inlined_call_operand.hbm [shape: f32[2,32,256], index: 7, kind: output, shape index: {}]  }
   0x1   :  { %4721 = sst [smem:[#allocation16_spill]] %s4705_s0 }
   0x2   :  { %4722 = sst [smem:[#allocation17_spill]] %s4706_s1 }
   0x3   :  { %12 = sst [smem:[#allocation3]] %s4711_s6 }
   0x4   :  { %13 = vsyncpa [#allocation5], 0 }
   0x5   :  { %15 = vsyncpa [#allocation5 + $0x1], 0 }
   0x6   :  { %16 = vsyncpa [#allocation7], 0 }
   0x7   :  { %17 = vsyncpa [#allocation6], 0 }
   0x8   :  { %19 = vsyncpa [#allocation6 + $0x1], 0  ;;  %s3370_s26 = smov 0   ;;  %s3372_s27 = smov 0  }
   0x9   :  { %s3374_s28 = smov 0   ;;  %s3376_s29 = smov 0  }
   0xa LB: > { %s3391_s6 = sadd.s32 4294967295, %s3266_s29   ;;  %s2799_s30 = sadd.s32 4294967294, %s3266_s29   ;;  %s3266_s29 = sphi %s3376_s29, %s4754_s29   ;;  %s3262_s28 = sphi %s3374_s28, %s4753_s28   ;;  %s3258_s27 = sphi %s3372_s27, %s4752_s27   ;;  %s3254_s26 = sphi %s3370_s26, %s4751_s26  }
   0xb   : > { %s3395_s8 = sadd.s32 1, %s3266_s29   ;;  %s32_s9 = sadd.s32 1, %s3262_s28 }
   0xc   : > { %s29_s10 = ssub.s32 %s3266_s29, %s3395_s8  ;;  %p39_p0 = scmp.ne.s32.totalorder %s3262_s28, %s3258_s27 }
   0xd   : > { %p30_p1 = scmp.eq.s32.totalorder %s29_s10, 0  ;;  %p40_p2 = scmp.eq.s32.totalorder %s3266_s29, 0 }
   0xe   : > { %p45_p3 = scmp.ne.s32.totalorder %s3258_s27, %s3254_s26  ;;  %p4714_p4 = scmp.eq.s32.totalorder %s3391_s6, 0 }
   0xf   : > { %s3407_s11 = scalar_select %p30_p1, %s3262_s28, %s32_s9  }
  0x10   : > { %p3409_p5 = por %p40_p2, %p39_p0  ;;  %p3415_p6 = por %p4714_p4, %p45_p3 }
  0x11   : > { %p195_p7 = scmp.eq.s32.totalorder %s3391_s6, 1  ;;  %p201_p8 = scmp.eq.s32.totalorder %s2799_s30, 1 }
  0x12   : > { %s4724_s13 = scalar_select %p3415_p6, 1, 0 }
  0x13   : > { %p2800_p9 = scmp.ge.s32.totalorder %s3266_s29, 1  ;;  %p208_p10 = scmp.lt.s32.totalorder %s3266_s29, 3 }
  0x14   : > { %p3422_p11 = por %p195_p7, %p39_p0  ;;  %p3426_p12 = por %p201_p8, %p45_p3 }
  0x15   : > { %p3430_p13 = pnand %p2800_p9, %p208_p10  ;;  %s233_s19 = sshll.u32 %s4710_s5, 4  ;;  %s234_s19 = int_to_ptr.vmem [resolvable:$true] %s233_s19 }
  0x16   : > { %s4725_s14 = scalar_select %p3422_p11, 1, 0 }
  0x17   : > { %s4726_s15 = scalar_select %p3426_p12, 1, 0 }
  0x18   : > { %p3018_p1 = pneg %p3430_p13  ;;  %p3031_p2 = scmp.lt.s32.totalorder %s3266_s29, 2 }
  0x19   : > { %s247_s21 = sand.u32 1, %s3262_s28   ;;  %s3151_s24 = scalar_lea.vmem %s234_s19, 32 }
  0x1a   : > { %p3443_p7 = pnand %p3018_p1, %p4714_p4  ;;  %p3450_p3 = pnand %p3031_p2, %p3409_p5 }
  0x1b   : > { %s2803_s23 = sshll.u32 %s247_s21, 6  ;;  %p3152_p8 = scmp.ne.s32.totalorder %s234_s19, %s3151_s24 }
  0x1c   : > { %p3153_p9 = pneg %p3443_p7  ;;  %p3159_p12 = scmp.lt.s32.totalorder %s234_s19, %s234_s19 }
  0x1d   : > { %p3160_p11 = scmp.lt.s32.totalorder %s3151_s24, %s3151_s24 }
  0x1e   : > { %p3154_p10 = pnand %p3153_p9, %p3152_p8 }
  0x1f   : > { %p3161_p1 = por %p3160_p11, %p3159_p12 }
  0x20   : > { %p3155_p0 = pneg %p3154_p10 }
  0x22   : > { %p3162_p4 = pnand %p3161_p1, %p3155_p0 }
  0x24   : > { %3165 = shalt.err (!%p3162_p4)
}
  0x25   : > { %s3268_s25 = smov [#allocation8]   ;;  %s2973_s30 = sshll.u32 %s3266_s29, 10 }
  0x26   : > { %3021 = dma.vmem_to_smem (!%p3443_p7), %s234_s19, 32, %s3268_s25, [#allocation7]  }
  0x27   : > { %s251_s9 = scalar_lea.vmem [#allocation4], %s2803_s23  ;;  %s4730_s0 = sld [smem:[#allocation16_spill]] }
  0x28   : > { %s258_s10 = sshll.u32 %s251_s9, 4  ;;  %s3466_s24 = scalar_lea.sflag [#allocation5], %s247_s21  ;;  %s3464_s10 = int_to_ptr.vmem [resolvable:$true] %s258_s10 }
  0x29   : > { %p3168_p5 = pneg %p3450_p3 }
  0x2d   : > { %s3462_s18 = scalar_lea.hbm %s4730_s0, %s2973_s30  ;;  %s3171_s25 = scalar_lea.hbm %s4730_s0, 2048 }
  0x2e   : > { %s3166_s20 = scalar_lea.hbm %s3462_s18, 1024  ;;  %p3172_p0 = scmp.lt.u32.totalorder %s3462_s18, %s4730_s0 }
  0x2f   : > { %p3167_p4 = scmp.ne.s32.totalorder %s3462_s18, %s3166_s20  ;;  %p3173_p2 = scmp.lt.u32.totalorder %s3171_s25, %s3166_s20 }
  0x30   : > { %p3175_p8 = scmp.lt.u32.totalorder %s3166_s20, %s3462_s18 }
  0x31   : > { %p3169_p11 = pnand %p3168_p5, %p3167_p4  ;;  %p3174_p7 = por %p3173_p2, %p3172_p0 }
  0x33   : > { %p3170_p12 = pneg %p3169_p11  ;;  %p3176_p9 = por %p3175_p8, %p3174_p7 }
  0x35   : > { %p3177_p10 = pnand %p3176_p9, %p3170_p12 }
  0x37   : > { %3180 = shalt.err (!%p3177_p10)
}
  0x38   : > { %s3181_s21 = scalar_lea.vmem %s3464_s10, 1024  ;;  %s3269_s12 = smov [#allocation4]  }
  0x39   : > { %p3182_p1 = scmp.ne.s32.totalorder %s3464_s10, %s3181_s21  ;;  %s3186_s17 = sshll.u32 %s3269_s12, 4  ;;  %s3187_s17 = int_to_ptr.vmem [resolvable:$false] %s3186_s17 }
  0x3a   : > { %s3188_s19 = scalar_lea.vmem %s3187_s17, 2048  ;;  %p3189_p6 = scmp.lt.s32.totalorder %s3464_s10, %s3187_s17 }
  0x3b   : > { %p3184_p4 = pnand %p3182_p1, %p3168_p5  ;;  %p3190_p0 = scmp.lt.s32.totalorder %s3188_s19, %s3181_s21 }
  0x3d   : > { %p3185_p11 = pneg %p3184_p4  ;;  %p3191_p2 = por %p3190_p0, %p3189_p6 }
  0x3f   : > { %p3192_p7 = pnand %p3191_p2, %p3185_p11 }
  0x41   : > { %3195 = shalt.err (!%p3192_p7)
}
  0x42   : > { %s3270_s20 = smov 256   ;;  %s3271_s23 = smov 16  }
  0x43   : > { %3025 = dma.hbm_to_vmem [thread:$0]  (!%p3450_p3), %s3462_s18, 1024, %s3464_s10, %s3466_s24, %s3270_s20, %s3270_s20, %s3271_s23  }
  0x44   : > { %270 = sbr.rel (%p3430_p13) target bundleno = 1353 (0x549), region = 48 }
  0x4b   : > { %s3497_s25 = sand.u32 1, %s3258_s27   ;;  %p4731_p6 = scmp.ne.s32.totalorder %s4724_s13, 0 }
  0x4c   : > { %s4717_s30 = sshll.u32 %s3497_s25, 6  ;;  %s273_s9 = scalar_lea.sflag [#allocation5], %s3497_s25 }
  0x4d   : > { %s276_s21 = scalar_lea.vmem [#allocation4], %s4717_s30 }
  0x4e   : > { %3241 = dma.done.wait (%p4731_p6), %s273_s9, 1024  }
  0x4f   : > { %3243 = vsyncadd (%p4731_p6), %s273_s9, 4294966272  ;;  %p4732_p3 = scmp.eq.s32.totalorder %s3391_s6, 0 }
  0x51   : > { %3245 = dma.done.wait (%p4732_p3), [#allocation7], 32   ;;  %p4733_p13 = pmov %p4732_p3 }
  0x53   : > { %3247 = vsyncadd (%p4733_p13), [#allocation7], 4294967264 }
  0x54   : > { %285 = sfence }
  0x55   : > { %v3511_v0 = vld [vmem:[%s276_s21] sm:$0xff]  ;;  %v3513_v1 = vld [vmem:[%s276_s21 + $0x8] sm:$0xff]  ;;  %v3515_v2 = vld [vmem:[%s276_s21 + $0x10] sm:$0xff]  ;;  %v3272_v16 = vmov 0.0|0.0   ;;  %v3273_v17 = vmov 0.0   ;;  %vm3274_vm0 = vmmov 0   ;;  %v323_v20 = vlaneseq }
  0x56   : > { %v418_v3 = vmax.f32 %v3511_v0, %v3513_v1  ;;  %v401_v4 = vadd.f32 %v3513_v1, %v3511_v0  ;;  %v3521_v5 = vld [vmem:[%s276_s21 + $0x18] sm:$0xff]  ;;  %v3527_v8 = vld [vmem:[%s276_s21 + $0x30] sm:$0xff]  ;;  %v3531_v10 = vld [vmem:[%s276_s21 + $0x20] sm:$0xff]  ;;  %3004 = vmatprep.subr.bf16.mxu0 %v3272_v16  ;;  %322 = vst [vmem:[#allocation2] sm:$0xff] %v3273_v17  ;;  %2993 = vmatprep.mubr.msk.f32.mxu0 %vm3274_vm0, %v3273_v17  ;;  %v3275_v19 = vmov 0   ;;  %s4734_s1 = sld [smem:[#allocation17_spill]] }
  0x57   : > { %v421_v6 = vmax.f32 %v3515_v2, %v3521_v5  ;;  %v404_v7 = vadd.f32 %v3521_v5, %v3515_v2  ;;  %v3529_v9 = vld [vmem:[%s276_s21 + $0x38] sm:$0xff]  ;;  %v3533_v11 = vld [vmem:[%s276_s21 + $0x28] sm:$0xff]  ;;  %3123 = vset.pattern.permute.xlu0 %v3275_v19  ;;  %3124 = vset.pattern.permute.xlu1 %v3275_v19  ;;  %v3547_v23 = vand.u32 127, %v323_v20  ;;  %vm439_vm2 = vcmask 261120   ;;  %v319_v43 = vld [vmem:[%s4709_s4 + $0x8] sm:$0xff]  ;;  %s2820_s17 = sld [smem:[#allocation8 + $0x80]] }
  0x58   : > { %419 = vmax.xlane.f32.xlu1 %v418_v3  ;;  %402 = vadd.xlane.f32.xlu0 %v401_v4  ;;  %v410_v12 = vadd.f32 %v3529_v9, %v3527_v8  ;;  %v407_v13 = vadd.f32 %v3533_v11, %v3531_v10  ;;  %v427_v14 = vmax.f32 %v3527_v8, %v3529_v9  ;;  %v313_v18 = vld [vmem:[%s4707_s2] sm:$0x3]  ;;  %vm534_vm3 = vcmask 15360   ;;  %v320_v44 = vld [vmem:[%s4709_s4 + $0x10] sm:$0xff]  ;;  %v321_v45 = vld [vmem:[%s4709_s4 + $0x18] sm:$0xff]  ;;  %s2823_s19 = sld [smem:[#allocation8 + $0x87]] }
  0x59   : > { %v424_v15 = vmax.f32 %v3531_v10, %v3533_v11  ;;  %vm392_vm1 = vcmp.eq.s32.totalorder %v3547_v23, 0  ;;  %v314_v41 = vld [vmem:[%s4708_s3] sm:$0xff]  ;;  %vm547_vm4 = vcmask 1041408   ;;  %v315_v51 = vld [vmem:[%s4708_s3 + $0x8] sm:$0xff]  ;;  %v316_v52 = vld [vmem:[%s4708_s3 + $0x10] sm:$0xff]  ;;  %vm739_vm5 = vcmp.lt.s32.totalorder %v323_v20, 256 }
  0x5a   : > { %2998 = vmatprep.mubr.msk.f32.mxu1 %vm534_vm3, %v314_v41  ;;  %v318_v42 = vld [vmem:[%s4709_s4] sm:$0xff]  ;;  %v317_v53 = vld [vmem:[%s4708_s3 + $0x18] sm:$0xff]  ;;  %s766_s20 = sld [smem:[#allocation8]]  ;;  %s2826_s23 = sld [smem:[#allocation8 + $0x8e]]  ;;  %vm796_vm7 = vcmask 416768   ;;  %vm835_vm9 = vcmask 285696  }
  0x5b   : > { %s2822_s9 = sld [smem:[#allocation8 + $0x7]]  ;;  %s2825_s21 = sld [smem:[#allocation8 + $0xe]]  ;;  %vm874_vm10 = vcmask 154624   ;;  %vm913_vm11 = vcmask 23552   ;;  %vm953_vm12 = vcmask 941056   ;;  %vm992_vm13 = vcmask 809984  }
  0x5c   : > { %422 = vmax.xlane.f32.xlu1 %v421_v6  ;;  %405 = vadd.xlane.f32.xlu0 %v404_v7  ;;  %v312_v40 = vld [vmem:[%s4734_s1] sm:$0x3]  ;;  %s2829_s13 = sld [smem:[#allocation8 + $0x95]]  ;;  %s2832_s16 = sld [smem:[#allocation8 + $0x9c]]  ;;  %vm1031_vm14 = vcmask 678912   ;;  %vm1070_vm15 = vcmask 408576  }
  0x5d   : > { %s3641_s22 = sld [smem:[#allocation8 + $0x15]]  ;;  %s3277_s10 = smov 51   ;;  %vm1109_vm0 = vcmask 277504  }
  0x5e   : > { %s3646_s18 = sld [smem:[#allocation8 + $0x1c]]  ;;  %s2835_s24 = sld [smem:[#allocation8 + $0xa3]] }
  0x5f   : > { %s3278_s12 = smov 35   ;;  %s3923_s30 = sld [smem:[#allocation8 + $0x13]] }
  0x60   : > { %411 = vadd.xlane.f32.xlu1 %v410_v12  ;;  %408 = vadd.xlane.f32.xlu0 %v407_v13  ;;  %s3927_s0 = sld [smem:[#allocation8 + $0x93]]  ;;  %s3929_s1 = sld [smem:[#allocation8 + $0x9a]] }
  0x61   : > { %p4747_p12 = scmp.ne.s32.totalorder %s4725_s14, 0 }
  0x64   : > { %428 = vmax.xlane.f32.xlu1 %v427_v14  ;;  %425 = vmax.xlane.f32.xlu0 %v424_v15 }
  0x75   : > { %516 = vperm.xlu1 %3124, %v318_v42  }
  0x79   : > { %521 = vperm.xlu1 %3124, %v319_v43  }
  0x7a   : > { %436 = vperm.xlu0 %3123, %v313_v18  }
  0x7d   : > { %526 = vperm.xlu1 %3124, %v320_v44  }
  0x81   : > { %531 = vperm.xlu1 %3124, %v321_v45  }
  0xe5   : > { %v420_v21 = vpop.xlane.xlu1 %419  ;;  %v403_v22 = vpop.xlane.xlu0 %402 }
  0xe6   : > { %v414_v24 = vmul.f32 0.00390625, %v403_v22 }
  0xe8   : > { %v430_v28 = vsel %vm392_vm1, %v414_v24, %v420_v21 }
  0xe9   : > { %v423_v25 = vpop.xlane.xlu1 %422  ;;  %v406_v26 = vpop.xlane.xlu0 %405 }
  0xea   : > { %v415_v27 = vmul.f32 0.00390625, %v406_v26 }
  0xec   : > { %v431_v29 = vsel %vm392_vm1, %v415_v27, %v423_v25 }
  0xed   : > { %v412_v30 = vpop.xlane.xlu1 %411  ;;  %v409_v31 = vpop.xlane.xlu0 %408  ;;  %v3005_v32 = vpack.c.bf16 %v431_v29, %v430_v28 }
  0xee   : > { %v417_v33 = vmul.f32 0.00390625, %v412_v30  ;;  %v416_v34 = vmul.f32 0.00390625, %v409_v31 }
  0xef   : > { %3006 = vmatpush3.bf16.msra.mxu0 %v3005_v32 }
  0xf0   : > { %3007 = vmatprep.subr.bf16.mxu0 %v3272_v16 }
  0xf1   : > { %v429_v35 = vpop.xlane.xlu1 %428  ;;  %v426_v36 = vpop.xlane.xlu0 %425 }
  0xf2   : > { %v433_v37 = vsel %vm392_vm1, %v417_v33, %v429_v35  ;;  %v432_v38 = vsel %vm392_vm1, %v416_v34, %v426_v36 }
  0xf3   : > { %v3008_v39 = vpack.c.bf16 %v433_v37, %v432_v38 }
  0xf5   : > { %3009 = vmatpush3.bf16.msra.mxu0 %v3008_v39  ;;  %v517_v54 = vpop.permute.xlu1 %516 }
  0xf8   : > { %2994 = vmatmul.mubr.msk.f32.vlgmr.msra.gmra.mrb[0].mxu0 %vm439_vm2, %v312_v40 }
  0xf9   : > { %v437_v46 = vpop.permute.xlu0 %436  ;;  %v522_v55 = vpop.permute.xlu1 %521 }
  0xfd   : > { %v527_v56 = vpop.permute.xlu1 %526 }
 0x101   : > { %v532_v62 = vpop.permute.xlu1 %531 }
 0x1cb   : > { %v509_v47 = vpop.f32.mrb[0].mxu0 }
 0x1cc   : > { %v510_v48 = vadd.f32 %v509_v47, %v437_v46  ;;  %v2995_v49 = vpop.f32.mrb[1].mxu0 }
 0x1ce   : > { %v513_v50 = vmax.f32 %v510_v48, 0.0 }
 0x1d0   : > { %2996 = vmatprep.subr.msk.mxu1 %vm547_vm4, %v513_v50 }
 0x1d1   : > { %2997 = vmatpush3.msk.msra.mxu1 %vm547_vm4, %v513_v50 }
 0x1d2   : > { %2999 = vmatmul.mubr.msk.f32.vlgmr.msra.gmra.mrb[0].mxu1 %vm534_vm3, %v315_v51 }
 0x1d3   : > { %3001 = vmatprep.mubr.msk.f32.mxu1 %vm534_vm3, %v316_v52  ;;  %v3276_v52 = vmov 1966171168  }
 0x1d6   : > { %3002 = vmatmul.mubr.msk.f32.gmra.mrb[2].mxu1 %vm534_vm3, %v317_v53  ;;  %v723_v53 = vunpack.c.l.s4 %v3276_v52  ;;  %v887_v52 = vstv %s2829_s13  ;;  %s2844_s13 = sld [smem:[#allocation8 + $0x88]] }
 0x2a5   : > { %v3000_v57 = vpop.f32.mrb[0].mxu1 }
 0x2a6   : > { %v623_v58 = vadd.f32 %v3000_v57, %v522_v55  ;;  %v617_v59 = vpop.f32.mrb[1].mxu1 }
 0x2a7   : > { %v618_v60 = vadd.f32 %v617_v59, %v517_v54 }
 0x2a8   : > { %v639_v61 = vsel %vm534_vm3, %v623_v58, 0.0 }
 0x2a9   : > { %640 = vadd.xlane.f32.xlu0 %v639_v61  ;;  %v3003_v63 = vpop.f32.mrb[2].mxu1  ;;  %v636_v3 = vsel %vm534_vm3, %v618_v60, 0.0 }
 0x2aa   : > { %v633_v4 = vadd.f32 %v3003_v63, %v532_v62  ;;  %v627_v6 = vpop.f32.mrb[3].mxu1  ;;  %637 = vadd.xlane.f32.xlu1 %v636_v3  ;;  %v724_v62 = vunpack.c.0.s8 %v723_v53  ;;  %v726_v63 = vshrl.u32 %v323_v20, 7 }
 0x2ab   : > { %v628_v12 = vadd.f32 %v627_v6, %v527_v56 }
 0x2ac   : > { %v645_v7 = vsel %vm534_vm3, %v633_v4, 0.0 }
 0x2ad   : > { %v642_v13 = vsel %vm534_vm3, %v628_v12, 0.0 }
 0x2ae   : > { %646 = vadd.xlane.f32.xlu1 %v645_v7 }
 0x2b2   : > { %643 = vadd.xlane.f32.xlu1 %v642_v13 }
 0x336   : > { %v641_v14 = vpop.xlane.xlu0 %640 }
 0x337   : > { %v2817_v15 = vmul.f32 -1.442695, %v641_v14  ;;  %v638_v16 = vpop.xlane.xlu1 %637 }
 0x338   : > { %v2816_v17 = vmul.f32 -1.442695, %v638_v16  ;;  %v727_v16 = vsub.s32 %v724_v62, %v726_v63 }
 0x339   : > { %3125 = vpow2.f32 %v2817_v15 }
 0x33a   : > { %3127 = vpow2.f32 %v2816_v17 }
 0x33b   : > { %v647_v18 = vpop.xlane.xlu1 %646 }
 0x33c   : > { %v2819_v19 = vmul.f32 -1.442695, %v647_v18 }
 0x33e   : > { %3129 = vpow2.f32 %v2819_v19 }
 0x33f   : > { %v644_v21 = vpop.xlane.xlu1 %643 }
 0x340   : > { %v2818_v22 = vmul.f32 -1.442695, %v644_v21 }
 0x342   : > { %3131 = vpow2.f32 %v2818_v22 }
 0x343   : > { %v3126_v24 = vpop.eup %3125 }
 0x344   : > { %v3128_v25 = vpop.eup %3127  ;;  %v661_v26 = vadd.f32 1.0, %v3126_v24 }
 0x345   : > { %v660_v27 = vadd.f32 1.0, %v3128_v25 }
 0x346   : > { %3133 = vrcp.f32 %v661_v26 }
 0x347   : > { %3135 = vrcp.f32 %v660_v27 }
 0x348   : > { %v3130_v28 = vpop.eup %3129 }
 0x349   : > { %v663_v29 = vadd.f32 1.0, %v3130_v28 }
 0x34b   : > { %3137 = vrcp.f32 %v663_v29 }
 0x34c   : > { %v3132_v30 = vpop.eup %3131 }
 0x34d   : > { %v662_v31 = vadd.f32 1.0, %v3132_v30 }
 0x34f   : > { %3139 = vrcp.f32 %v662_v31  ;;  %v770_v31 = vstv %s2820_s17  ;;  %s2838_s17 = sld [smem:[#allocation8 + $0xaa]] }
 0x350   : > { %v3134_v32 = vpop.eup %3133 }
 0x351   : > { %v3136_v33 = vpop.eup %3135  ;;  %v3587_v35 = vmul.f32 %v3134_v32, %v3515_v2  ;;  %v3590_v36 = vmul.f32 %v3134_v32, %v3521_v5  ;;  %v809_v32 = vstv %s2823_s19  ;;  %s3279_s19 = smov 19  }
 0x352   : > { %v3593_v37 = vmul.f32 %v3136_v33, %v3511_v0  ;;  %v3596_v38 = vmul.f32 %v3136_v33, %v3513_v1 }
 0x353   : > { %4735 = vst [vmem:[#allocation13_spill] sm:$0xff] %v3590_v36 }
 0x354   : > { %v680_v2 = vadd.f32 %v3587_v35, %v3593_v37  ;;  %v689_v5 = vadd.f32 %v3590_v36, %v3596_v38 }
 0x355   : > { %v3138_v34 = vpop.eup %3137 }
 0x356   : > { %v3599_v39 = vmul.f32 %v3138_v34, %v3527_v8  ;;  %v3602_v40 = vmul.f32 %v3138_v34, %v3529_v9  ;;  %v767_v34 = vstv %s766_s20  ;;  %s2834_s20 = sld [smem:[#allocation8 + $0x23]] }
 0x358   : > { %4736 = vst [vmem:[#allocation14_spill] sm:$0xff] %v3602_v40  ;;  %v702_v1 = vmax.f32 %v3587_v35, %v3599_v39  ;;  %v711_v8 = vmax.f32 %v3590_v36, %v3602_v40 }
 0x359   : > { %v3140_v41 = vpop.eup %3139 }
 0x35a   : > { %v3609_v42 = vmul.f32 %v3140_v41, %v3531_v10  ;;  %v3612_v0 = vmul.f32 %v3140_v41, %v3533_v11  ;;  %v848_v41 = vstv %s2826_s23  ;;  %s2837_s23 = sld [smem:[#allocation8 + $0x2a]] }
 0x35c   : > { %4737 = vst [vmem:[#allocation15_spill] sm:$0xff] %v3612_v0  ;;  %v681_v9 = vadd.f32 %v680_v2, %v3609_v42  ;;  %v690_v43 = vadd.f32 %v689_v5, %v3612_v0  ;;  %v701_v44 = vmax.f32 %v3593_v37, %v3609_v42  ;;  %v710_v10 = vmax.f32 %v3596_v38, %v3612_v0 }
 0x35d   : > { %v3632_v5 = vsub.s32 0, %v726_v63 }
 0x35e   : > { %v682_v45 = vadd.f32 %v681_v9, %v3599_v39  ;;  %v691_v11 = vadd.f32 %v690_v43, %v3602_v40  ;;  %v703_v46 = vmax.f32 %v701_v44, %v702_v1  ;;  %v712_v47 = vmax.f32 %v710_v10, %v711_v8 }
 0x35f   : > { %v3634_v1 = vsub.s32 2, %v726_v63  ;;  %v806_v8 = vstv %s2822_s9  ;;  %s2841_s9 = sld [smem:[#allocation8 + $0x81]] }
 0x360   : > { %v683_v48 = vrot.slane %v682_v45, 4  ;;  %v692_v49 = vrot.slane %v691_v11, 4  ;;  %v704_v50 = vrot.slane %v703_v46, 4  ;;  %v713_v51 = vrot.slane %v712_v47, 4 }
 0x362   : > { %v684_v54 = vadd.f32 %v683_v48, %v682_v45  ;;  %v693_v55 = vadd.f32 %v692_v49, %v691_v11  ;;  %v705_v56 = vmax.f32 %v703_v46, %v704_v50  ;;  %v714_v57 = vmax.f32 %v712_v47, %v713_v51 }
 0x363   : > { %v3639_v46 = vsub.s32 4, %v726_v63  ;;  %v845_v47 = vstv %s2825_s21  ;;  %s3280_s21 = smov 3  }
 0x364   : > { %v685_v58 = vrot.slane %v684_v54, 2  ;;  %v694_v59 = vrot.slane %v693_v55, 2  ;;  %v706_v60 = vrot.slane %v705_v56, 2  ;;  %v715_v61 = vrot.slane %v714_v57, 2 }
 0x366   : > { %v686_v3 = vadd.f32 %v685_v58, %v684_v54  ;;  %v695_v4 = vadd.f32 %v694_v59, %v693_v55  ;;  %v707_v6 = vmax.f32 %v705_v56, %v706_v60  ;;  %v716_v7 = vmax.f32 %v714_v57, %v715_v61 }
 0x367   : > { %v927_v59 = vstv %s2832_s16  ;;  %v884_v60 = vstv %s3641_s22  ;;  %s3281_s16 = smov 115   ;;  %s2840_s22 = sld [smem:[#allocation8 + $0x1]] }
 0x368   : > { %v687_v12 = vrot.slane %v686_v3, 1  ;;  %v696_v13 = vrot.slane %v695_v4, 1  ;;  %v708_v14 = vrot.slane %v707_v6, 1  ;;  %v717_v15 = vrot.slane %v716_v7, 1 }
 0x36a   : > { %v688_v17 = vadd.f32 %v687_v12, %v686_v3  ;;  %v697_v18 = vadd.f32 %v696_v13, %v695_v4  ;;  %v709_v19 = vmax.f32 %v707_v6, %v708_v14  ;;  %v718_v21 = vmax.f32 %v716_v7, %v717_v15 }
 0x36b   : > { %v924_v6 = vstv %s3646_s18  ;;  %v966_v15 = vstv %s2835_s24  ;;  %s2847_s18 = sld [smem:[#allocation8 + $0x8f]]  ;;  %s3282_s24 = smov 99  }
 0x36c   : > { %v699_v22 = vmul.f32 0.03125, %v688_v17  ;;  %v700_v24 = vmul.f32 0.03125, %v697_v18  ;;  %v745_v25 = vcombine.low %v709_v19, %v718_v21 }
 0x36e   : > { %v721_v26 = vcombine.low %v699_v22, %v700_v24  ;;  %v752_v27 = vrot.slane %v745_v25, %v727_v16  ;;  %v1005_v22 = vstv %s2838_s17  ;;  %v963_v24 = vstv %s2834_s20  ;;  %s3283_s17 = smov 83   ;;  %s2849_s20 = sld [smem:[#allocation8 + $0x16]] }
 0x370   : > { %v728_v28 = vrot.slane %v721_v26, %v727_v16  ;;  %v759_v29 = vrot.slane %v752_v27, %v727_v16 }
 0x372   : > { %v735_v30 = vrot.slane %v728_v28, %v727_v16  ;;  %762 = vst.msk [vmem:[#allocation2 + $0x3] ss:$2 sm:$0x3] %vm739_vm5, %v759_v29 }
 0x374   : > { %742 = vst.msk [vmem:[#allocation2 + $0x2] ss:$2 sm:$0x3] %vm739_vm5, %v735_v30  ;;  %v1002_v30 = vstv %s2837_s23  ;;  %s2853_s23 = sld [smem:[#allocation8 + $0x9d]]  ;;  %vm1148_vm5 = vcmask 146432  }
 0x37b   : > { %v3628_v33 = vld [vmem:[#allocation2] sm:$0x3f] }
 0x37c   : > { %v771_v20 = vmul.f32 %v770_v31, %v3628_v33  ;;  %v810_v2 = vmul.f32 %v809_v32, %v3628_v33  ;;  %v768_v9 = vmul.f32 %v767_v34, %v3628_v33  ;;  %v849_v10 = vmul.f32 %v848_v41, %v3628_v33  ;;  %v3651_v58 = vld [vmem:[#allocation2 + $0x2] sm:$0x3f] }
 0x37d   : > { %v807_v11 = vmul.f32 %v806_v8, %v3628_v33  ;;  %v846_v53 = vmul.f32 %v845_v47, %v3628_v33  ;;  %v888_v57 = vmul.f32 %v887_v52, %v3628_v33  ;;  %v928_v3 = vmul.f32 %v927_v59, %v3651_v58 }
 0x37e   : > { %v2821_v43 = vrot.slane %v771_v20, 9  ;;  %v2824_v44 = vrot.slane %v810_v2, 9  ;;  %v2827_v51 = vrot.slane %v849_v10, 9  ;;  %v885_v4 = vmul.f32 %v884_v60, %v3628_v33 }
 0x37f   : > { %v2830_v63 = vrot.slane %v888_v57, 9  ;;  %v2833_v14 = vrot.slane %v928_v3, 9  ;;  %v925_v16 = vmul.f32 %v924_v6, %v3651_v58  ;;  %v967_v21 = vmul.f32 %v966_v15, %v3651_v58 }
 0x380   : > { %v776_v45 = vadd.f32 %v2821_v43, %v768_v9  ;;  %v815_v50 = vadd.f32 %v2824_v44, %v807_v11  ;;  %v854_v56 = vadd.f32 %v2827_v51, %v846_v53  ;;  %v1006_v28 = vmul.f32 %v1005_v22, %v3651_v58 }
 0x381   : > { %v893_v13 = vadd.f32 %v2830_v63, %v885_v4  ;;  %v933_v19 = vadd.f32 %v2833_v14, %v925_v16  ;;  %v2836_v27 = vrot.slane %v967_v21, 9  ;;  %v964_v29 = vmul.f32 %v963_v24, %v3651_v58 }
 0x382   : > { %v785_v48 = vrot.slane %v776_v45, %v3634_v1  ;;  %v781_v49 = vrot.slane %v776_v45, %v3632_v5  ;;  %v824_v54 = vrot.slane %v815_v50, %v3634_v1  ;;  %v789_v55 = vrot.slane %v776_v45, %v3639_v46 }
 0x383   : > { %v859_v61 = vrot.slane %v854_v56, %v3632_v5  ;;  %v820_v62 = vrot.slane %v815_v50, %v3632_v5  ;;  %v867_v7 = vrot.slane %v854_v56, %v3639_v46  ;;  %v828_v12 = vrot.slane %v815_v50, %v3639_v46 }
 0x384   : > { %792 = vrot.lane.b32.xlu0 %v785_v48, %s3277_s10  ;;  %790 = vrot.lane.b32.xlu1 %v781_v49, %s3277_s10  ;;  %v902_v17 = vrot.slane %v893_v13, %v3634_v1  ;;  %v863_v18 = vrot.slane %v854_v56, %v3634_v1  ;;  %v938_v25 = vrot.slane %v933_v19, %v3632_v5  ;;  %v2839_v41 = vrot.slane %v1006_v28, 9 }
 0x385   : > { %v898_v26 = vrot.slane %v893_v13, %v3632_v5  ;;  %v946_v31 = vrot.slane %v933_v19, %v3639_v46  ;;  %v906_v32 = vrot.slane %v893_v13, %v3639_v46  ;;  %v972_v34 = vadd.f32 %v2836_v27, %v964_v29 }
 0x386   : > { %v1044_v20 = vstv %s2841_s9  ;;  %v1003_v2 = vmul.f32 %v1002_v30, %v3651_v58  ;;  %v942_v9 = vrot.slane %v933_v19, %v3634_v1  ;;  %v1083_v10 = vstv %s2844_s13  ;;  %s3284_s9 = smov 50   ;;  %s3285_s13 = smov 34  }
 0x387   : > { %v981_v8 = vrot.slane %v972_v34, %v3634_v1  ;;  %v1045_v44 = vmul.f32 %v1044_v20, %v3628_v33  ;;  %v1041_v45 = vstv %s2840_s22  ;;  %v977_v47 = vrot.slane %v972_v34, %v3632_v5  ;;  %s2855_s22 = sld [smem:[#allocation8 + $0x24]] }
 0x388   : > { %831 = vrot.lane.b32.xlu0 %v824_v54, %s3278_s12  ;;  %794 = vrot.lane.b32.xlu1 %v789_v55, %s3277_s10  ;;  %s2843_s10 = sld [smem:[#allocation8 + $0x8]]  ;;  %v1011_v43 = vadd.f32 %v2839_v41, %v1003_v2  ;;  %v1084_v49 = vmul.f32 %v1083_v10, %v3628_v33  ;;  %v1042_v50 = vmul.f32 %v1041_v45, %v3628_v33  ;;  %v1122_v56 = vstv %s2847_s18  ;;  %s3286_s18 = smov 18  }
 0x389   : > { %v2842_v48 = vrot.slane %v1045_v44, 9  ;;  %v985_v53 = vrot.slane %v972_v34, %v3639_v46  ;;  %v1158_v14 = vstv %s2849_s20  ;;  %v1199_v19 = vstv %s2853_s23  ;;  %s2865_s20 = sld [smem:[#allocation8 + $0x89]]  ;;  %s3288_s23 = smov 114  }
 0x38a   : > { %v1016_v11 = vrot.slane %v1011_v43, %v3632_v5  ;;  %v1024_v52 = vrot.slane %v1011_v43, %v3639_v46  ;;  %v2845_v55 = vrot.slane %v1084_v49, 9  ;;  %v1020_v60 = vrot.slane %v1011_v43, %v3634_v1 }
 0x38b   : > { %v1050_v54 = vadd.f32 %v2842_v48, %v1042_v50  ;;  %v1159_v21 = vmul.f32 %v1158_v14, %v3628_v33 }
 0x38c   : > { %868 = vrot.lane.b32.xlu0 %v859_v61, %s3279_s19  ;;  %829 = vrot.lane.b32.xlu1 %v820_v62, %s3278_s12  ;;  %v1123_v62 = vmul.f32 %v1122_v56, %v3628_v33 }
 0x38d   : > { %v1059_v59 = vrot.slane %v1050_v54, %v3634_v1  ;;  %v1055_v6 = vrot.slane %v1050_v54, %v3632_v5  ;;  %v1063_v16 = vrot.slane %v1050_v54, %v3639_v46  ;;  %v1235_v41 = vstv %s2855_s22  ;;  %s2871_s22 = sld [smem:[#allocation8 + $0x97]] }
 0x38e   : > { %v1080_v51 = vstv %s2843_s10  ;;  %s2859_s10 = sld [smem:[#allocation8 + $0xab]]  ;;  %v1236_v44 = vmul.f32 %v1235_v41, %v3651_v58 }
 0x38f   : > { %v1081_v57 = vmul.f32 %v1080_v51, %v3628_v33 }
 0x390   : > { %872 = vrot.lane.b32.xlu0 %v867_v7, %s3279_s19  ;;  %833 = vrot.lane.b32.xlu1 %v828_v12, %s3278_s12  ;;  %s2850_s12 = sld [smem:[#allocation8 + $0x96]]  ;;  %v2848_v7 = vrot.slane %v1123_v62, 9 }
 0x391   : > { %v1089_v61 = vadd.f32 %v2845_v55, %v1081_v57 }
 0x393   : > { %v1094_v4 = vrot.slane %v1089_v61, %v3632_v5  ;;  %v1102_v15 = vrot.slane %v1089_v61, %v3639_v46  ;;  %v1098_v24 = vrot.slane %v1089_v61, %v3634_v1  ;;  %v1355_v61 = vstv %s2865_s20  ;;  %s3292_s20 = smov 33  }
 0x394   : > { %909 = vrot.lane.b32.xlu0 %v902_v17, %s3280_s21  ;;  %870 = vrot.lane.b32.xlu1 %v863_v18, %s3279_s19  ;;  %s2846_s19 = sld [smem:[#allocation8 + $0xf]]  ;;  %v1277_v43 = vstv %s2859_s10  ;;  %s3290_s10 = smov 82  }
 0x396   : > { %v1161_v63 = vstv %s2850_s12  ;;  %s3287_s12 = smov 2  }
 0x397   : > { %v1162_v12 = vmul.f32 %v1161_v63, %v3628_v33 }
 0x398   : > { %947 = vrot.lane.b32.xlu0 %v938_v25, %s3281_s16  ;;  %907 = vrot.lane.b32.xlu1 %v898_v26, %s3280_s21  ;;  %v1200_v26 = vmul.f32 %v1199_v19, %v3651_v58 }
 0x399   : > { %v2851_v18 = vrot.slane %v1162_v12, 9 }
 0x39a   : > { %v1119_v3 = vstv %s2846_s19  ;;  %s2861_s19 = sld [smem:[#allocation8 + $0x2]] }
 0x39b   : > { %v1120_v13 = vmul.f32 %v1119_v3, %v3628_v33  ;;  %v1167_v25 = vadd.f32 %v2851_v18, %v1159_v21 }
 0x39c   : > { %951 = vrot.lane.b32.xlu0 %v946_v31, %s3281_s16  ;;  %911 = vrot.lane.b32.xlu1 %v906_v32, %s3280_s21  ;;  %s2856_s21 = sld [smem:[#allocation8 + $0xa4]]  ;;  %v2854_v31 = vrot.slane %v1200_v26, 9 }
 0x39d   : > { %v1128_v17 = vadd.f32 %v2848_v7, %v1120_v13  ;;  %v1172_v29 = vrot.slane %v1167_v25, %v3632_v5  ;;  %v1180_v20 = vrot.slane %v1167_v25, %v3639_v46  ;;  %v1176_v45 = vrot.slane %v1167_v25, %v3634_v1 }
 0x39e   : > { %v1433_v25 = vstv %s2871_s22  ;;  %s3294_s22 = smov 1  }
 0x39f   : > { %v1137_v22 = vrot.slane %v1128_v17, %v3634_v1  ;;  %v1133_v30 = vrot.slane %v1128_v17, %v3632_v5  ;;  %v1141_v2 = vrot.slane %v1128_v17, %v3639_v46 }
 0x3a0   : > { %988 = vrot.lane.b32.xlu0 %v981_v8, %s3282_s24  ;;  %949 = vrot.lane.b32.xlu1 %v942_v9, %s3281_s16  ;;  %s2852_s16 = sld [smem:[#allocation8 + $0x1d]]  ;;  %v1313_v55 = vstv %s2861_s19 }
 0x3a1   : > { %v1314_v62 = vmul.f32 %v1313_v55, %v3628_v33  ;;  %s2877_s19 = sld [smem:[#allocation8 + $0xa5]] }
 0x3a2   : > { %v1238_v27 = vstv %s2856_s21  ;;  %s3289_s21 = smov 98  }
 0x3a3   : > { %v1239_v32 = vmul.f32 %v1238_v27, %v3651_v58 }
 0x3a4   : > { %1025 = vrot.lane.b32.xlu0 %v1016_v11, %s3283_s17  ;;  %986 = vrot.lane.b32.xlu1 %v977_v47, %s3282_s24  ;;  %v1278_v47 = vmul.f32 %v1277_v43, %v3651_v58 }
 0x3a5   : > { %v2857_v9 = vrot.slane %v1239_v32, 9 }
 0x3a6   : > { %v1196_v28 = vstv %s2852_s16  ;;  %s2867_s16 = sld [smem:[#allocation8 + $0x10]] }
 0x3a7   : > { %v1197_v34 = vmul.f32 %v1196_v28, %v3651_v58  ;;  %v1244_v11 = vadd.f32 %v2857_v9, %v1236_v44 }
 0x3a8   : > { %1029 = vrot.lane.b32.xlu0 %v1024_v52, %s3283_s17  ;;  %990 = vrot.lane.b32.xlu1 %v985_v53, %s3282_s24  ;;  %s2862_s24 = sld [smem:[#allocation8 + $0x82]]  ;;  %v2860_v52 = vrot.slane %v1278_v47, 9 }
 0x3a9   : > { %v1205_v8 = vadd.f32 %v2854_v31, %v1197_v34  ;;  %v1249_v50 = vrot.slane %v1244_v11, %v3632_v5  ;;  %v1257_v56 = vrot.slane %v1244_v11, %v3639_v46  ;;  %v1253_v3 = vrot.slane %v1244_v11, %v3634_v1 }
 0x3aa   : > { %v1511_v11 = vstv %s2877_s19  ;;  %s3296_s19 = smov 97  }
 0x3ab   : > { %v1214_v10 = vrot.slane %v1205_v8, %v3634_v1  ;;  %v1210_v51 = vrot.slane %v1205_v8, %v3632_v5  ;;  %v1218_v57 = vrot.slane %v1205_v8, %v3639_v46 }
 0x3ac   : > { %1066 = vrot.lane.b32.xlu0 %v1059_v59, %s3284_s9  ;;  %1027 = vrot.lane.b32.xlu1 %v1020_v60, %s3283_s17  ;;  %s2858_s17 = sld [smem:[#allocation8 + $0x2b]]  ;;  %v1391_v18 = vstv %s2867_s16 }
 0x3ad   : > { %v1392_v26 = vmul.f32 %v1391_v18, %v3628_v33  ;;  %s2883_s16 = sld [smem:[#allocation8 + $0x83]] }
 0x3ae   : > { %v1316_v48 = vstv %s2862_s24  ;;  %s3291_s24 = smov 49  }
 0x3af   : > { %v1317_v53 = vmul.f32 %v1316_v48, %v3628_v33 }
 0x3b0   : > { %1103 = vrot.lane.b32.xlu0 %v1094_v4, %s3285_s13  ;;  %1064 = vrot.lane.b32.xlu1 %v1055_v6, %s3284_s9  ;;  %v1356_v6 = vmul.f32 %v1355_v61, %v3628_v33 }
 0x3b1   : > { %v2863_v60 = vrot.slane %v1317_v53, 9 }
 0x3b2   : > { %v1274_v49 = vstv %s2858_s17  ;;  %s2873_s17 = sld [smem:[#allocation8 + $0x1e]] }
 0x3b3   : > { %v1275_v54 = vmul.f32 %v1274_v49, %v3651_v58  ;;  %v1322_v4 = vadd.f32 %v2863_v60, %v1314_v62 }
 0x3b4   : > { %1107 = vrot.lane.b32.xlu0 %v1102_v15, %s3285_s13  ;;  %1068 = vrot.lane.b32.xlu1 %v1063_v16, %s3284_s9  ;;  %s2868_s9 = sld [smem:[#allocation8 + $0x90]]  ;;  %v2866_v15 = vrot.slane %v1356_v6, 9 }
 0x3b5   : > { %v1283_v59 = vadd.f32 %v2860_v52, %v1275_v54  ;;  %v1327_v13 = vrot.slane %v1322_v4, %v3632_v5  ;;  %v1335_v19 = vrot.slane %v1322_v4, %v3639_v46  ;;  %v1331_v28 = vrot.slane %v1322_v4, %v3634_v1 }
 0x3b6   : > { %v1589_v4 = vstv %s2883_s16  ;;  %s3298_s16 = smov 48  }
 0x3b7   : > { %v1292_v63 = vrot.slane %v1283_v59, %v3634_v1  ;;  %v1288_v14 = vrot.slane %v1283_v59, %v3632_v5  ;;  %v1296_v21 = vrot.slane %v1283_v59, %v3639_v46 }
 0x3b8   : > { %1144 = vrot.lane.b32.xlu0 %v1137_v22, %s3286_s18  ;;  %1105 = vrot.lane.b32.xlu1 %v1098_v24, %s3285_s13  ;;  %s2864_s13 = sld [smem:[#allocation8 + $0x9]]  ;;  %v1469_v9 = vstv %s2873_s17 }
 0x3b9   : > { %v1470_v47 = vmul.f32 %v1469_v9, %v3651_v58  ;;  %s3752_s17 = sld [smem:[#allocation8 + $0x91]] }
 0x3ba   : > { %v1394_v7 = vstv %s2868_s9  ;;  %s3293_s9 = smov 17  }
 0x3bb   : > { %v1395_v16 = vmul.f32 %v1394_v7, %v3628_v33 }
 0x3bc   : > { %1181 = vrot.lane.b32.xlu0 %v1172_v29, %s3287_s12  ;;  %1142 = vrot.lane.b32.xlu1 %v1133_v30, %s3286_s18  ;;  %v1434_v30 = vmul.f32 %v1433_v25, %v3628_v33 }
 0x3bd   : > { %v2869_v24 = vrot.slane %v1395_v16, 9 }
 0x3be   : > { %v1352_v12 = vstv %s2864_s13  ;;  %s2879_s13 = sld [smem:[#allocation8 + $0x2c]] }
 0x3bf   : > { %v1353_v17 = vmul.f32 %v1352_v12, %v3628_v33  ;;  %v1400_v29 = vadd.f32 %v2869_v24, %v1392_v26 }
 0x3c0   : > { %1185 = vrot.lane.b32.xlu0 %v1180_v20, %s3287_s12  ;;  %1146 = vrot.lane.b32.xlu1 %v1141_v2, %s3286_s18  ;;  %s2874_s18 = sld [smem:[#allocation8 + $0x9e]]  ;;  %v2872_v20 = vrot.slane %v1434_v30, 9 }
 0x3c1   : > { %v1361_v22 = vadd.f32 %v2866_v15, %v1353_v17  ;;  %v1405_v34 = vrot.slane %v1400_v29, %v3632_v5  ;;  %v1413_v43 = vrot.slane %v1400_v29, %v3639_v46  ;;  %v1409_v49 = vrot.slane %v1400_v29, %v3634_v1 }
 0x3c3   : > { %v1370_v27 = vrot.slane %v1361_v22, %v3634_v1  ;;  %v1366_v41 = vrot.slane %v1361_v22, %v3632_v5  ;;  %v1374_v44 = vrot.slane %v1361_v22, %v3639_v46 }
 0x3c4   : > { %1221 = vrot.lane.b32.xlu0 %v1214_v10, %s3288_s23  ;;  %1183 = vrot.lane.b32.xlu1 %v1176_v45, %s3287_s12  ;;  %s2870_s12 = sld [smem:[#allocation8 + $0x17]]  ;;  %v1547_v60 = vstv %s2879_s13  ;;  %s3786_s13 = sld [smem:[#allocation8 + $0xa6]] }
 0x3c5   : > { %v1548_v6 = vmul.f32 %v1547_v60, %v3651_v58 }
 0x3c6   : > { %v1472_v31 = vstv %s2874_s18  ;;  %s3295_s18 = smov 113  }
 0x3c7   : > { %v1473_v2 = vmul.f32 %v1472_v31, %v3651_v58 }
 0x3c8   : > { %1258 = vrot.lane.b32.xlu0 %v1249_v50, %s3289_s21  ;;  %1219 = vrot.lane.b32.xlu1 %v1210_v51, %s3288_s23  ;;  %v1512_v51 = vmul.f32 %v1511_v11, %v3651_v58 }
 0x3c9   : > { %v2875_v45 = vrot.slane %v1473_v2, 9 }
 0x3ca   : > { %v1430_v32 = vstv %s2870_s12  ;;  %s3746_s12 = sld [smem:[#allocation8 + $0xa]] }
 0x3cb   : > { %v1431_v8 = vmul.f32 %v1430_v32, %v3628_v33  ;;  %v1478_v50 = vadd.f32 %v2875_v45, %v1470_v47 }
 0x3cc   : > { %1262 = vrot.lane.b32.xlu0 %v1257_v56, %s3289_s21  ;;  %1223 = vrot.lane.b32.xlu1 %v1218_v57, %s3288_s23  ;;  %s2880_s23 = sld [smem:[#allocation8 + $0xac]]  ;;  %v2878_v56 = vrot.slane %v1512_v51, 9 }
 0x3cd   : > { %v1439_v10 = vadd.f32 %v2872_v20, %v1431_v8  ;;  %v1483_v54 = vrot.slane %v1478_v50, %v3632_v5  ;;  %v1491_v61 = vrot.slane %v1478_v50, %v3639_v46  ;;  %v1487_v12 = vrot.slane %v1478_v50, %v3634_v1 }
 0x3cf   : > { %v1448_v48 = vrot.slane %v1439_v10, %v3634_v1  ;;  %v1444_v55 = vrot.slane %v1439_v10, %v3632_v5  ;;  %v1452_v62 = vrot.slane %v1439_v10, %v3639_v46 }
 0x3d0   : > { %1299 = vrot.lane.b32.xlu0 %v1292_v63, %s3290_s10  ;;  %1260 = vrot.lane.b32.xlu1 %v1253_v3, %s3289_s21  ;;  %s2876_s21 = sld [smem:[#allocation8 + $0x25]]  ;;  %v1625_v26 = vstv %s3746_s12  ;;  %s3820_s12 = sld [smem:[#allocation8 + $0x84]] }
 0x3d2   : > { %v1550_v52 = vstv %s2880_s23  ;;  %s3297_s23 = smov 81  }
 0x3d3   : > { %v1551_v57 = vmul.f32 %v1550_v52, %v3651_v58 }
 0x3d4   : > { %1336 = vrot.lane.b32.xlu0 %v1327_v13, %s3291_s24  ;;  %1297 = vrot.lane.b32.xlu1 %v1288_v14, %s3290_s10  ;;  %v1590_v14 = vmul.f32 %v1589_v4, %v3628_v33 }
 0x3d5   : > { %v2881_v3 = vrot.slane %v1551_v57, 9 }
 0x3d6   : > { %v1508_v53 = vstv %s2876_s21  ;;  %v2884_v22 = vrot.slane %v1590_v14, 9  ;;  %s3776_s21 = sld [smem:[#allocation8 + $0x1f]] }
 0x3d7   : > { %v1509_v59 = vmul.f32 %v1508_v53, %v3651_v58  ;;  %v1556_v13 = vadd.f32 %v2881_v3, %v1548_v6 }
 0x3d8   : > { %1340 = vrot.lane.b32.xlu0 %v1335_v19, %s3291_s24  ;;  %1301 = vrot.lane.b32.xlu1 %v1296_v21, %s3290_s10  ;;  %s3738_s10 = sld [smem:[#allocation8 + $0x8a]] }
 0x3d9   : > { %v1517_v63 = vadd.f32 %v2878_v56, %v1509_v59  ;;  %v1561_v19 = vrot.slane %v1556_v13, %v3632_v5  ;;  %v1569_v29 = vrot.slane %v1556_v13, %v3639_v46  ;;  %v1565_v9 = vrot.slane %v1556_v13, %v3634_v1 }
 0x3db   : > { %v1526_v7 = vrot.slane %v1517_v63, %v3634_v1  ;;  %v1522_v21 = vrot.slane %v1517_v63, %v3632_v5  ;;  %v1530_v30 = vrot.slane %v1517_v63, %v3639_v46 }
 0x3dc   : > { %1377 = vrot.lane.b32.xlu0 %v1370_v27, %s3292_s20  ;;  %1338 = vrot.lane.b32.xlu1 %v1331_v28, %s3291_s24  ;;  %s3741_s24 = sld [smem:[#allocation8 + $0x3]]  ;;  %v1729_v53 = vstv %s3776_s21  ;;  %s3857_s21 = sld [smem:[#allocation8 + $0x92]] }
 0x3de   : > { %v1628_v15 = vstv %s3738_s10  ;;  %s3299_s10 = smov 32  }
 0x3df   : > { %v1629_v24 = vmul.f32 %v1628_v15, %v3628_v33 }
 0x3e0   : > { %1414 = vrot.lane.b32.xlu0 %v1405_v34, %s3293_s9  ;;  %1375 = vrot.lane.b32.xlu1 %v1366_v41, %s3292_s20  ;;  %v1666_v34 = vstv %s3752_s17  ;;  %v1626_v41 = vmul.f32 %v1625_v26, %v3628_v33  ;;  %s4716_s17 = smov 16  }
 0x3e1   : > { %v2887_v32 = vrot.slane %v1629_v24, 9 }
 0x3e2   : > { %v1586_v16 = vstv %s3741_s24  ;;  %s3810_s24 = sld [smem:[#allocation8 + $0x2d]] }
 0x3e3   : > { %v1587_v25 = vmul.f32 %v1586_v16, %v3628_v33 }
 0x3e4   : > { %1418 = vrot.lane.b32.xlu0 %v1413_v43, %s3293_s9  ;;  %1379 = vrot.lane.b32.xlu1 %v1374_v44, %s3292_s20  ;;  %s3762_s20 = sld [smem:[#allocation8 + $0x9f]]  ;;  %v1634_v43 = vadd.f32 %v2887_v32, %v1626_v41  ;;  %v1667_v44 = vmul.f32 %v1666_v34, %v3628_v33 }
 0x3e5   : > { %v1595_v31 = vadd.f32 %v2884_v22, %v1587_v25 }
 0x3e6   : > { %v2890_v50 = vrot.slane %v1667_v44, 9  ;;  %v1647_v56 = vrot.slane %v1634_v43, %v3639_v46  ;;  %v1643_v6 = vrot.slane %v1634_v43, %v3634_v1 }
 0x3e7   : > { %v1604_v8 = vrot.slane %v1595_v31, %v3634_v1  ;;  %v1608_v57 = vrot.slane %v1595_v31, %v3639_v46 }
 0x3e8   : > { %1455 = vrot.lane.b32.xlu0 %v1448_v48, %s3294_s22  ;;  %1416 = vrot.lane.b32.xlu1 %v1409_v49, %s3293_s9  ;;  %s3766_s9 = sld [smem:[#allocation8 + $0x11]]  ;;  %v1639_v48 = vrot.slane %v1634_v43, %v3632_v5  ;;  %v1600_v49 = vrot.slane %v1595_v31, %v3632_v5  ;;  %v1807_v26 = vstv %s3810_s24  ;;  %s3883_s24 = sld [smem:[#allocation8 + $0xa0]] }
 0x3ea   : > { %v1732_v10 = vstv %s3762_s20  ;;  %s3301_s20 = smov 112  }
 0x3eb   : > { %v1733_v51 = vmul.f32 %v1732_v10, %v3651_v58 }
 0x3ec   : > { %1492 = vrot.lane.b32.xlu0 %v1483_v54, %s3295_s18  ;;  %1453 = vrot.lane.b32.xlu1 %v1444_v55, %s3294_s22 }
 0x3ed   : > { %v2896_v60 = vrot.slane %v1733_v51, 9 }
 0x3ee   : > { %v1663_v45 = vstv %s3766_s9  ;;  %s3847_s9 = sld [smem:[#allocation8 + $0xb]] }
 0x3ef   : > { %v1664_v52 = vmul.f32 %v1663_v45, %v3628_v33 }
 0x3f0   : > { %1496 = vrot.lane.b32.xlu0 %v1491_v61, %s3295_s18  ;;  %1457 = vrot.lane.b32.xlu1 %v1452_v62, %s3294_s22  ;;  %s3796_s22 = sld [smem:[#allocation8 + $0xad]]  ;;  %v1771_v61 = vstv %s3786_s13  ;;  %v1730_v62 = vmul.f32 %v1729_v53, %v3651_v58  ;;  %s3302_s13 = smov 96  }
 0x3f1   : > { %v1672_v59 = vadd.f32 %v2890_v50, %v1664_v52 }
 0x3f3   : > { %v1681_v4 = vrot.slane %v1672_v59, %v3634_v1  ;;  %v1685_v32 = vrot.slane %v1672_v59, %v3639_v46 }
 0x3f4   : > { %1533 = vrot.lane.b32.xlu0 %v1526_v7, %s3296_s19  ;;  %1494 = vrot.lane.b32.xlu1 %v1487_v12, %s3295_s18  ;;  %s3800_s18 = sld [smem:[#allocation8 + $0x26]]  ;;  %v1738_v7 = vadd.f32 %v2896_v60, %v1730_v62  ;;  %v1772_v12 = vmul.f32 %v1771_v61, %v3651_v58  ;;  %v1885_v62 = vstv %s3847_s9 }
 0x3f5   : > { %s3901_s9 = sld [smem:[#allocation8 + $0x2e]] }
 0x3f6   : > { %v3755_v17 = vpop.permute.xlu0 %792  ;;  %v3757_v18 = vpop.permute.xlu1 %790  ;;  %v1810_v13 = vstv %s3796_s22  ;;  %v2899_v22 = vrot.slane %v1772_v12, 9  ;;  %v1751_v31 = vrot.slane %v1738_v7, %v3639_v46  ;;  %v1747_v45 = vrot.slane %v1738_v7, %v3634_v1  ;;  %s3303_s22 = smov 80  }
 0x3f7   : > { %v1811_v24 = vmul.f32 %v1810_v13, %v3651_v58 }
 0x3f8   : > { %1570 = vrot.lane.b32.xlu0 %v1561_v19, %s3297_s23  ;;  %1531 = vrot.lane.b32.xlu1 %v1522_v21, %s3296_s19  ;;  %v1743_v19 = vrot.slane %v1738_v7, %v3632_v5  ;;  %v1677_v21 = vrot.slane %v1672_v59, %v3632_v5 }
 0x3f9   : > { %v2902_v41 = vrot.slane %v1811_v24, 9 }
 0x3fa   : > { %v3768_v27 = vpop.permute.xlu0 %831  ;;  %v3770_v28 = vpop.permute.xlu1 %794  ;;  %v1768_v14 = vstv %s3800_s18  ;;  %s3881_s18 = sld [smem:[#allocation8 + $0x19]] }
 0x3fb   : > { %v1769_v25 = vmul.f32 %v1768_v14, %v3651_v58 }
 0x3fc   : > { %1574 = vrot.lane.b32.xlu0 %v1569_v29, %s3297_s23  ;;  %1535 = vrot.lane.b32.xlu1 %v1530_v30, %s3296_s19  ;;  %s3831_s19 = sld [smem:[#allocation8 + $0x8b]] }
 0x3fd   : > { %v1777_v34 = vadd.f32 %v2899_v22, %v1769_v25 }
 0x3fe   : > { %v3778_v20 = vpop.permute.xlu0 %868  ;;  %v3780_v2 = vpop.permute.xlu1 %829 }
 0x3ff   : > { %v1786_v10 = vrot.slane %v1777_v34, %v3634_v1  ;;  %v1790_v12 = vrot.slane %v1777_v34, %v3639_v46 }
 0x400   : > { %1611 = vrot.lane.b32.xlu0 %v1604_v8, %s3298_s16  ;;  %1572 = vrot.lane.b32.xlu1 %v1565_v9, %s3297_s23  ;;  %s3836_s23 = sld [smem:[#allocation8 + $0x4]]  ;;  %v1849_v8 = vstv %s3820_s12  ;;  %v1808_v9 = vmul.f32 %v1807_v26, %v3651_v58  ;;  %s3893_s12 = sld [smem:[#allocation8 + $0x20]] }
 0x402   : > { %v3789_v11 = vpop.permute.xlu0 %872  ;;  %v3791_v47 = vpop.permute.xlu1 %833  ;;  %v1888_v50 = vstv %s3831_s19  ;;  %s3304_s19 = smov 47  }
 0x403   : > { %v1889_v60 = vmul.f32 %v1888_v50, %v3628_v33 }
 0x404   : > { %1648 = vrot.lane.b32.xlu0 %v1639_v48, %s3299_s10  ;;  %1609 = vrot.lane.b32.xlu1 %v1600_v49, %s3298_s16  ;;  %v1816_v48 = vadd.f32 %v2902_v41, %v1808_v9  ;;  %v1850_v49 = vmul.f32 %v1849_v8, %v3628_v33 }
 0x405   : > { %v2908_v14 = vrot.slane %v1889_v60, 9 }
 0x406   : > { %v3802_v54 = vpop.permute.xlu0 %909  ;;  %v3804_v55 = vpop.permute.xlu1 %870  ;;  %v1846_v51 = vstv %s3836_s23  ;;  %v2905_v59 = vrot.slane %v1850_v49, 9  ;;  %v1829_v7 = vrot.slane %v1816_v48, %v3639_v46  ;;  %v1825_v26 = vrot.slane %v1816_v48, %v3634_v1  ;;  %s3898_s23 = sld [smem:[#allocation8 + $0xa7]] }
 0x407   : > { %v1847_v61 = vmul.f32 %v1846_v51, %v3628_v33  ;;  %v1963_v51 = vstv %s3881_s18  ;;  %s3939_s18 = sld [smem:[#allocation8 + $0xa1]] }
 0x408   : > { %1652 = vrot.lane.b32.xlu0 %v1647_v56, %s3299_s10  ;;  %1613 = vrot.lane.b32.xlu1 %v1608_v57, %s3298_s16  ;;  %v1821_v56 = vrot.slane %v1816_v48, %v3632_v5  ;;  %v1782_v57 = vrot.slane %v1777_v34, %v3632_v5  ;;  %s3867_s16 = sld [smem:[#allocation8 + $0x99]] }
 0x409   : > { %v1855_v13 = vadd.f32 %v2905_v59, %v1847_v61 }
 0x40a   : > { %v3812_v63 = vpop.permute.xlu0 %947  ;;  %v3814_v3 = vpop.permute.xlu1 %907 }
 0x40b   : > { %v1864_v25 = vrot.slane %v1855_v13, %v3634_v1  ;;  %v1868_v60 = vrot.slane %v1855_v13, %v3639_v46 }
 0x40c   : > { %1688 = vrot.lane.b32.xlu0 %v1681_v4, %s4716_s17  ;;  %1650 = vrot.lane.b32.xlu1 %v1643_v6, %s3299_s10  ;;  %s3871_s10 = sld [smem:[#allocation8 + $0x12]] }
 0x40e   : > { %v3824_v15 = vpop.permute.xlu0 %951  ;;  %v3826_v16 = vpop.permute.xlu1 %911  ;;  %v1966_v34 = vstv %s3867_s16  ;;  %s3914_s16 = sld [smem:[#allocation8 + $0x85]] }
 0x40f   : > { %v1967_v49 = vmul.f32 %v1966_v34, %v3651_v58 }
 0x410   : > { %1752 = vrot.lane.b32.xlu0 %v1743_v19, %s3301_s20  ;;  %1686 = vrot.lane.b32.xlu1 %v1677_v21, %s4716_s17  ;;  %v1927_v19 = vstv %s3857_s21  ;;  %v1886_v21 = vmul.f32 %v1885_v62, %v3628_v33  ;;  %s3910_s21 = sld [smem:[#allocation8 + $0xae]] }
 0x411   : > { %v2914_v62 = vrot.slane %v1967_v49, 9 }
 0x412   : > { %v3838_v29 = vpop.permute.xlu0 %988  ;;  %v3840_v30 = vpop.permute.xlu1 %949  ;;  %v1924_v41 = vstv %s3871_s10  ;;  %s3305_s10 = smov 31  }
 0x413   : > { %v1925_v50 = vmul.f32 %v1924_v41, %v3628_v33 }
 0x414   : > { %1756 = vrot.lane.b32.xlu0 %v1751_v31, %s3301_s20  ;;  %1690 = vrot.lane.b32.xlu1 %v1685_v32, %s4716_s17  ;;  %v1894_v31 = vadd.f32 %v2908_v14, %v1886_v21  ;;  %v1928_v32 = vmul.f32 %v1927_v19, %v3628_v33  ;;  %s3921_s17 = sld [smem:[#allocation8 + $0x8c]]  ;;  %v2044_v14 = vstv %s3898_s23  ;;  %v2002_v19 = vstv %s3893_s12  ;;  %s3306_s12 = smov 15  }
 0x415   : > { %v2045_v49 = vmul.f32 %v2044_v14, %v3651_v58  ;;  %s4241_s23 = sld [smem:[#allocation8 + $0x21]] }
 0x416   : > { %v3849_v43 = vpop.permute.xlu0 %1025  ;;  %v3851_v44 = vpop.permute.xlu1 %986  ;;  %v2911_v48 = vrot.slane %v1928_v32, 9  ;;  %v1907_v33 = vrot.slane %v1894_v31, %v3639_v46  ;;  %v1903_v41 = vrot.slane %v1894_v31, %v3634_v1 }
 0x418   : > { %1793 = vrot.lane.b32.xlu0 %v1786_v10, %s3302_s13  ;;  %1754 = vrot.lane.b32.xlu1 %v1747_v45, %s3301_s20  ;;  %s3896_s20 = sld [smem:[#allocation8 + $0x27]]  ;;  %v1899_v10 = vrot.slane %v1894_v31, %v3632_v5  ;;  %v1860_v45 = vrot.slane %v1855_v13, %v3632_v5  ;;  %v3937_v61 = vadd.f32 %v2911_v48, %v1925_v50  ;;  %v3963_v48 = vand.u32 15, %v3547_v23 }
 0x41a   : > { %v3860_v52 = vpop.permute.xlu0 %1029  ;;  %v3862_v53 = vpop.permute.xlu1 %990  ;;  %v1942_v34 = vrot.slane %v3937_v61, %v3634_v1  ;;  %vm350_vm6 = vcmp.ge.s32.totalorder %v3963_v48, 3  ;;  %vm356_vm1 = vcmp.ge.s32.totalorder %v3963_v48, 2 }
 0x41c   : > { %1830 = vrot.lane.b32.xlu0 %v1821_v56, %s3303_s22  ;;  %1791 = vrot.lane.b32.xlu1 %v1782_v57, %s3302_s13  ;;  %v2005_v56 = vstv %s3883_s24  ;;  %s3941_s24 = sld [smem:[#allocation3]] }
 0x41d   : > { %v2006_v13 = vmul.f32 %v2005_v56, %v3651_v58 }
 0x41e   : > { %v3873_v4 = vpop.permute.xlu0 %1066  ;;  %v3875_v6 = vpop.permute.xlu1 %1027  ;;  %v2041_v21 = vstv %s3896_s20  ;;  %s3308_s20 = smov 111  }
 0x41f   : > { %v2917_v31 = vrot.slane %v2006_v13, 9 }
 0x420   : > { %1834 = vrot.lane.b32.xlu0 %v1829_v7, %s3303_s22  ;;  %1795 = vrot.lane.b32.xlu1 %v1790_v12, %s3302_s13  ;;  %s3912_s13 = sld [smem:[#allocation8 + $0x5]]  ;;  %v325_v7 = vadd.s32 128, %v3547_v23  ;;  %v1964_v12 = vmul.f32 %v1963_v51, %v3651_v58  ;;  %v2122_v51 = vstv %s3914_s16  ;;  %s3313_s16 = smov 14  }
 0x422   : > { %v3885_v22 = vpop.permute.xlu0 %1103  ;;  %v3887_v24 = vpop.permute.xlu1 %1064  ;;  %v3968_v56 = vand.u32 15, %v325_v7 }
 0x424   : > { %1871 = vrot.lane.b32.xlu0 %v1864_v25, %s3304_s19  ;;  %1832 = vrot.lane.b32.xlu1 %v1825_v26, %s3303_s22  ;;  %s3916_s22 = sld [smem:[#allocation8 + $0xc]]  ;;  %v2080_v25 = vstv %s3901_s9  ;;  %vm351_vm8 = vcmp.ge.s32.totalorder %v3968_v56, 3  ;;  %vm357_vm4 = vcmp.ge.s32.totalorder %v3968_v56, 2  ;;  %s4247_s9 = sld [smem:[#allocation8 + $0xa8]] }
 0x426   : > { %v3903_v8 = vpop.permute.xlu0 %1107  ;;  %v3905_v9 = vpop.permute.xlu1 %1068  ;;  %v2119_v50 = vstv %s3912_s13  ;;  %s4278_s13 = sld [smem:[#allocation8 + $0xaf]] }
 0x428   : > { %1908 = vrot.lane.b32.xlu0 %v1899_v10, %s3305_s10  ;;  %1869 = vrot.lane.b32.xlu1 %v1860_v45, %s3304_s19  ;;  %v3959_v10 = vadd.f32 %v2914_v62, %v1964_v12  ;;  %v2083_v45 = vstv %s3910_s21  ;;  %s3312_s21 = smov 30  }
 0x429   : > { %v2084_v62 = vmul.f32 %v2083_v45, %v3651_v58  ;;  %v2920_v45 = vrot.slane %v2045_v49, 9 }
 0x42a   : > { %v3931_v57 = vpop.permute.xlu0 %1144  ;;  %v3933_v59 = vpop.permute.xlu1 %1105  ;;  %v1977_v7 = vrot.slane %v3959_v10, %v3632_v5  ;;  %v1985_v23 = vrot.slane %v3959_v10, %v3639_v46 }
 0x42b   : > { %v2923_v13 = vrot.slane %v2084_v62, 9 }
 0x42c   : > { %1912 = vrot.lane.b32.xlu0 %v1907_v33, %s3305_s10  ;;  %1873 = vrot.lane.b32.xlu1 %v1868_v60, %s3304_s19  ;;  %v2158_v33 = vstv %s3916_s22  ;;  %v764_v60 = vstv %s3941_s24  ;;  %s3307_s19 = smov 127   ;;  %s4288_s22 = sld [smem:[#allocation8 + $0x28]] }
 0x42d   : > { %s3314_s24 = smov 126  }
 0x42e   : > { %v3952_v26 = vpop.permute.xlu0 %1181  ;;  %v3954_v32 = vpop.permute.xlu1 %1142 }
 0x430   : > { %1949 = vrot.lane.b32.xlu0 %v1942_v34, %s3306_s12  ;;  %1910 = vrot.lane.b32.xlu1 %v1903_v41, %s3305_s10  ;;  %v1938_v34 = vrot.slane %v3937_v61, %v3632_v5  ;;  %v2003_v41 = vmul.f32 %v2002_v19, %v3651_v58  ;;  %v2042_v19 = vmul.f32 %v2041_v21, %v3651_v58  ;;  %s4304_s10 = sld [smem:[#allocation8 + $0x2f]] }
 0x431   : > { %v798_v21 = vsel %vm796_vm7, %v3755_v17, %v3770_v28  ;;  %v836_v28 = vsel %vm835_vm9, %v3780_v2, %v3768_v27 }
 0x432   : > { %v3978_v14 = vpop.permute.xlu0 %1185  ;;  %v3980_v0 = vpop.permute.xlu1 %1146  ;;  %v3993_v40 = vadd.f32 %v2917_v31, %v2003_v41  ;;  %v797_v31 = vsel %vm796_vm7, %v3757_v18, %v3755_v17  ;;  %v4011_v62 = vadd.f32 %v2920_v45, %v2042_v19  ;;  %v4013_v41 = vld [vmem:[#allocation2] sm:$0x3f]  ;;  %v1981_v18 = vrot.slane %v3959_v10, %v3634_v1 }
 0x433   : > { %v4016_v36 = vmul.f32 %v4013_v41, %v2119_v50  ;;  %v802_v10 = vsel %vm351_vm8, %v798_v21, 0.0  ;;  %v2123_v19 = vmul.f32 %v4013_v41, %v2122_v51  ;;  %v840_v51 = vsel %vm350_vm6, %v836_v28, 0.0 }
 0x434   : > { %1986 = vrot.lane.b32.xlu0 %v1977_v7, %s3307_s19  ;;  %1947 = vrot.lane.b32.xlu1 %v1938_v34, %s3306_s12  ;;  %v1946_v7 = vrot.slane %v3937_v61, %v3639_v46  ;;  %v2081_v34 = vmul.f32 %v2080_v25, %v3651_v58  ;;  %v2020_v58 = vrot.slane %v3993_v40, %v3634_v1  ;;  %vm1225_vm7 = vcmask 932864  }
 0x435   : > { %v2016_v17 = vrot.slane %v3993_v40, %v3632_v5  ;;  %v837_v61 = vsel %vm835_vm9, %v3768_v27, %v3791_v47  ;;  %v2024_v25 = vrot.slane %v3993_v40, %v3639_v46  ;;  %v4046_v27 = vmul.f32 %v4013_v41, %v2158_v33 }
 0x436   : > { %v3996_v12 = vpop.permute.xlu0 %1221  ;;  %v3998_v49 = vpop.permute.xlu1 %1183  ;;  %v4034_v50 = vadd.f32 %v2923_v13, %v2081_v34  ;;  %v875_v40 = vsel %vm874_vm10, %v3778_v20, %v3804_v55  ;;  %v876_v47 = vsel %vm874_vm10, %v3804_v55, %v3789_v11  ;;  %v2055_v13 = vrot.slane %v4011_v62, %v3632_v5 }
 0x437   : > { %v841_v33 = vsel %vm351_vm8, %v837_v61, 0.0  ;;  %v2059_v20 = vrot.slane %v4011_v62, %v3634_v1  ;;  %v4738_v11 = vstv %s3921_s17  ;;  %v914_v21 = vsel %vm913_vm11, %v3814_v3, %v3802_v54  ;;  %s3309_s17 = smov 95  }
 0x438   : > { %1990 = vrot.lane.b32.xlu0 %v1985_v23, %s3307_s19  ;;  %1951 = vrot.lane.b32.xlu1 %v1946_v7, %s3306_s12  ;;  %v801_v23 = vsel %vm350_vm6, %v797_v31, 0.0  ;;  %v2063_v7 = vrot.slane %v4011_v62, %v3639_v46  ;;  %v2162_v55 = vmul.f32 %v4013_v41, %v4738_v11  ;;  %v804_v31 = vadd.f32 %v802_v10, %v764_v60  ;;  %s4323_s12 = sld [smem:[#allocation8 + $0x8d]] }
 0x439   : > { %v803_v34 = vadd.f32 %v801_v23, %v764_v60  ;;  %v915_v28 = vsel %vm913_vm11, %v3802_v54, %v3826_v16  ;;  %v2098_v3 = vrot.slane %v4034_v50, %v3634_v1  ;;  %v2926_v23 = vrot.slane %v2123_v19, 9 }
 0x43a   : > { %v4040_v45 = vpop.permute.xlu0 %1258  ;;  %v4042_v2 = vpop.permute.xlu1 %1219  ;;  %v843_v16 = vadd.f32 %v841_v33, %v804_v31  ;;  %v954_v10 = vsel %vm953_vm12, %v3812_v63, %v3840_v30  ;;  %v919_v11 = vsel %vm351_vm8, %v915_v28, 0.0  ;;  %v2094_v19 = vrot.slane %v4034_v50, %v3632_v5 }
 0x43b   : > { %v842_v54 = vadd.f32 %v840_v51, %v803_v34  ;;  %v2102_v63 = vrot.slane %v4034_v50, %v3639_v46  ;;  %v994_v33 = vsel %vm992_vm13, %v3838_v29, %v3862_v53  ;;  %v4739_v28 = vstv %s3923_s30  ;;  %s4210_s30 = sld [smem:[#allocation8 + $0x1a]] }
 0x43c   : > { %2027 = vrot.lane.b32.xlu0 %v2020_v58, %s3308_s20  ;;  %1988 = vrot.lane.b32.xlu1 %v1981_v18, %s3307_s19  ;;  %v879_v58 = vsel %vm350_vm6, %v875_v40, 0.0  ;;  %v880_v18 = vsel %vm351_vm8, %v876_v47, 0.0  ;;  %v955_v40 = vsel %vm953_vm12, %v3840_v30, %v3824_v15  ;;  %v918_v47 = vsel %vm350_vm6, %v914_v21, 0.0  ;;  %s3315_s19 = smov 110  }
 0x43d   : > { %v881_v51 = vadd.f32 %v879_v58, %v842_v54  ;;  %v882_v15 = vadd.f32 %v880_v18, %v843_v16  ;;  %v993_v30 = vsel %vm992_vm13, %v3851_v44, %v3838_v29  ;;  %v2929_v21 = vrot.slane %v2162_v55, 9 }
 0x43e   : > { %v4081_v60 = vpop.permute.xlu0 %1262  ;;  %v4083_v61 = vpop.permute.xlu1 %1223  ;;  %v4120_v44 = vmul.f32 %v4013_v41, %v4739_v28  ;;  %v1032_v29 = vsel %vm1031_vm14, %v3849_v43, %v3875_v6  ;;  %v1033_v53 = vsel %vm1031_vm14, %v3875_v6, %v3860_v52  ;;  %v997_v54 = vsel %vm350_vm6, %v993_v30, 0.0 }
 0x43f   : > { %v920_v58 = vadd.f32 %v918_v47, %v881_v51  ;;  %v921_v18 = vadd.f32 %v919_v11, %v882_v15  ;;  %v998_v55 = vsel %vm351_vm8, %v994_v33, 0.0  ;;  %v4135_v16 = vadd.f32 %v2926_v23, %v4016_v36  ;;  %v4155_v51 = vld [vmem:[#allocation2 + $0x2] sm:$0x3f] }
 0x440   : > { %2064 = vrot.lane.b32.xlu0 %v2055_v13, %s3309_s17  ;;  %2025 = vrot.lane.b32.xlu1 %v2016_v17, %s3308_s20  ;;  %v958_v13 = vsel %vm350_vm6, %v954_v10, 0.0  ;;  %v959_v17 = vsel %vm351_vm8, %v955_v40, 0.0  ;;  %v4740_v10 = vstv %s3927_s0  ;;  %v1071_v52 = vsel %vm1070_vm15, %v3887_v24, %v3873_v4  ;;  %s3310_s0 = smov 79  }
 0x441   : > { %v2201_v43 = vmul.f32 %v4013_v41, %v4740_v10  ;;  %v960_v40 = vadd.f32 %v958_v13, %v920_v58  ;;  %v961_v47 = vadd.f32 %v959_v17, %v921_v18  ;;  %v1072_v6 = vsel %vm1070_vm15, %v3873_v4, %v3905_v9 }
 0x442   : > { %v4113_v34 = vpop.permute.xlu0 %1299  ;;  %v4115_v31 = vpop.permute.xlu1 %1260  ;;  %v1037_v36 = vsel %vm351_vm8, %v1033_v53, 0.0  ;;  %v4153_v11 = vadd.f32 %v2929_v21, %v4046_v27  ;;  %v4741_v15 = vstv %s3929_s1  ;;  %v1110_v9 = vsel %vm1109_vm0, %v3885_v22, %v3933_v59  ;;  %s3311_s1 = smov 46  }
 0x443   : > { %v4160_v24 = vmul.f32 %v4155_v51, %v4741_v15  ;;  %v999_v30 = vadd.f32 %v997_v54, %v960_v40  ;;  %v1000_v4 = vadd.f32 %v998_v55, %v961_v47  ;;  %v1111_v33 = vsel %vm1109_vm0, %v3933_v59, %v3903_v8 }
 0x444   : > { %2068 = vrot.lane.b32.xlu0 %v2063_v7, %s3309_s17  ;;  %2029 = vrot.lane.b32.xlu1 %v2024_v25, %s3308_s20  ;;  %v1036_v7 = vsel %vm350_vm6, %v1032_v29, 0.0  ;;  %v1075_v27 = vsel %vm356_vm1, %v1071_v52, 0.0  ;;  %v1076_v13 = vsel %vm357_vm4, %v1072_v6, 0.0  ;;  %v2133_v22 = vrot.slane %v4135_v16, %v3632_v5  ;;  %s4331_s20 = sld [smem:[#allocation8 + $0x6]] }
 0x445   : > { %v2932_v17 = vrot.slane %v2201_v43, 9  ;;  %v1038_v21 = vadd.f32 %v1036_v7, %v999_v30  ;;  %v1039_v8 = vadd.f32 %v1037_v36, %v1000_v4  ;;  %v1149_v59 = vsel %vm1148_vm5, %v3954_v32, %v3931_v57 }
 0x446   : > { %v4150_v25 = vpop.permute.xlu0 %1336  ;;  %v1298_v23 = vpop.permute.xlu1 %1297  ;;  %v1150_v28 = vsel %vm1148_vm5, %v3931_v57, %v3980_v0  ;;  %v1115_v62 = vsel %vm357_vm4, %v1111_v33, 0.0  ;;  %v2141_v18 = vrot.slane %v4135_v16, %v3639_v46  ;;  %v2137_v29 = vrot.slane %v4135_v16, %v3634_v1 }
 0x447   : > { %v1077_v53 = vadd.f32 %v1075_v27, %v1038_v21  ;;  %v1078_v32 = vadd.f32 %v1076_v13, %v1039_v8  ;;  %v1187_v0 = vsel %vm534_vm3, %v3952_v26, %v3998_v49  ;;  %v1188_v57 = vsel %vm534_vm3, %v3998_v49, %v3978_v14 }
 0x448   : > { %2105 = vrot.lane.b32.xlu0 %v2098_v3, %s3310_s0  ;;  %2066 = vrot.lane.b32.xlu1 %v2059_v20, %s3309_s17  ;;  %v1114_v3 = vsel %vm356_vm1, %v1110_v9, 0.0  ;;  %v1153_v54 = vsel %vm356_vm1, %v1149_v59, 0.0  ;;  %v1154_v55 = vsel %vm357_vm4, %v1150_v28, 0.0  ;;  %vm1264_vm6 = vcmask 801792   ;;  %s4343_s17 = sld [smem:[#allocation8 + $0xd]] }
 0x449   : > { %v2176_v26 = vrot.slane %v4153_v11, %v3634_v1  ;;  %v1116_v14 = vadd.f32 %v1114_v3, %v1077_v53  ;;  %v1117_v49 = vadd.f32 %v1115_v62, %v1078_v32  ;;  %v1226_v16 = vsel %vm1225_vm7, %v4042_v2, %v3996_v12 }
 0x44a   : > { %v1341_v20 = vpop.permute.xlu0 %1340  ;;  %v1302_v58 = vpop.permute.xlu1 %1301  ;;  %v1227_v10 = vsel %vm1225_vm7, %v3996_v12, %v4083_v61  ;;  %v1191_v43 = vsel %vm356_vm1, %v1187_v0, 0.0  ;;  %vm1303_vm3 = vcmask 670720   ;;  %v4223_v52 = vadd.f32 %v2932_v17, %v4120_v44 }
 0x44b   : > { %v1155_v6 = vadd.f32 %v1153_v54, %v1116_v14  ;;  %v1156_v7 = vadd.f32 %v1154_v55, %v1117_v49  ;;  %v1265_v2 = vsel %vm1264_vm6, %v4040_v45, %v4115_v31  ;;  %v1266_v12 = vsel %vm1264_vm6, %v4115_v31, %v4081_v60 }
 0x44c   : > { %2142 = vrot.lane.b32.xlu0 %v2133_v22, %s3311_s1  ;;  %2103 = vrot.lane.b32.xlu1 %v2094_v19, %s3310_s0  ;;  %v1192_v19 = vsel %vm357_vm4, %v1188_v57, 0.0  ;;  %v1230_v61 = vsel %vm356_vm1, %v1226_v16, 0.0  ;;  %v1231_v36 = vsel %vm357_vm4, %v1227_v10, 0.0  ;;  %vm362_vm8 = vcmp.ge.s32.totalorder %v3963_v48, 1 }
 0x44d   : > { %vm1342_vm9 = vcmask 400384   ;;  %v1193_v45 = vadd.f32 %v1191_v43, %v1155_v6  ;;  %v1194_v60 = vadd.f32 %v1192_v19, %v1156_v7  ;;  %v1304_v31 = vsel %vm1303_vm3, %v1298_v23, %v4113_v34 }
 0x44e   : > { %v1378_v40 = vpop.permute.xlu0 %1377  ;;  %v1339_v47 = vpop.permute.xlu1 %1338  ;;  %v1305_v44 = vsel %vm1303_vm3, %v4113_v34, %v1302_v58  ;;  %v1269_v15 = vsel %vm356_vm1, %v1265_v2, 0.0  ;;  %v1270_v50 = vsel %vm357_vm4, %v1266_v12, 0.0  ;;  %vm363_vm10 = vcmp.ge.s32.totalorder %v3968_v56, 1 }
 0x44f   : > { %vm1381_vm11 = vcmask 269312   ;;  %v1232_v4 = vadd.f32 %v1230_v61, %v1193_v45  ;;  %v1233_v23 = vadd.f32 %v1231_v36, %v1194_v60  ;;  %v1343_v34 = vsel %vm1342_vm9, %v4150_v25, %v1339_v47 }
 0x450   : > { %2146 = vrot.lane.b32.xlu0 %v2141_v18, %s3311_s1  ;;  %2107 = vrot.lane.b32.xlu1 %v2102_v63, %s3310_s0  ;;  %v1344_v9 = vsel %vm1342_vm9, %v1339_v47, %v1341_v20  ;;  %v1308_v33 = vsel %vm356_vm1, %v1304_v31, 0.0  ;;  %v1309_v27 = vsel %vm357_vm4, %v1305_v44, 0.0  ;;  %v2236_v13 = vstv %s4210_s30  ;;  %s4350_s0 = sld [smem:[#allocation8 + $0x94]]  ;;  %s4361_s30 = sld [smem:[#allocation8 + $0x9b]] }
 0x451   : > { %v4742_v22 = vstv %s3939_s18  ;;  %v1271_v21 = vadd.f32 %v1269_v15, %v1232_v4  ;;  %v1272_v8 = vadd.f32 %v1270_v50, %v1233_v23  ;;  %v2935_v59 = vrot.slane %v4160_v24, 9  ;;  %s4312_s18 = sld [smem:[#allocation8 + $0x86]] }
 0x452   : > { %v1415_v63 = vpop.permute.xlu0 %1414  ;;  %v1376_v30 = vpop.permute.xlu1 %1375  ;;  %v2279_v17 = vmul.f32 %v4155_v51, %v4742_v22  ;;  %v1347_v28 = vsel %vm362_vm8, %v1343_v34, 0.0  ;;  %v1348_v3 = vsel %vm363_vm10, %v1344_v9, 0.0  ;;  %v2211_v58 = vrot.slane %v4223_v52, %v3632_v5 }
 0x453   : > { %v1382_v25 = vsel %vm1381_vm11, %v1376_v30, %v1378_v40  ;;  %v2172_v18 = vrot.slane %v4153_v11, %v3632_v5  ;;  %v1311_v53 = vadd.f32 %v1309_v27, %v1272_v8  ;;  %vm1420_vm12 = vcmask 138240  }
 0x454   : > { %2183 = vrot.lane.b32.xlu0 %v2176_v26, %s3312_s21  ;;  %2144 = vrot.lane.b32.xlu1 %v2137_v29, %s3311_s1  ;;  %v1310_v29 = vadd.f32 %v1308_v33, %v1271_v21  ;;  %v1386_v32 = vsel %vm362_vm8, %v1382_v25, 0.0  ;;  %v2237_v57 = vmul.f32 %v4155_v51, %v2236_v13  ;;  %v2275_v26 = vstv %s4241_s23  ;;  %s3316_s1 = smov 94   ;;  %s3317_s23 = smov 78  }
 0x455   : > { %v1350_v55 = vadd.f32 %v1348_v3, %v1311_v53  ;;  %v2317_v14 = vstv %s4247_s9  ;;  %v2219_v10 = vrot.slane %v4223_v52, %v3639_v46  ;;  %v2180_v43 = vrot.slane %v4153_v11, %v3639_v46  ;;  %s4369_s9 = sld [smem:[#allocation8 + $0x14]] }
 0x456   : > { %v1419_v62 = vpop.permute.xlu0 %1418  ;;  %v1380_v20 = vpop.permute.xlu1 %1379  ;;  %v1349_v54 = vadd.f32 %v1347_v28, %v1310_v29  ;;  %v2245_v19 = vadd.f32 %v2935_v59, %v2237_v57  ;;  %vm1459_vm13 = vcmask 7168   ;;  %v2276_v11 = vmul.f32 %v4155_v51, %v2275_v26 }
 0x457   : > { %v1383_v24 = vsel %vm1381_vm11, %v1378_v40, %v1380_v20  ;;  %v2938_v40 = vrot.slane %v2279_v17, 9  ;;  %v2215_v15 = vrot.slane %v4223_v52, %v3634_v1  ;;  %v2356_v4 = vstv %s4278_s13  ;;  %s4383_s13 = sld [smem:[#allocation8 + $0x1b]] }
 0x458   : > { %v1387_v0 = vsel %vm363_vm10, %v1383_v24, 0.0  ;;  %2220 = vrot.lane.b32.xlu0 %v2211_v58, %s3313_s16  ;;  %2181 = vrot.lane.b32.xlu1 %v2172_v18, %s3312_s21  ;;  %v1388_v47 = vadd.f32 %v1386_v32, %v1349_v54  ;;  %v2254_v44 = vrot.slane %v2245_v19, %v3634_v1  ;;  %v2314_v9 = vstv %s4288_s22  ;;  %s4392_s22 = sld [smem:[#allocation8 + $0xa2]] }
 0x459   : > { %v1389_v6 = vadd.f32 %v1387_v0, %v1350_v55  ;;  %v2284_v50 = vadd.f32 %v2938_v40, %v2276_v11  ;;  %v2250_v13 = vrot.slane %v2245_v19, %v3632_v5  ;;  %v2357_v17 = vmul.f32 %v4155_v51, %v2356_v4 }
 0x45a   : > { %v1456_v49 = vpop.permute.xlu0 %1455  ;;  %v1417_v16 = vpop.permute.xlu1 %1416  ;;  %vm1498_vm14 = vcmask 924672   ;;  %v2315_v25 = vmul.f32 %v4155_v51, %v2314_v9  ;;  %v2353_v28 = vstv %s4304_s10  ;;  %v2258_v58 = vrot.slane %v2245_v19, %v3639_v46  ;;  %s3318_s10 = smov 45  }
 0x45b   : > { %v1421_v7 = vsel %vm1420_vm12, %v1415_v63, %v1417_v16  ;;  %v1422_v2 = vsel %vm1420_vm12, %v1417_v16, %v1419_v62  ;;  %v2318_v63 = vmul.f32 %v4155_v51, %v2317_v14  ;;  %v2289_v27 = vrot.slane %v2284_v50, %v3632_v5 }
 0x45c   : > { %v1425_v12 = vsel %vm362_vm8, %v1421_v7, 0.0  ;;  %v1426_v61 = vsel %vm363_vm10, %v1422_v2, 0.0  ;;  %2224 = vrot.lane.b32.xlu0 %v2219_v10, %s3313_s16  ;;  %2185 = vrot.lane.b32.xlu1 %v2180_v43, %s3312_s21  ;;  %v2297_v20 = vrot.slane %v2284_v50, %v3639_v46  ;;  %v2944_v29 = vrot.slane %v2357_v17, 9  ;;  %s4371_s21 = sld [smem:[#allocation8 + $0x98]] }
 0x45d   : > { %v1427_v36 = vadd.f32 %v1425_v12, %v1388_v47  ;;  %v1428_v45 = vadd.f32 %v1426_v61, %v1389_v6  ;;  %v2941_v22 = vrot.slane %v2318_v63, 9  ;;  %v2395_v32 = vstv %s4312_s18  ;;  %s4402_s18 = sld [smem:[#allocation8 + $0xa9]] }
 0x45e   : > { %v1493_v60 = vpop.permute.xlu0 %1492  ;;  %v1454_v31 = vpop.permute.xlu1 %1453  ;;  %vm1537_vm15 = vcmask 793600   ;;  %v2354_v54 = vmul.f32 %v4155_v51, %v2353_v28  ;;  %v2293_v10 = vrot.slane %v2284_v50, %v3634_v1  ;;  %v2396_v19 = vmul.f32 %v4013_v41, %v2395_v32  ;;  %v1701_v32 = vld [vmem:[#allocation2 + $0x2] sm:$0xf] }
 0x45f   : > { %v1460_v30 = vsel %vm1459_vm13, %v1454_v31, %v1456_v49  ;;  %v2323_v18 = vadd.f32 %v2941_v22, %v2315_v25  ;;  %v2434_v47 = vstv %s4323_s12  ;;  %v2392_v2 = vstv %s4331_s20  ;;  %s4408_s12 = sld [smem:[#allocation8 + $0x22]]  ;;  %s4426_s20 = sld [smem:[#allocation8 + $0xb0]] }
 0x460   : > { %v1464_v23 = vsel %vm362_vm8, %v1460_v30, 0.0  ;;  %2261 = vrot.lane.b32.xlu0 %v2254_v44, %s3314_s24  ;;  %2222 = vrot.lane.b32.xlu1 %v2215_v15, %s3313_s16  ;;  %v2362_v43 = vadd.f32 %v2944_v29, %v2354_v54  ;;  %vm1576_vm0 = vcmask 662528   ;;  %v2393_v15 = vmul.f32 %v4013_v41, %v2392_v2  ;;  %s4385_s16 = sld [smem:[#allocation8 + $0x18]] }
 0x461   : > { %v1466_v34 = vadd.f32 %v1464_v23, %v1427_v36  ;;  %v2332_v16 = vrot.slane %v2323_v18, %v3634_v1  ;;  %v2328_v36 = vrot.slane %v2323_v18, %v3632_v5  ;;  %v2431_v63 = vstv %s4343_s17  ;;  %s3320_s17 = smov 13  }
 0x462   : > { %v1497_v52 = vpop.permute.xlu0 %1496  ;;  %v1458_v33 = vpop.permute.xlu1 %1457  ;;  %v2367_v11 = vrot.slane %v2362_v43, %v3632_v5  ;;  %v2375_v23 = vrot.slane %v2362_v43, %v3639_v46  ;;  %vm1615_vm1 = vcmask 392192   ;;  %v2512_v29 = vstv %s4361_s30  ;;  %s3322_s30 = smov 109  }
 0x463   : > { %v1461_v21 = vsel %vm1459_vm13, %v1456_v49, %v1458_v33  ;;  %vm1692_vm4 = vcmask 130048   ;;  %vm1797_vm5 = vcmask 785408   ;;  %vm1836_vm7 = vcmask 654336  }
 0x464   : > { %v1465_v8 = vsel %vm363_vm10, %v1461_v21, 0.0  ;;  %2298 = vrot.lane.b32.xlu0 %v2289_v27, %s3315_s19  ;;  %2259 = vrot.lane.b32.xlu1 %v2250_v13, %s3314_s24  ;;  %v2473_v13 = vstv %s4350_s0  ;;  %v2432_v21 = vmul.f32 %v4013_v41, %v2431_v63  ;;  %s3321_s0 = smov 125   ;;  %vm1875_vm6 = vcmask 384000  }
 0x465   : > { %v1467_v59 = vadd.f32 %v1465_v8, %v1428_v45  ;;  %v2947_v45 = vrot.slane %v2396_v19, 9  ;;  %v2509_v19 = vstv %s4383_s13  ;;  %vm376_vm3 = vcmp.lt.s32.totalorder %v3963_v48, 15  ;;  %s4743_s13 = sshll.u32 %s3497_s25, 6 }
 0x466   : > { %v1534_v3 = vpop.permute.xlu0 %1533  ;;  %v1495_v62 = vpop.permute.xlu1 %1494  ;;  %vm1914_vm9 = vcmask 252928   ;;  %vm1992_vm11 = vcmask 1039360   ;;  %vm2031_vm12 = vcmask 908288   ;;  %vm2070_vm13 = vcmask 777216  }
 0x467   : > { %v1499_v53 = vsel %vm1498_vm14, %v1493_v60, %v1495_v62  ;;  %v1500_v24 = vsel %vm1498_vm14, %v1495_v62, %v1497_v52  ;;  %v2435_v60 = vmul.f32 %v4013_v41, %v2434_v47  ;;  %v2401_v9 = vadd.f32 %v2947_v45, %v2393_v15 }
 0x468   : > { %v1503_v0 = vsel %vm362_vm8, %v1499_v53, 0.0  ;;  %v1504_v57 = vsel %vm363_vm10, %v1500_v24, 0.0  ;;  %2302 = vrot.lane.b32.xlu0 %v2297_v20, %s3315_s19  ;;  %2263 = vrot.lane.b32.xlu1 %v2258_v58, %s3314_s24  ;;  %v2371_v62 = vrot.slane %v2362_v43, %v3634_v1  ;;  %v2474_v58 = vmul.f32 %v4013_v41, %v2473_v13  ;;  %s3319_s24 = smov 29  }
 0x469   : > { %v1505_v55 = vadd.f32 %v1503_v0, %v1466_v34  ;;  %v1506_v26 = vadd.f32 %v1504_v57, %v1467_v59  ;;  %v2336_v34 = vrot.slane %v2323_v18, %v3639_v46  ;;  %v2950_v52 = vrot.slane %v2435_v60, 9 }
 0x46a   : > { %v1571_v14 = vpop.permute.xlu0 %1570  ;;  %v1532_v49 = vpop.permute.xlu1 %1531  ;;  %v2470_v24 = vstv %s4369_s9  ;;  %v1706_v0 = vstv %s4371_s21  ;;  %v1703_v47 = vstv %s4385_s16  ;;  %v2510_v60 = vmul.f32 %v4155_v51, %v2509_v19  ;;  %s3324_s9 = smov 77   ;;  %s2974_s21 = sshll.u32 %s3391_s6, 10 }
 0x46b   : > { %v1538_v40 = vsel %vm1537_vm15, %v1532_v49, %v1534_v3  ;;  %v2440_v20 = vadd.f32 %v2950_v52, %v2432_v21  ;;  %v2513_v49 = vmul.f32 %v4155_v51, %v2512_v29  ;;  %v2471_v43 = vmul.f32 %v4013_v41, %v2470_v24  ;;  %s311_s16 = scalar_lea.vmem [#allocation9], %s4743_s13  ;;  %s2701_s6 = scalar_lea.sflag [#allocation6], %s3497_s25 }
 0x46c   : > { %v1542_v6 = vsel %vm362_vm8, %v1538_v40, 0.0  ;;  %2339 = vrot.lane.b32.xlu0 %v2332_v16, %s3316_s1  ;;  %2300 = vrot.lane.b32.xlu1 %v2293_v10, %s3315_s19  ;;  %v1707_v40 = vmul.f32 %v1706_v0, %v1701_v32  ;;  %v2551_v41 = vstv %s4392_s22  ;;  %s4419_s19 = sld [smem:[#allocation8 + $0x29]]  ;;  %vm2109_vm14 = vcmask 646144   ;;  %s2714_s22 = sshll.u32 %s311_s16, 4  ;;  %s4660_s22 = int_to_ptr.vmem [resolvable:$true] %s2714_s22 }
 0x46d   : > { %v1544_v7 = vadd.f32 %v1542_v6, %v1505_v55  ;;  %v2445_v55 = vrot.slane %v2440_v20, %v3632_v5  ;;  %v2453_v2 = vrot.slane %v2440_v20, %v3639_v46 }
 0x46e   : > { %v1575_v12 = vpop.permute.xlu0 %1574  ;;  %v1536_v61 = vpop.permute.xlu1 %1535  ;;  %v2893_v15 = vrot.slane %v1707_v40, 9 }
 0x46f   : > { %v1539_v31 = vsel %vm1537_vm15, %v1534_v3, %v1536_v61  ;;  %v2410_v3 = vrot.slane %v2401_v9, %v3634_v1  ;;  %vm2148_vm15 = vcmask 375808  }
 0x470   : > { %v1543_v44 = vsel %vm363_vm10, %v1539_v31, 0.0  ;;  %2376 = vrot.lane.b32.xlu0 %v2367_v11, %s3317_s23  ;;  %2337 = vrot.lane.b32.xlu1 %v2328_v36, %s3316_s1  ;;  %v2956_v11 = vrot.slane %v2513_v49, 9 }
 0x471   : > { %v1545_v50 = vadd.f32 %v1543_v44, %v1506_v26  ;;  %v2406_v26 = vrot.slane %v2401_v9, %v3632_v5 }
 0x472   : > { %v1612_v30 = vpop.permute.xlu0 %1611  ;;  %v1573_v4 = vpop.permute.xlu1 %1572  ;;  %v2587_v24 = vstv %s4419_s19  ;;  %s3325_s19 = smov [#allocation9]  }
 0x473   : > { %v1577_v33 = vsel %vm1576_vm0, %v1571_v14, %v1573_v4  ;;  %v1578_v27 = vsel %vm1576_vm0, %v1573_v4, %v1575_v12  ;;  %v2953_v14 = vrot.slane %v2474_v58, 9  ;;  %v2414_v12 = vrot.slane %v2401_v9, %v3639_v46 }
 0x474   : > { %v1581_v22 = vsel %vm362_vm8, %v1577_v33, 0.0  ;;  %v1582_v17 = vsel %vm363_vm10, %v1578_v27, 0.0  ;;  %2380 = vrot.lane.b32.xlu0 %v2375_v23, %s3317_s23  ;;  %2341 = vrot.lane.b32.xlu1 %v2336_v34, %s3316_s1  ;;  %v2449_v23 = vrot.slane %v2440_v20, %v3634_v1  ;;  %v2518_v34 = vadd.f32 %v2956_v11, %v2510_v60  ;;  %s4443_s1 = sld [smem:[#allocation8 + $0x30]] }
 0x475   : > { %v1583_v8 = vadd.f32 %v1581_v22, %v1544_v7  ;;  %v1584_v25 = vadd.f32 %v1582_v17, %v1545_v50  ;;  %v2479_v61 = vadd.f32 %v2953_v14, %v2471_v43  ;;  %v1704_v50 = vmul.f32 %v1703_v47, %v1701_v32 }
 0x476   : > { %v1649_v59 = vpop.permute.xlu0 %1648  ;;  %v1610_v28 = vpop.permute.xlu1 %1609  ;;  %v2552_v9 = vmul.f32 %v4155_v51, %v2551_v41  ;;  %v2590_v33 = vstv %s4402_s18  ;;  %v2548_v22 = vstv %s4408_s12  ;;  %v2531_v29 = vrot.slane %v2518_v34, %v3639_v46  ;;  %s3196_s12 = scalar_lea.vmem %s4660_s22, 1024 }
 0x477   : > { %v1616_v18 = vsel %vm1615_vm1, %v1610_v28, %v1612_v30  ;;  %v2488_v4 = vrot.slane %v2479_v61, %v3634_v1  ;;  %v1712_v13 = vadd.f32 %v2893_v15, %v1704_v50  ;;  %v2591_v28 = vmul.f32 %v4155_v51, %v2590_v33  ;;  %p3197_p5 = scmp.ne.s32.totalorder %s4660_s22, %s3196_s12 }
 0x478   : > { %v1622_v53 = vadd.f32 %v1616_v18, %v1583_v8  ;;  %2417 = vrot.lane.b32.xlu0 %v2410_v3, %s3318_s10  ;;  %2378 = vrot.lane.b32.xlu1 %v2371_v62, %s3317_s23  ;;  %v2523_v8 = vrot.slane %v2518_v34, %v3632_v5  ;;  %v2549_v62 = vmul.f32 %v4155_v51, %v2548_v22  ;;  %s3323_s23 = smov 93   ;;  %vm377_vm8 = vcmp.lt.s32.totalorder %v3968_v56, 15 }
 0x479   : > { %v1717_v58 = vrot.slane %v1712_v13, %v3632_v5  ;;  %v1721_v18 = vrot.slane %v1712_v13, %v3634_v1  ;;  %v2588_v19 = vmul.f32 %v4155_v51, %v2587_v24  ;;  %vm1953_vm10 = vcmask 121856   ;;  %p3198_p8 = pnand %p3197_p5, %p4747_p12 }
 0x47a   : > { %v1653_v57 = vpop.permute.xlu0 %1652  ;;  %v1614_v54 = vpop.permute.xlu1 %1613  ;;  %vm2187_vm0 = vcmask 244736  }
 0x47b   : > { %v1617_v16 = vsel %vm1615_vm1, %v1612_v30, %v1614_v54  ;;  %vm382_vm1 = vcmp.lt.s32.totalorder %v3963_v48, 14  ;;  %p3199_p9 = pneg %p3198_p8 }
 0x47c   : > { %v1623_v10 = vadd.f32 %v1617_v16, %v1584_v25  ;;  %2454 = vrot.lane.b32.xlu0 %v2445_v55, %s3319_s24  ;;  %2415 = vrot.lane.b32.xlu1 %v2406_v26, %s3318_s10  ;;  %v2484_v25 = vrot.slane %v2479_v61, %v3632_v5  ;;  %v2962_v26 = vrot.slane %v2591_v28, 9  ;;  %v2629_v16 = vstv %s4426_s20  ;;  %s3200_s20 = sshll.u32 %s3325_s19, 4  ;;  %s3201_s20 = int_to_ptr.vmem [resolvable:$false] %s3200_s20 }
 0x47d   : > { %p3203_p10 = scmp.lt.s32.totalorder %s4660_s22, %s3201_s20 }
 0x47e   : > { %v1689_v6 = vpop.permute.xlu0 %1688  ;;  %v1651_v7 = vpop.permute.xlu1 %1650 }
 0x47f   : > { %v1654_v36 = vsel %vm439_vm2, %v1649_v59, %v1651_v7  ;;  %v1655_v45 = vsel %vm439_vm2, %v1651_v7, %v1653_v57  ;;  %v2959_v59 = vrot.slane %v2552_v9, 9  ;;  %vm1758_vm2 = vcmask 916480  }
 0x480   : > { %v1660_v31 = vadd.f32 %v1654_v36, %v1622_v53  ;;  %v1661_v44 = vadd.f32 %v1655_v45, %v1623_v10  ;;  %2458 = vrot.lane.b32.xlu0 %v2453_v2, %s3319_s24  ;;  %2419 = vrot.lane.b32.xlu1 %v2414_v12, %s3318_s10  ;;  %v2492_v53 = vrot.slane %v2479_v61, %v3639_v46  ;;  %v2626_v36 = vstv %s4443_s1 }
 0x481   : > { %v2557_v55 = vadd.f32 %v2959_v59, %v2549_v62  ;;  %v2527_v7 = vrot.slane %v2518_v34, %v3634_v1  ;;  %v2596_v2 = vadd.f32 %v2962_v26, %v2588_v19  ;;  %v2630_v12 = vmul.f32 %v4155_v51, %v2629_v16 }
 0x482   : > { %v1753_v63 = vpop.permute.xlu0 %1752  ;;  %v1687_v30 = vpop.permute.xlu1 %1686 }
 0x483   : > { %v1693_v52 = vsel %vm1692_vm4, %v1687_v30, %v1689_v6  ;;  %v2601_v41 = vrot.slane %v2596_v2, %v3632_v5  ;;  %v2570_v34 = vrot.slane %v2557_v55, %v3639_v46 }
 0x484   : > { %v1699_v27 = vadd.f32 %v1693_v52, %v1660_v31  ;;  %2495 = vrot.lane.b32.xlu0 %v2488_v4, %s3320_s17  ;;  %2456 = vrot.lane.b32.xlu1 %v2449_v23, %s3319_s24  ;;  %v2562_v31 = vrot.slane %v2557_v55, %v3632_v5  ;;  %v2609_v23 = vrot.slane %v2596_v2, %v3639_v46  ;;  %s4654_s24 = scalar_lea.hbm %s4712_s7, %s2974_s21 }
 0x486   : > { %v1757_v17 = vpop.permute.xlu0 %1756  ;;  %v1691_v21 = vpop.permute.xlu1 %1690  ;;  %v1726_v0 = vadd.f32 %v1717_v58, %v1699_v27 }
 0x487   : > { %v1694_v3 = vsel %vm1692_vm4, %v1689_v6, %v1691_v21  ;;  %v2566_v6 = vrot.slane %v2557_v55, %v3634_v1  ;;  %v2605_v21 = vrot.slane %v2596_v2, %v3634_v1  ;;  %vm2226_vm4 = vcmask 113664  }
 0x488   : > { %v1700_v20 = vadd.f32 %v1694_v3, %v1661_v44  ;;  %2532 = vrot.lane.b32.xlu0 %v2523_v8, %s3321_s0  ;;  %2493 = vrot.lane.b32.xlu1 %v2484_v25, %s3320_s17  ;;  %v2965_v44 = vrot.slane %v2630_v12, 9 }
 0x48a   : > { %v1794_v32 = vpop.permute.xlu0 %1793  ;;  %v1727_v57 = vadd.f32 %v1721_v18, %v1700_v20  ;;  %v1755_v54 = vpop.permute.xlu1 %1754 }
 0x48b   : > { %v1759_v14 = vsel %vm1758_vm2, %v1753_v63, %v1755_v54  ;;  %v1760_v49 = vsel %vm1758_vm2, %v1755_v54, %v1757_v17  ;;  %v2627_v63 = vmul.f32 %v4155_v51, %v2626_v36  ;;  %vm2265_vm2 = vcmask 1031168  }
 0x48c   : > { %v1765_v10 = vadd.f32 %v1759_v14, %v1726_v0  ;;  %v1766_v43 = vadd.f32 %v1760_v49, %v1727_v57  ;;  %2536 = vrot.lane.b32.xlu0 %v2531_v29, %s3321_s0  ;;  %2497 = vrot.lane.b32.xlu1 %v2492_v53, %s3320_s17  ;;  %s3202_s17 = scalar_lea.vmem %s3201_s20, 2048 }
 0x48d   : > { %v2635_v9 = vadd.f32 %v2965_v44, %v2627_v63  ;;  %p3204_p1 = scmp.lt.s32.totalorder %s3202_s17, %s3196_s12 }
 0x48e   : > { %v1831_v40 = vpop.permute.xlu0 %1830  ;;  %v1792_v47 = vpop.permute.xlu1 %1791 }
 0x48f   : > { %v1798_v61 = vsel %vm1797_vm5, %v1792_v47, %v1794_v32  ;;  %v2644_v51 = vrot.slane %v2635_v9, %v3634_v1  ;;  %v2640_v62 = vrot.slane %v2635_v9, %v3632_v5  ;;  %v2648_v53 = vrot.slane %v2635_v9, %v3639_v46  ;;  %p3205_p4 = por %p3204_p1, %p3203_p10 }
 0x490   : > { %v1804_v11 = vadd.f32 %v1798_v61, %v1765_v10  ;;  %2573 = vrot.lane.b32.xlu0 %v2566_v6, %s3322_s30  ;;  %2534 = vrot.lane.b32.xlu1 %v2527_v7, %s3321_s0 }
 0x491   : > { %p3206_p11 = pnand %p3205_p4, %p3199_p9 }
 0x492   : > { %v1835_v45 = vpop.permute.xlu0 %1834  ;;  %v1796_v60 = vpop.permute.xlu1 %1795 }
 0x493   : > { %v1799_v15 = vsel %vm1797_vm5, %v1794_v32, %v1796_v60  ;;  %vm383_vm5 = vcmp.lt.s32.totalorder %v3968_v56, 14 }
 0x494   : > { %v1805_v50 = vadd.f32 %v1799_v15, %v1766_v43  ;;  %2610 = vrot.lane.b32.xlu0 %v2601_v41, %s3323_s23  ;;  %2571 = vrot.lane.b32.xlu1 %v2562_v31, %s3322_s30 }
 0x496   : > { %v1872_v30 = vpop.permute.xlu0 %1871  ;;  %v1833_v4 = vpop.permute.xlu1 %1832 }
 0x497   : > { %v1837_v52 = vsel %vm1836_vm7, %v1831_v40, %v1833_v4  ;;  %v1838_v33 = vsel %vm1836_vm7, %v1833_v4, %v1835_v45  ;;  %vm2304_vm7 = vcmask 900096  }
 0x498   : > { %v1843_v27 = vadd.f32 %v1837_v52, %v1804_v11  ;;  %v1844_v13 = vadd.f32 %v1838_v33, %v1805_v50  ;;  %2614 = vrot.lane.b32.xlu0 %v2609_v23, %s3323_s23  ;;  %2575 = vrot.lane.b32.xlu1 %v2570_v34, %s3322_s30 }
 0x49a   : > { %v1909_v22 = vpop.permute.xlu0 %1908  ;;  %v1870_v17 = vpop.permute.xlu1 %1869 }
 0x49b   : > { %v1876_v8 = vsel %vm1875_vm6, %v1870_v17, %v1872_v30 }
 0x49c   : > { %v1880_v25 = vsel %vm376_vm3, %v1876_v8, 0.0  ;;  %2651 = vrot.lane.b32.xlu0 %v2644_v51, %s3324_s9  ;;  %2612 = vrot.lane.b32.xlu1 %v2605_v21, %s3323_s23 }
 0x49d   : > { %v1882_v59 = vadd.f32 %v1880_v25, %v1843_v27 }
 0x49e   : > { %v1913_v28 = vpop.permute.xlu0 %1912  ;;  %v1874_v3 = vpop.permute.xlu1 %1873 }
 0x49f   : > { %v1877_v20 = vsel %vm1875_vm6, %v1872_v30, %v1874_v3  ;;  %vm2343_vm6 = vcmask 769024  }
 0x4a0   : > { %v1881_v1 = vsel %vm377_vm8, %v1877_v20, 0.0  ;;  %2649 = vrot.lane.b32.xlu1 %v2640_v62, %s3324_s9 }
 0x4a1   : > { %v1883_v58 = vadd.f32 %v1881_v1, %v1844_v13 }
 0x4a2   : > { %v1950_v18 = vpop.permute.xlu0 %1949  ;;  %v1911_v29 = vpop.permute.xlu1 %1910 }
 0x4a3   : > { %v1915_v24 = vsel %vm1914_vm9, %v1909_v22, %v1911_v29  ;;  %v1916_v32 = vsel %vm1914_vm9, %v1911_v29, %v1913_v28  ;;  %vm388_vm9 = vcmp.lt.s32.totalorder %v3963_v48, 13 }
 0x4a4   : > { %v1919_v0 = vsel %vm376_vm3, %v1915_v24, 0.0  ;;  %v1920_v57 = vsel %vm377_vm8, %v1916_v32, 0.0  ;;  %2653 = vrot.lane.b32.xlu1 %v2648_v53, %s3324_s9 }
 0x4a5   : > { %v1921_v54 = vadd.f32 %v1919_v0, %v1882_v59  ;;  %v1922_v55 = vadd.f32 %v1920_v57, %v1883_v58 }
 0x4a6   : > { %v1987_v26 = vpop.permute.xlu0 %1986  ;;  %v1948_v14 = vpop.permute.xlu1 %1947 }
 0x4a7   : > { %v1954_v49 = vsel %vm1953_vm10, %v1948_v14, %v1950_v18 }
 0x4a8   : > { %v1958_v16 = vsel %vm376_vm3, %v1954_v49, 0.0 }
 0x4a9   : > { %v1960_v10 = vadd.f32 %v1958_v16, %v1921_v54 }
 0x4aa   : > { %v1991_v46 = vpop.permute.xlu0 %1990  ;;  %v1952_v43 = vpop.permute.xlu1 %1951 }
 0x4ab   : > { %v1955_v19 = vsel %vm1953_vm10, %v1950_v18, %v1952_v43  ;;  %vm2460_vm10 = vcmask 236544  }
 0x4ac   : > { %v1959_v40 = vsel %vm377_vm8, %v1955_v19, 0.0 }
 0x4ad   : > { %v1961_v47 = vadd.f32 %v1959_v40, %v1922_v55 }
 0x4ae   : > { %v2028_v6 = vpop.permute.xlu0 %2027  ;;  %v1989_v7 = vpop.permute.xlu1 %1988 }
 0x4af   : > { %v1993_v2 = vsel %vm1992_vm11, %v1987_v26, %v1989_v7  ;;  %v1994_v12 = vsel %vm1992_vm11, %v1989_v7, %v1991_v46  ;;  %vm2499_vm11 = vcmask 105472  }
 0x4b0   : > { %v1997_v61 = vsel %vm376_vm3, %v1993_v2, 0.0  ;;  %v1998_v11 = vsel %vm377_vm8, %v1994_v12, 0.0 }
 0x4b1   : > { %v1999_v36 = vadd.f32 %v1997_v61, %v1960_v10  ;;  %v2000_v45 = vadd.f32 %v1998_v11, %v1961_v47 }
 0x4b2   : > { %v2065_v60 = vpop.permute.xlu0 %2064  ;;  %v2026_v41 = vpop.permute.xlu1 %2025 }
 0x4b3   : > { %v2032_v31 = vsel %vm2031_vm12, %v2026_v41, %v2028_v6 }
 0x4b4   : > { %v2036_v44 = vsel %vm376_vm3, %v2032_v31, 0.0 }
 0x4b5   : > { %v2038_v15 = vadd.f32 %v2036_v44, %v1999_v36 }
 0x4b6   : > { %v2069_v50 = vpop.permute.xlu0 %2068  ;;  %v2030_v63 = vpop.permute.xlu1 %2029 }
 0x4b7   : > { %v2033_v30 = vsel %vm2031_vm12, %v2028_v6, %v2030_v63  ;;  %vm389_vm12 = vcmp.lt.s32.totalorder %v3968_v56, 13 }
 0x4b8   : > { %v2037_v4 = vsel %vm377_vm8, %v2033_v30, 0.0 }
 0x4b9   : > { %v2039_v23 = vadd.f32 %v2037_v4, %v2000_v45 }
 0x4ba   : > { %v2106_v34 = vpop.permute.xlu0 %2105  ;;  %v2067_v9 = vpop.permute.xlu1 %2066 }
 0x4bb   : > { %v2071_v26 = vsel %vm2070_vm13, %v2065_v60, %v2067_v9  ;;  %v2072_v46 = vsel %vm2070_vm13, %v2067_v9, %v2069_v50  ;;  %vm2538_vm13 = vcmask 1022976  }
 0x4bc   : > { %v2075_v10 = vsel %vm376_vm3, %v2071_v26, 0.0  ;;  %v2076_v12 = vsel %vm377_vm8, %v2072_v46, 0.0 }
 0x4bd   : > { %v2077_v6 = vadd.f32 %v2075_v10, %v2038_v15  ;;  %v2078_v15 = vadd.f32 %v2076_v12, %v2039_v23 }
 0x4be   : > { %v2143_v52 = vpop.permute.xlu0 %2142  ;;  %v2104_v33 = vpop.permute.xlu1 %2103 }
 0x4bf   : > { %v2110_v16 = vsel %vm2109_vm14, %v2104_v33, %v2106_v34 }
 0x4c0   : > { %v2114_v19 = vsel %vm376_vm3, %v2110_v16, 0.0  ;;  %vm2382_vm3 = vcmask 637952  }
 0x4c1   : > { %v2116_v11 = vadd.f32 %v2114_v19, %v2077_v6 }
 0x4c2   : > { %v2147_v27 = vpop.permute.xlu0 %2146  ;;  %v2108_v13 = vpop.permute.xlu1 %2107 }
 0x4c3   : > { %v2111_v7 = vsel %vm2109_vm14, %v2106_v34, %v2108_v13  ;;  %vm2577_vm14 = vcmask 891904  }
 0x4c4   : > { %v2115_v60 = vsel %vm377_vm8, %v2111_v7, 0.0  ;;  %vm2421_vm8 = vcmask 367616  }
 0x4c5   : > { %v2117_v9 = vadd.f32 %v2115_v60, %v2078_v15 }
 0x4c6   : > { %v2184_v22 = vpop.permute.xlu0 %2183  ;;  %v2145_v17 = vpop.permute.xlu1 %2144 }
 0x4c7   : > { %v2149_v43 = vsel %vm2148_vm15, %v2143_v52, %v2145_v17  ;;  %v2150_v36 = vsel %vm2148_vm15, %v2145_v17, %v2147_v27  ;;  %vm2616_vm15 = vcmask 760832  }
 0x4c8   : > { %v2153_v61 = vsel %vm382_vm1, %v2149_v43, 0.0  ;;  %v2154_v4 = vsel %vm383_vm5, %v2150_v36, 0.0 }
 0x4c9   : > { %v2155_v50 = vadd.f32 %v2153_v61, %v2116_v11 }
 0x4ca   : > { %v2221_v51 = vpop.permute.xlu0 %2220  ;;  %v2182_v21 = vpop.permute.xlu1 %2181 }
 0x4cb   : > { %v2188_v2 = vsel %vm2187_vm0, %v2182_v21, %v2184_v22 }
 0x4cc   : > { %v2192_v41 = vsel %vm382_vm1, %v2188_v2, 0.0 }
 0x4cd   : > { %v2194_v52 = vadd.f32 %v2192_v41, %v2155_v50 }
 0x4ce   : > { %v2225_v8 = vpop.permute.xlu0 %2224  ;;  %v2186_v25 = vpop.permute.xlu1 %2185 }
 0x4cf   : > { %v2189_v63 = vsel %vm2187_vm0, %v2184_v22, %v2186_v25  ;;  %vm2655_vm0 = vcmask 629760  }
 0x4d0   : > { %v2193_v27 = vsel %vm383_vm5, %v2189_v63, 0.0 }
 0x4d2   : > { %v4489_v59 = vpop.permute.xlu0 %2261  ;;  %v2223_v28 = vpop.permute.xlu1 %2222 }
 0x4d3   : > { %v2227_v45 = vsel %vm2226_vm4, %v2221_v51, %v2223_v28  ;;  %v2228_v33 = vsel %vm2226_vm4, %v2223_v28, %v2225_v8  ;;  %v2156_v51 = vadd.f32 %v2154_v4, %v2117_v9 }
 0x4d4   : > { %v2231_v34 = vsel %vm382_vm1, %v2227_v45, 0.0  ;;  %v2232_v28 = vsel %vm383_vm5, %v2228_v33, 0.0 }
 0x4d5   : > { %v2233_v21 = vadd.f32 %v2231_v34, %v2194_v52 }
 0x4d6   : > { %v2299_v3 = vpop.permute.xlu0 %2298  ;;  %v2260_v62 = vpop.permute.xlu1 %2259 }
 0x4d7   : > { %v2266_v30 = vsel %vm2265_vm2, %v2260_v62, %v4489_v59  ;;  %v2195_v62 = vadd.f32 %v2193_v27, %v2156_v51 }
 0x4d8   : > { %v2270_v13 = vsel %vm382_vm1, %v2266_v30, 0.0 }
 0x4d9   : > { %v2272_v26 = vadd.f32 %v2270_v13, %v2233_v21  ;;  %v2234_v43 = vadd.f32 %v2232_v28, %v2195_v62 }
 0x4da   : > { %v4491_v20 = vpop.permute.xlu0 %2302  ;;  %v2264_v1 = vpop.permute.xlu1 %2263 }
 0x4db   : > { %v2267_v25 = vsel %vm2265_vm2, %v4489_v59, %v2264_v1 }
 0x4dc   : > { %v2271_v1 = vsel %vm383_vm5, %v2267_v25, 0.0 }
 0x4dd   : > { %v2273_v7 = vadd.f32 %v2271_v1, %v2234_v43 }
 0x4de   : > { %v4493_v58 = vpop.permute.xlu0 %2339  ;;  %v4495_v18 = vpop.permute.xlu1 %2300 }
 0x4df   : > { %v2305_v23 = vsel %vm2304_vm7, %v2299_v3, %v4495_v18  ;;  %v2306_v16 = vsel %vm2304_vm7, %v4495_v18, %v4491_v20 }
 0x4e0   : > { %v2309_v3 = vsel %vm382_vm1, %v2305_v23, 0.0 }
 0x4e1   : > { %v2311_v19 = vadd.f32 %v2309_v3, %v2272_v26 }
 0x4e2   : > { %v4497_v29 = vpop.permute.xlu0 %2376  ;;  %v2338_v53 = vpop.permute.xlu1 %2337 }
 0x4e3   : > { %v2344_v8 = vsel %vm2343_vm6, %v2338_v53, %v4493_v58 }
 0x4e4   : > { %v2348_v53 = vsel %vm382_vm1, %v2344_v8, 0.0 }
 0x4e5   : > { %v2350_v2 = vadd.f32 %v2348_v53, %v2311_v19 }
 0x4e6   : > { %v4499_v24 = vpop.permute.xlu0 %2380  ;;  %v4501_v32 = vpop.permute.xlu1 %2341 }
 0x4e7   : > { %v2345_v20 = vsel %vm2343_vm6, %v4493_v58, %v4501_v32 }
 0x4e8   : > { %v2349_v32 = vsel %vm383_vm5, %v2345_v20, 0.0 }
 0x4ea   : > { %v4503_v0 = vpop.permute.xlu0 %2417  ;;  %v4505_v57 = vpop.permute.xlu1 %2378 }
 0x4eb   : > { %v2383_v59 = vsel %vm2382_vm3, %v4497_v29, %v4505_v57  ;;  %v2310_v29 = vsel %vm383_vm5, %v2306_v16, 0.0  ;;  %v2384_v12 = vsel %vm2382_vm3, %v4505_v57, %v4499_v24 }
 0x4ec   : > { %v2387_v6 = vsel %vm382_vm1, %v2383_v59, 0.0  ;;  %v2312_v36 = vadd.f32 %v2310_v29, %v2273_v7 }
 0x4ed   : > { %v2389_v45 = vadd.f32 %v2387_v6, %v2350_v2 }
 0x4ee   : > { %v4507_v54 = vpop.permute.xlu0 %2454  ;;  %v4509_v55 = vpop.permute.xlu1 %2415  ;;  %v2351_v41 = vadd.f32 %v2349_v32, %v2312_v36 }
 0x4ef   : > { %v2422_v18 = vsel %vm2421_vm8, %v4509_v55, %v4503_v0 }
 0x4f0   : > { %v2426_v55 = vsel %vm388_vm9, %v2422_v18, 0.0 }
 0x4f1   : > { %v2428_v15 = vadd.f32 %v2426_v55, %v2389_v45 }
 0x4f2   : > { %v4511_v14 = vpop.permute.xlu0 %2458  ;;  %v4513_v49 = vpop.permute.xlu1 %2419 }
 0x4f3   : > { %v2423_v24 = vsel %vm2421_vm8, %v4503_v0, %v4513_v49 }
 0x4f4   : > { %v2427_v0 = vsel %vm389_vm12, %v2423_v24, 0.0 }
 0x4f6   : > { %v4522_v40 = vpop.permute.xlu0 %2495  ;;  %v4524_v47 = vpop.permute.xlu1 %2456 }
 0x4f7   : > { %v2461_v58 = vsel %vm2460_vm10, %v4507_v54, %v4524_v47  ;;  %v2388_v54 = vsel %vm383_vm5, %v2384_v12, 0.0  ;;  %v2462_v50 = vsel %vm2460_vm10, %v4524_v47, %v4511_v14 }
 0x4f8   : > { %v2465_v60 = vsel %vm388_vm9, %v2461_v58, 0.0  ;;  %v2390_v30 = vadd.f32 %v2388_v54, %v2351_v41  ;;  %v2466_v14 = vsel %vm389_vm12, %v2462_v50, 0.0 }
 0x4f9   : > { %v2467_v4 = vadd.f32 %v2465_v60, %v2428_v15  ;;  %v4746_v15 = vld [vmem:[#allocation14_spill] sm:$0xff] }
 0x4fa   : > { %v4539_v31 = vpop.permute.xlu0 %2532  ;;  %v2494_v44 = vpop.permute.xlu1 %2493  ;;  %v2429_v52 = vadd.f32 %v2427_v0, %v2390_v30 }
 0x4fb   : > { %v2500_v57 = vsel %vm2499_vm11, %v2494_v44, %v4522_v40 }
 0x4fc   : > { %v2504_v49 = vsel %vm388_vm9, %v2500_v57, 0.0 }
 0x4fd   : > { %v2506_v33 = vadd.f32 %v2504_v49, %v2467_v4 }
 0x4fe   : > { %v2537_v22 = vpop.permute.xlu0 %2536  ;;  %v2498_v17 = vpop.permute.xlu1 %2497 }
 0x4ff   : > { %v2501_v34 = vsel %vm2499_vm11, %v4522_v40, %v2498_v17  ;;  %v2468_v17 = vadd.f32 %v2466_v14, %v2429_v52 }
 0x500   : > { %v2505_v27 = vsel %vm389_vm12, %v2501_v34, 0.0 }
 0x502   : > { %v2574_v10 = vpop.permute.xlu0 %2573  ;;  %v2535_v46 = vpop.permute.xlu1 %2534 }
 0x503   : > { %v2539_v63 = vsel %vm2538_vm13, %v4539_v31, %v2535_v46  ;;  %v2540_v23 = vsel %vm2538_vm13, %v2535_v46, %v2537_v22  ;;  %v2507_v22 = vadd.f32 %v2505_v27, %v2468_v17 }
 0x504   : > { %v2543_v47 = vsel %vm388_vm9, %v2539_v63, 0.0  ;;  %v2544_v8 = vsel %vm389_vm12, %v2540_v23, 0.0 }
 0x505   : > { %v2545_v51 = vadd.f32 %v2543_v47, %v2506_v33  ;;  %v2546_v1 = vadd.f32 %v2544_v8, %v2507_v22 }
 0x506   : > { %v2611_v61 = vpop.permute.xlu0 %2610  ;;  %v2572_v11 = vpop.permute.xlu1 %2571 }
 0x507   : > { %v2578_v9 = vsel %vm2577_vm14, %v2572_v11, %v2574_v10 }
 0x508   : > { %v2582_v40 = vsel %vm388_vm9, %v2578_v9, 0.0 }
 0x509   : > { %v2584_v3 = vadd.f32 %v2582_v40, %v2545_v51 }
 0x50a   : > { %v2576_v44 = vpop.permute.xlu1 %2575  ;;  %v2615_v31 = vpop.permute.xlu0 %2614 }
 0x50b   : > { %v2579_v21 = vsel %vm2577_vm14, %v2574_v10, %v2576_v44 }
 0x50c   : > { %v2583_v26 = vsel %vm389_vm12, %v2579_v21, 0.0 }
 0x50d   : > { %v2585_v19 = vadd.f32 %v2583_v26, %v2546_v1 }
 0x50e   : > { %v2613_v13 = vpop.permute.xlu1 %2612  ;;  %v2652_v16 = vpop.permute.xlu0 %2651 }
 0x50f   : > { %v2617_v25 = vsel %vm2616_vm15, %v2611_v61, %v2613_v13  ;;  %v2618_v62 = vsel %vm2616_vm15, %v2613_v13, %v2615_v31 }
 0x510   : > { %v2621_v28 = vsel %vm388_vm9, %v2617_v25, 0.0  ;;  %v2622_v46 = vsel %vm389_vm12, %v2618_v62, 0.0 }
 0x511   : > { %v2623_v53 = vadd.f32 %v2621_v28, %v2584_v3  ;;  %v2624_v29 = vadd.f32 %v2622_v46, %v2585_v19 }
 0x512   : > { %v2650_v59 = vpop.permute.xlu1 %2649 }
 0x513   : > { %v2656_v10 = vsel %vm2655_vm0, %v2650_v59, %v2652_v16 }
 0x514   : > { %v2660_v43 = vsel %vm388_vm9, %v2656_v10, 0.0 }
 0x515   : > { %v2662_v20 = vadd.f32 %v2660_v43, %v2623_v53 }
 0x516   : > { %v2654_v18 = vpop.permute.xlu1 %2653 }
 0x517   : > { %v2966_v6 = vmul.f32 -1.442695, %v2662_v20  ;;  %v2657_v7 = vsel %vm2655_vm0, %v2652_v16, %v2654_v18 }
 0x518   : > { %v2661_v2 = vsel %vm389_vm12, %v2657_v7, 0.0 }
 0x519   : > { %3141 = vpow2.f32 %v2966_v6  ;;  %v2663_v12 = vadd.f32 %v2661_v2, %v2624_v29 }
 0x51b   : > { %v2967_v58 = vmul.f32 -1.442695, %v2663_v12 }
 0x51d   : > { %3143 = vpow2.f32 %v2967_v58 }
 0x523   : > { %v3142_v32 = vpop.eup %3141 }
 0x524   : > { %v2670_v55 = vadd.f32 1.0, %v3142_v32 }
 0x526   : > { %3145 = vrcp.f32 %v2670_v55 }
 0x527   : > { %v3144_v48 = vpop.eup %3143 }
 0x528   : > { %v2671_v61 = vadd.f32 1.0, %v3144_v48 }
 0x52a   : > { %3147 = vrcp.f32 %v2671_v61 }
 0x530   : > { %v3146_v11 = vpop.eup %3145 }
 0x531   : > { %v2679_v36 = vrot.slane %v3146_v11, %v3632_v5 }
 0x533   : > { %v2684_v45 = vmul.f32 %v2679_v36, %v3593_v37  ;;  %v2686_v56 = vmul.f32 %v2679_v36, %v3587_v35  ;;  %v2688_v24 = vmul.f32 %v2679_v36, %v3609_v42  ;;  %v2690_v57 = vmul.f32 %v2679_v36, %v3599_v39  ;;  %v4744_v37 = vld [vmem:[#allocation13_spill] sm:$0xff]  ;;  %v4745_v42 = vld [vmem:[#allocation15_spill] sm:$0xff] }
 0x534   : > { %v3148_v54 = vpop.eup %3147 }
 0x535   : > { %2692 = vst [vmem:[%s311_s16] sm:$0xff] %v2684_v45  ;;  %2694 = vst [vmem:[%s311_s16 + $0x10] sm:$0xff] %v2686_v56  ;;  %v2683_v60 = vrot.slane %v3148_v54, %v3632_v5 }
 0x536   : > { %2696 = vst [vmem:[%s311_s16 + $0x20] sm:$0xff] %v2688_v24  ;;  %2698 = vst [vmem:[%s311_s16 + $0x30] sm:$0xff] %v2690_v57 }
 0x537   : > { %v2685_v35 = vmul.f32 %v2683_v60, %v3596_v38  ;;  %v2687_v39 = vmul.f32 %v2683_v60, %v4744_v37  ;;  %v2689_v41 = vmul.f32 %v2683_v60, %v4745_v42  ;;  %v2691_v50 = vmul.f32 %v2683_v60, %v4746_v15 }
 0x539   : > { %2693 = vst [vmem:[%s311_s16 + $0x8] sm:$0xff] %v2685_v35  ;;  %2695 = vst [vmem:[%s311_s16 + $0x18] sm:$0xff] %v2687_v39 }
 0x53a   : > { %2697 = vst [vmem:[%s311_s16 + $0x28] sm:$0xff] %v2689_v41  ;;  %2699 = vst [vmem:[%s311_s16 + $0x38] sm:$0xff] %v2691_v50 }
 0x53b   : > { %3209 = shalt.err (!%p3206_p11)
}
 0x53c   : > { %s3210_s0 = scalar_lea.hbm %s4654_s24, 1024  ;;  %s3214_s23 = scalar_lea.hbm %s4712_s7, 2048 }
 0x53d   : > { %p3211_p0 = scmp.ne.s32.totalorder %s4654_s24, %s3210_s0  ;;  %p3215_p6 = scmp.lt.u32.totalorder %s4654_s24, %s4712_s7 }
 0x53e   : > { %p3216_p3 = scmp.lt.u32.totalorder %s3214_s23, %s3210_s0  ;;  %p3218_p5 = scmp.lt.u32.totalorder %s3210_s0, %s4654_s24 }
 0x53f   : > { %p3212_p2 = pnand %p3211_p0, %p4747_p12 }
 0x540   : > { %p3217_p13 = por %p3216_p3, %p3215_p6 }
 0x541   : > { %p3213_p7 = pneg %p3212_p2 }
 0x542   : > { %p3219_p8 = por %p3218_p5, %p3217_p13 }
 0x544   : > { %p3220_p9 = pnand %p3219_p8, %p3213_p7 }
 0x546   : > { %3223 = shalt.err (!%p3220_p9)
}
 0x547   : > { %s3326_s13 = smov 256   ;;  %s4748_s16 = smov 16  }
 0x548   : > { %3016 = dma.vmem_to_hbm [thread:$0]  (%p4747_p12), %s4660_s22, 1024, %s4654_s24, %s2701_s6, %s3326_s13, %s3326_s13, %s4748_s16  }
 0x549 PF: > { %s2729_s10 = sand.u32 1, %s3254_s26   ;;  %p4749_p10 = scmp.ne.s32.totalorder %s4726_s15, 0 }
 0x54a   : > { %p4750_p1 = scmp.ge.s32.totalorder %s3266_s29, 2  ;;  %s2730_s18 = scalar_lea.sflag [#allocation6], %s2729_s10 }
 0x54c   : > { %p3027_p4 = pnand %p4750_p1, %p4749_p10 }
 0x54e   : > { %3249 = dma.done.wait (!%p3027_p4), %s2730_s18, 1024  }
 0x54f   : > { %3251 = vsyncadd (!%p3027_p4), %s2730_s18, 4294966272  ;;  %p22_p11 = scmp.ge.s32.totalorder %s3395_s8, 4   ;;  %s4751_s26 = smov %s3258_s27 }
 0x550   : > { %s4752_s27 = smov %s3262_s28  ;;  %s4753_s28 = smov %s3407_s11 }
 0x551   : > { %s4754_s29 = smov %s3395_s8  ;;  %24 = sbr.rel (!%p22_p11) target bundleno = 10 (0xa), region = 100 }
 0x558   :  { %2735 = vsyncpa [#allocation5], 1 }
 0x559   :  { %2737 = vsyncpa [#allocation5 + $0x1], 1 }
 0x55a   :  { %2738 = vsyncpa [#allocation6], 1 }
 0x55b   :  { %2740 = vsyncpa [#allocation6 + $0x1], 1 }
 0x55c   :  { %2741 = vsyncpa [#allocation7], 1 }
 0x55d   :  { %2743 = vsyncpa [#allocation7 + $0x1], 1 }

</bundles_post_ra>
